<compile_context>
chip_gen: v5e
topology: v5e:2x2
jax: 0.10.0
libtpu: 0.0.40
codegen_flags: <defaults>
</compile_context>

<pallas_src>
import functools

import jax
import jax.numpy as jnp
from jax.experimental import pallas as pl
from jax.experimental.pallas import tpu as pltpu


def bn_relu_kernel(x_ref, gamma_ref, beta_ref, o_ref, *, eps, inv_m, ct):
    # x_ref / o_ref: [ct, L]   (channels on sublanes, N*H*W on lanes)
    # gamma_ref / beta_ref: [C, 1]  (full params, loaded once; sliced per tile)
    c0 = pl.multiple_of(pl.program_id(0) * ct, 8)

    x = x_ref[...].astype(jnp.float32)                          # [ct, L]

    # Pass 1: per-channel mean (single lane-axis reduce -> XLU).
    mean = jnp.sum(x, axis=1, keepdims=True) * inv_m            # [ct, 1]

    # Pass 2: centered variance. x is resident in VMEM, so this only re-reads
    # VMEM (no HBM traffic) and is numerically safer than E[x^2] - E[x]^2.
    centered = x - mean
    var = jnp.sum(centered * centered, axis=1, keepdims=True) * inv_m
    inv_std = jax.lax.rsqrt(var + eps)

    g = gamma_ref[pl.ds(c0, ct), :].astype(jnp.float32)         # [ct, 1]
    b = beta_ref[pl.ds(c0, ct), :].astype(jnp.float32)

    y = centered * (inv_std * g) + b
    o_ref[...] = jnp.maximum(y, 0.0).astype(o_ref.dtype)


def _pick_channel_tile(C, lanes, itemsize, *, target_tiles=2,
                       max_block_bytes=4 * 1024 * 1024):
    """Largest multiple-of-8 divisor of C that (a) yields >= target_tiles grid
    steps and (b) keeps a single (ct, lanes) block under max_block_bytes.
    Falls back to the biggest fitting divisor, then to full C."""
    padded_lanes = max(128, ((lanes + 127) // 128) * 128)

    def block_bytes(t):
        return t * padded_lanes * itemsize

    cands = [t for t in range(8 * (C // 8), 0, -8) if C % t == 0]
    for t in cands:                                 # prefer >= target_tiles
        if C // t >= target_tiles and block_bytes(t) <= max_block_bytes:
            return t
    for t in cands:                                 # else biggest that fits
        if block_bytes(t) <= max_block_bytes:
            return t
    return C                                        # tiny / odd C: single tile


def batchnorm_relu(x_nchw, gamma, beta, *, eps=1e-5):
    N, C, H, W = x_nchw.shape
    HW = H * W
    L = N * HW                                      # per-channel reduction size

    if N == 1:
        # Zero-cost reshape: NCHW with N == 1 is already channel-major.
        x2d = x_nchw.reshape(C, HW)
    else:
        # TODO(synk): for N > 1 this moveaxis is a real HBM transpose; a 3-D
        # [N, Ct, HW] kernel variant would avoid it.
        x2d = jnp.moveaxis(x_nchw, 1, 0).reshape(C, L)

    g2d = gamma.reshape(C, 1).astype(jnp.float32)
    b2d = beta.reshape(C, 1).astype(jnp.float32)

    ct = _pick_channel_tile(C, L, x_nchw.dtype.itemsize)   # 1232 -> 616 (2 tiles)
    grid = (pl.cdiv(C, ct),)

    cost = pl.CostEstimate(
        flops=10 * C * L,
        transcendentals=C,
        bytes_accessed=2 * C * L * x_nchw.dtype.itemsize + 2 * C * 4,
    )

    out2d = pl.pallas_call(
        functools.partial(bn_relu_kernel,
                          eps=float(eps), inv_m=1.0 / float(L), ct=ct),
        out_shape=jax.ShapeDtypeStruct((C, L), x_nchw.dtype),
        grid=grid,
        in_specs=[
            pl.BlockSpec((ct, L), lambda c: (c, 0)),
            pl.BlockSpec((C, 1), lambda c: (0, 0)),   # constant index -> DMA'd once
            pl.BlockSpec((C, 1), lambda c: (0, 0)),
        ],
        out_specs=pl.BlockSpec((ct, L), lambda c: (c, 0)),
        compiler_params=pltpu.CompilerParams(
            dimension_semantics=("parallel",),        # channel tiles independent
        ),
        cost_estimate=cost,
    )(x2d, g2d, b2d)

    if N == 1:
        return out2d.reshape(N, C, H, W)
    return jnp.moveaxis(out2d.reshape(C, N, H, W), 0, 1)


def reference(x_nchw, gamma, beta, eps=1e-5):
    # Pure-JAX reference of PyTorch BatchNorm2d (training mode) + ReLU.
    mean = jnp.mean(x_nchw, axis=(0, 2, 3), keepdims=True)
    var = jnp.mean((x_nchw - mean) ** 2, axis=(0, 2, 3), keepdims=True)
    y = (x_nchw - mean) / jnp.sqrt(var + eps)
    y = y * gamma.reshape(1, -1, 1, 1) + beta.reshape(1, -1, 1, 1)
    return jnp.maximum(y, 0.0)


if __name__ == "__main__":
    # Shapes from the module's forward: x266 ~ [1, 1232, 14, 14] (NCHW).
    N, C, H, W = 1, 1232, 14, 14

    key = jax.random.PRNGKey(0)
    kx, kg, kb = jax.random.split(key, 3)
    x = jax.random.normal(kx, (N, C, H, W), dtype=jnp.float32)
    # Deterministic (non-trivial) affine parameters for BatchNorm2d(1232).
    gamma = 1.0 + 0.05 * jax.random.normal(kg, (C,), dtype=jnp.float32)
    beta = 0.05 * jax.random.normal(kb, (C,), dtype=jnp.float32)

    out = jax.block_until_ready(batchnorm_relu(x, gamma, beta, eps=1e-5))

    ref = reference(x, gamma, beta, eps=1e-5)
    assert out.shape == (N, C, H, W)
    assert jnp.allclose(out, ref, atol=1e-4, rtol=1e-4), "mismatch vs reference"

    print("KERNEL_OK")
</pallas_src>

<mosaic_0001>
module attributes {stable_mosaic.version = 11 : i64} {
  func.func @bn_relu_kernel(%arg0: i32, %arg1: memref<616x196xf32, #tpu.memory_space<vmem>>, %arg2: memref<1232x1xf32, #tpu.memory_space<vmem>>, %arg3: memref<1232x1xf32, #tpu.memory_space<vmem>>, %arg4: memref<616x196xf32, #tpu.memory_space<vmem>>) attributes {dimension_semantics = [#tpu.dimension_semantics<parallel>], iteration_bounds = array<i64: 2>, scalar_prefetch = 0 : i64, scratch_operands = 0 : i64, tpu.core_type = #tpu.core_type<tc>, window_params = [{transform_indices = @transform_0, window_bounds = array<i64: 616, 196>}, {pipeline_mode = #tpu.pipeline_mode<synchronous>, transform_indices = @transform_1, window_bounds = array<i64: 1232, 1>}, {pipeline_mode = #tpu.pipeline_mode<synchronous>, transform_indices = @transform_2, window_bounds = array<i64: 1232, 1>}, {transform_indices = @transform_3, window_bounds = array<i64: 616, 196>}]} {
    %c616_i32 = arith.constant 616 : i32
    %0 = arith.muli %arg0, %c616_i32 : i32
    %1 = tpu.assume_multiple %0, 8 : i32
    %c0 = arith.constant 0 : index
    %c0_0 = arith.constant 0 : index
    %2 = vector.load %arg1[%c0, %c0_0] : memref<616x196xf32, #tpu.memory_space<vmem>>, vector<616x196xf32>
    %cst = arith.constant dense<0.000000e+00> : vector<616xf32>
    %3 = vector.multi_reduction <add>, %2, %cst [1] : vector<616x196xf32> to vector<616xf32>
    %4 = vector.shape_cast %3 : vector<616xf32> to vector<616x1xf32>
    %cst_1 = arith.constant 0.00510204071 : f32
    %5 = vector.broadcast %cst_1 : f32 to vector<616x1xf32>
    %6 = arith.mulf %4, %5 : vector<616x1xf32>
    %7 = vector.broadcast %6 : vector<616x1xf32> to vector<616x196xf32>
    %8 = arith.subf %2, %7 : vector<616x196xf32>
    %9 = arith.mulf %8, %8 : vector<616x196xf32>
    %cst_2 = arith.constant dense<0.000000e+00> : vector<616xf32>
    %10 = vector.multi_reduction <add>, %9, %cst_2 [1] : vector<616x196xf32> to vector<616xf32>
    %11 = vector.shape_cast %10 : vector<616xf32> to vector<616x1xf32>
    %cst_3 = arith.constant 0.00510204071 : f32
    %12 = vector.broadcast %cst_3 : f32 to vector<616x1xf32>
    %13 = arith.mulf %11, %12 : vector<616x1xf32>
    %cst_4 = arith.constant 9.99999974E-6 : f32
    %14 = vector.broadcast %cst_4 : f32 to vector<616x1xf32>
    %15 = arith.addf %13, %14 : vector<616x1xf32>
    %16 = math.rsqrt %15 : vector<616x1xf32>
    %17 = arith.index_cast %1 : i32 to index
    %c0_5 = arith.constant 0 : index
    %18 = vector.load %arg2[%17, %c0_5] : memref<1232x1xf32, #tpu.memory_space<vmem>>, vector<616x1xf32>
    %19 = arith.index_cast %1 : i32 to index
    %c0_6 = arith.constant 0 : index
    %20 = vector.load %arg3[%19, %c0_6] : memref<1232x1xf32, #tpu.memory_space<vmem>>, vector<616x1xf32>
    %21 = arith.mulf %16, %18 : vector<616x1xf32>
    %22 = vector.broadcast %21 : vector<616x1xf32> to vector<616x196xf32>
    %23 = arith.mulf %8, %22 : vector<616x196xf32>
    %24 = vector.broadcast %20 : vector<616x1xf32> to vector<616x196xf32>
    %25 = arith.addf %23, %24 : vector<616x196xf32>
    %cst_7 = arith.constant 0.000000e+00 : f32
    %26 = vector.broadcast %cst_7 : f32 to vector<616x196xf32>
    %27 = arith.maximumf %25, %26 : vector<616x196xf32>
    %c0_8 = arith.constant 0 : index
    %c0_9 = arith.constant 0 : index
    %28 = vector.load %arg4[%c0_8, %c0_9] : memref<616x196xf32, #tpu.memory_space<vmem>>, vector<616x196xf32>
    tpu.vector_store %arg4[%c0_8, %c0_9], %27 {strides = array<i32>} : memref<616x196xf32, #tpu.memory_space<vmem>>, vector<616x196xf32>,
    return
  }
  func.func @transform_0(%arg0: i32) -> (i32, i32) {
    %c0_i32 = arith.constant 0 : i32
    %c0_i32_0 = arith.constant 0 : i32
    return %arg0, %c0_i32 : i32, i32
  }
  func.func @transform_1(%arg0: i32) -> (i32, i32) {
    %c0_i32 = arith.constant 0 : i32
    %c0_i32_0 = arith.constant 0 : i32
    %c0_i32_1 = arith.constant 0 : i32
    return %c0_i32, %c0_i32_0 : i32, i32
  }
  func.func @transform_2(%arg0: i32) -> (i32, i32) {
    %c0_i32 = arith.constant 0 : i32
    %c0_i32_0 = arith.constant 0 : i32
    %c0_i32_1 = arith.constant 0 : i32
    return %c0_i32, %c0_i32_0 : i32, i32
  }
  func.func @transform_3(%arg0: i32) -> (i32, i32) {
    %c0_i32 = arith.constant 0 : i32
    %c0_i32_0 = arith.constant 0 : i32
    return %arg0, %c0_i32 : i32, i32
  }
}

</mosaic_0001>

<bundles_post_ra>
// kernel: tpu_custom_call.1
= control target key start
LH: loop header
LB: loop body
LE: loop exit
PB: predicated region body
PF: predicated region fallthrough
CT: control target
= control target key end

     0   :  { %s4251_s12 = smov 0   ;;  %s8500_s0 = inlined_call_operand.vmem [shape: f32[1232,196], index: 0, kind: input, shape index: {}]   ;;  %s8501_s1 = inlined_call_operand.vmem [shape: f32[1232,1], index: 1, kind: input, shape index: {}]   ;;  %s8502_s2 = inlined_call_operand.vmem [shape: f32[1232,1], index: 2, kind: input, shape index: {}]   ;;  %s8503_s3 = inlined_call_operand.vmem [shape: f32[1232,196], index: 3, kind: output, shape index: {}]  }
   0x1 LB: > { %s3941_s13 = sadd.s32 4294967295, %s4228_s12   ;;  %p3945_p0 = scmp.ge.s32.totalorder %s4228_s12, 1  ;;  %s4228_s12 = sphi %s4251_s12, %s13_s12  }
   0x2   : > { %p139_p1 = scmp.lt.s32.totalorder %s4228_s12, 3 }
   0x4   : > { %p140_p2 = pnand %p3945_p0, %p139_p1 }
   0x6   : > { %143 = sbr.rel (%p140_p2) target bundleno = 986 (0x3da), region = 32 }
   0xb   : > { %s165_s14 = smul.u32 77, %s3941_s13  ;;  %vm334_vm0 = vcmask 556032  }
   0xc   : > { %s5893_s19 = smul.u32 616, %s3941_s13 }
   0xd   : > { %p166_p3 = scmp.lt.s32.totalorder %s165_s14, 153 }
   0xe   : > { %s5922_s22 = scalar_lea.vmem %s8501_s1, %s5893_s19  ;;  %s7776_s25 = scalar_lea.vmem %s8502_s2, %s5893_s19 }
   0xf   : > { %s9314_s14 = smov (!%p166_p3, %s165_s14), 153 }
  0x10   : > { %s3952_s15 = sshll.u32 %s9314_s14, 4 }
  0x11   : > { %s4269_s18 = scalar_lea.vmem %s8500_s0, %s3952_s15  ;;  %s7923_s28 = scalar_lea.vmem %s8503_s3, %s3952_s15 }
  0x12   : > { %v4272_v0 = vld [vmem:[%s4269_s18 + $0x40] sm:$0xff]  ;;  %v4275_v1 = vld [vmem:[%s4269_s18 + $0x48] sm:$0xff]  ;;  %v4297_v10 = vld [vmem:[%s4269_s18 + $0x58] sm:$0xff] }
  0x13   : > { %v4278_v2 = vld [vmem:[%s4269_s18 + $0x20] sm:$0xff]  ;;  %v351_v3 = vsel %vm334_vm0, %v4275_v1, 0.0  ;;  %v4283_v4 = vld [vmem:[%s4269_s18 + $0x28] sm:$0xff]  ;;  %v4302_v13 = vld [vmem:[%s4269_s18 + $0x38] sm:$0xff]  ;;  %v355_v16 = vsel %vm334_vm0, %v4297_v10, 0.0 }
  0x14   : > { %v4286_v5 = vld [vmem:[%s4269_s18] sm:$0xff]  ;;  %v4289_v6 = vld [vmem:[%s4269_s18 + $0x8] sm:$0xff]  ;;  %v352_v7 = vadd.f32 %v351_v3, %v4272_v0  ;;  %v343_v8 = vsel %vm334_vm0, %v4283_v4, 0.0  ;;  %v4305_v14 = vld [vmem:[%s4269_s18 + $0x18] sm:$0xff]  ;;  %v347_v18 = vsel %vm334_vm0, %v4302_v13, 0.0 }
  0x15   : > { %v335_v9 = vsel %vm334_vm0, %v4289_v6, 0.0  ;;  %v344_v11 = vadd.f32 %v343_v8, %v4278_v2  ;;  %v4308_v15 = vld [vmem:[%s4269_s18 + $0x50] sm:$0xff]  ;;  %v339_v20 = vsel %vm334_vm0, %v4305_v14, 0.0  ;;  %v4326_v24 = vld [vmem:[%s4269_s18 + $0x88] sm:$0xff]  ;;  %v4329_v25 = vld [vmem:[%s4269_s18 + $0x78] sm:$0xff] }
  0x16   : > { %v336_v12 = vadd.f32 %v335_v9, %v4286_v5  ;;  %353 = vadd.xlane.f32.xlu2 %v352_v7  ;;  %v4313_v17 = vld [vmem:[%s4269_s18 + $0x30] sm:$0xff]  ;;  %v356_v21 = vadd.f32 %v355_v16, %v4308_v15  ;;  %v4332_v26 = vld [vmem:[%s4269_s18 + $0x68] sm:$0xff]  ;;  %v4335_v27 = vld [vmem:[%s4269_s18 + $0x80] sm:$0xff]  ;;  %v367_v28 = vsel %vm334_vm0, %v4326_v24, 0.0  ;;  %v363_v30 = vsel %vm334_vm0, %v4329_v25, 0.0 }
  0x17   : > { %345 = vadd.xlane.f32.xlu1 %v344_v11  ;;  %v4318_v19 = vld [vmem:[%s4269_s18 + $0x10] sm:$0xff]  ;;  %v348_v22 = vadd.f32 %v347_v18, %v4313_v17  ;;  %v4345_v31 = vld [vmem:[%s4269_s18 + $0x60] sm:$0xff]  ;;  %v359_v32 = vsel %vm334_vm0, %v4332_v26, 0.0  ;;  %v368_v33 = vadd.f32 %v367_v28, %v4335_v27  ;;  %v4353_v36 = vld [vmem:[%s4269_s18 + $0xb8] sm:$0xff] }
  0x18   : > { %337 = vadd.xlane.f32.xlu0 %v336_v12  ;;  %v340_v23 = vadd.f32 %v339_v20, %v4318_v19  ;;  %v4340_v29 = vld [vmem:[%s4269_s18 + $0x70] sm:$0xff]  ;;  %v360_v35 = vadd.f32 %v359_v32, %v4345_v31  ;;  %v4356_v37 = vld [vmem:[%s4269_s18 + $0xa8] sm:$0xff]  ;;  %v4359_v38 = vld [vmem:[%s4269_s18 + $0x98] sm:$0xff]  ;;  %v379_v40 = vsel %vm334_vm0, %v4353_v36, 0.0 }
  0x19   : > { %v364_v34 = vadd.f32 %v363_v30, %v4340_v29  ;;  %v4362_v39 = vld [vmem:[%s4269_s18 + $0xb0] sm:$0xff]  ;;  %v4367_v41 = vld [vmem:[%s4269_s18 + $0xa0] sm:$0xff]  ;;  %v375_v42 = vsel %vm334_vm0, %v4356_v37, 0.0  ;;  %v371_v44 = vsel %vm334_vm0, %v4359_v38, 0.0  ;;  %v4380_v48 = vld [vmem:[%s4269_s18 + $0xe8] sm:$0xff] }
  0x1a   : > { %v4372_v43 = vld [vmem:[%s4269_s18 + $0x90] sm:$0xff]  ;;  %v380_v45 = vadd.f32 %v379_v40, %v4362_v39  ;;  %v376_v46 = vadd.f32 %v375_v42, %v4367_v41  ;;  %v4383_v49 = vld [vmem:[%s4269_s18 + $0xd8] sm:$0xff]  ;;  %v4386_v50 = vld [vmem:[%s4269_s18 + $0xc8] sm:$0xff]  ;;  %v391_v52 = vsel %vm334_vm0, %v4380_v48, 0.0 }
  0x1b   : > { %v372_v47 = vadd.f32 %v371_v44, %v4372_v43  ;;  %v4389_v51 = vld [vmem:[%s4269_s18 + $0xe0] sm:$0xff]  ;;  %v4394_v53 = vld [vmem:[%s4269_s18 + $0xd0] sm:$0xff]  ;;  %v387_v54 = vsel %vm334_vm0, %v4383_v49, 0.0  ;;  %v383_v56 = vsel %vm334_vm0, %v4386_v50, 0.0  ;;  %v4407_v60 = vld [vmem:[%s4269_s18 + $0x118] sm:$0xff] }
  0x1c   : > { %8709 = vst [vmem:[#allocation2_spill] sm:$0xff] %v4394_v53  ;;  %v4399_v55 = vld [vmem:[%s4269_s18 + $0xc0] sm:$0xff]  ;;  %v392_v57 = vadd.f32 %v391_v52, %v4389_v51  ;;  %v388_v58 = vadd.f32 %v387_v54, %v4394_v53  ;;  %v4410_v61 = vld [vmem:[%s4269_s18 + $0x108] sm:$0xff]  ;;  %v4413_v62 = vld [vmem:[%s4269_s18 + $0xf8] sm:$0xff]  ;;  %v403_v3 = vsel %vm334_vm0, %v4407_v60, 0.0 }
  0x1d   : > { %v384_v59 = vadd.f32 %v383_v56, %v4399_v55  ;;  %8710 = vst [vmem:[#allocation3_spill] sm:$0xff] %v4407_v60  ;;  %v4416_v63 = vld [vmem:[%s4269_s18 + $0x110] sm:$0xff]  ;;  %v4421_v7 = vld [vmem:[%s4269_s18 + $0x100] sm:$0xff]  ;;  %v399_v8 = vsel %vm334_vm0, %v4410_v61, 0.0  ;;  %v395_v11 = vsel %vm334_vm0, %v4413_v62, 0.0  ;;  %v4434_v20 = vld [vmem:[%s4269_s18 + $0x148] sm:$0xff] }
  0x1e   : > { %357 = vadd.xlane.f32.xlu2 %v356_v21  ;;  %8711 = vst [vmem:[#allocation4_spill] sm:$0xff] %v4410_v61  ;;  %v4426_v9 = vld [vmem:[%s4269_s18 + $0xf0] sm:$0xff]  ;;  %v404_v12 = vadd.f32 %v403_v3, %v4416_v63  ;;  %v400_v16 = vadd.f32 %v399_v8, %v4421_v7  ;;  %v4437_v21 = vld [vmem:[%s4269_s18 + $0x138] sm:$0xff]  ;;  %v415_v28 = vsel %vm334_vm0, %v4434_v20, 0.0  ;;  %v4475_v54 = vld [vmem:[%s4269_s18 + $0x160] sm:$0xff] }
  0x1f   : > { %349 = vadd.xlane.f32.xlu1 %v348_v22  ;;  %8712 = vst [vmem:[#allocation5_spill] sm:$0xff] %v4416_v63  ;;  %v396_v18 = vadd.f32 %v395_v11, %v4426_v9  ;;  %v4440_v22 = vld [vmem:[%s4269_s18 + $0x128] sm:$0xff]  ;;  %v4448_v30 = vld [vmem:[%s4269_s18 + $0x130] sm:$0xff]  ;;  %v411_v32 = vsel %vm334_vm0, %v4437_v21, 0.0  ;;  %v4461_v44 = vld [vmem:[%s4269_s18 + $0x178] sm:$0xff] }
  0x20   : > { %341 = vadd.xlane.f32.xlu0 %v340_v23  ;;  %8713 = vst [vmem:[#allocation6_spill] sm:$0xff] %v4421_v7  ;;  %v4443_v23 = vld [vmem:[%s4269_s18 + $0x140] sm:$0xff]  ;;  %v412_v40 = vadd.f32 %v411_v32, %v4448_v30  ;;  %v427_v52 = vsel %vm334_vm0, %v4461_v44, 0.0  ;;  %v233_v11 = vld [vmem:[%s4269_s18 + $0x1a8] sm:$0xff]  ;;  %v230_v32 = vld [vmem:[%s4269_s18 + $0x190] sm:$0xff] }
  0x21   : > { %8714 = vst [vmem:[#allocation7_spill] sm:$0xff] %v4426_v9  ;;  %v296_v7 = vld [vmem:[%s4269_s18 + $0x3a0] sm:$0xff]  ;;  %v294_v63 = vld [vmem:[%s4269_s18 + $0x390] sm:$0xff] }
  0x22   : > { %8715 = vst [vmem:[#allocation8_spill] sm:$0xff] %v4434_v20  ;;  %v288_v20 = vld [vmem:[%s4269_s18 + $0x360] sm:$0xff]  ;;  %v302_v61 = vld [vmem:[%s4269_s18 + $0x3d0] sm:$0xff] }
  0x23   : > { %8716 = vst [vmem:[#allocation9_spill] sm:$0xff] %v4437_v21  ;;  %v290_v21 = vld [vmem:[%s4269_s18 + $0x370] sm:$0xff]  ;;  %v300_v60 = vld [vmem:[%s4269_s18 + $0x3c0] sm:$0xff] }
  0x24   : > { %8717 = vst [vmem:[#allocation10_spill] sm:$0xff] %v4440_v22  ;;  %v308_v53 = vld [vmem:[%s4269_s18 + $0x400] sm:$0xff]  ;;  %v306_v9 = vld [vmem:[%s4269_s18 + $0x3f0] sm:$0xff] }
  0x25   : > { %8718 = vst [vmem:[#allocation11_spill] sm:$0xff] %v4443_v23 }
  0x26   : > { %369 = vadd.xlane.f32.xlu2 %v368_v33  ;;  %8719 = vst [vmem:[#allocation12_spill] sm:$0xff] %v4448_v30  ;;  %v4453_v33 = vld [vmem:[%s4269_s18 + $0x120] sm:$0xff] }
  0x27   : > { %365 = vadd.xlane.f32.xlu1 %v364_v34  ;;  %8720 = vst [vmem:[#allocation13_spill] sm:$0xff] %v4453_v33  ;;  %v407_v34 = vsel %vm334_vm0, %v4440_v22, 0.0  ;;  %v284_v30 = vld [vmem:[%s4269_s18 + $0x340] sm:$0xff] }
  0x28   : > { %361 = vadd.xlane.f32.xlu0 %v360_v35  ;;  %v416_v35 = vadd.f32 %v415_v28, %v4443_v23  ;;  %v408_v42 = vadd.f32 %v407_v34, %v4453_v33  ;;  %8721 = vst [vmem:[#allocation14_spill] sm:$0xff] %v4461_v44  ;;  %v439_v28 = vsel %vm334_vm0, %v233_v11, 0.0  ;;  %v276_v44 = vld [vmem:[%s4269_s18 + $0x300] sm:$0xff]  ;;  %v282_v23 = vld [vmem:[%s4269_s18 + $0x330] sm:$0xff] }
  0x29   : > { %8725 = vst [vmem:[#allocation18_spill] sm:$0xff] %v4475_v54 }
  0x2e   : > { %381 = vadd.xlane.f32.xlu2 %v380_v45  ;;  %v4464_v45 = vld [vmem:[%s4269_s18 + $0x168] sm:$0xff] }
  0x2f   : > { %377 = vadd.xlane.f32.xlu1 %v376_v46  ;;  %8722 = vst [vmem:[#allocation15_spill] sm:$0xff] %v4464_v45  ;;  %v4467_v46 = vld [vmem:[%s4269_s18 + $0x158] sm:$0xff]  ;;  %v423_v56 = vsel %vm334_vm0, %v4464_v45, 0.0  ;;  %v278_v45 = vld [vmem:[%s4269_s18 + $0x310] sm:$0xff] }
  0x30   : > { %373 = vadd.xlane.f32.xlu0 %v372_v47  ;;  %8723 = vst [vmem:[#allocation16_spill] sm:$0xff] %v4467_v46  ;;  %v4470_v47 = vld [vmem:[%s4269_s18 + $0x170] sm:$0xff]  ;;  %v424_v3 = vadd.f32 %v423_v56, %v4475_v54 }
  0x31   : > { %8724 = vst [vmem:[#allocation17_spill] sm:$0xff] %v4470_v47 }
  0x36   : > { %393 = vadd.xlane.f32.xlu2 %v392_v57  ;;  %v4480_v57 = vld [vmem:[%s4269_s18 + $0x150] sm:$0xff] }
  0x37   : > { %389 = vadd.xlane.f32.xlu1 %v388_v58  ;;  %8726 = vst [vmem:[#allocation19_spill] sm:$0xff] %v4480_v57  ;;  %v419_v58 = vsel %vm334_vm0, %v4467_v46, 0.0 }
  0x38   : > { %385 = vadd.xlane.f32.xlu0 %v384_v59  ;;  %v428_v59 = vadd.f32 %v427_v52, %v4470_v47  ;;  %v420_v8 = vadd.f32 %v419_v58, %v4480_v57  ;;  %v239_v58 = vld [vmem:[%s4269_s18 + $0x1d8] sm:$0xff]  ;;  %v273_v47 = vld [vmem:[%s4269_s18 + $0x2e8] sm:$0xff] }
  0x39   : > { %v451_v11 = vsel %vm334_vm0, %v239_v58, 0.0  ;;  %v241_v58 = vld [vmem:[%s4269_s18 + $0x1e8] sm:$0xff] }
  0x3e   : > { %405 = vadd.xlane.f32.xlu2 %v404_v12  ;;  %v231_v12 = vld [vmem:[%s4269_s18 + $0x198] sm:$0xff] }
  0x3f   : > { %401 = vadd.xlane.f32.xlu1 %v400_v16  ;;  %v4490_v16 = vld [vmem:[%s4269_s18 + $0x188] sm:$0xff]  ;;  %v435_v34 = vsel %vm334_vm0, %v231_v12, 0.0  ;;  %v236_v12 = vld [vmem:[%s4269_s18 + $0x1c0] sm:$0xff] }
  0x40   : > { %397 = vadd.xlane.f32.xlu0 %v396_v18  ;;  %8727 = vst [vmem:[#allocation20_spill] sm:$0xff] %v4490_v16  ;;  %v232_v18 = vld [vmem:[%s4269_s18 + $0x1a0] sm:$0xff]  ;;  %v436_v52 = vadd.f32 %v435_v34, %v230_v32 }
  0x46   : > { %417 = vadd.xlane.f32.xlu2 %v416_v35  ;;  %v4497_v35 = vld [vmem:[%s4269_s18 + $0x180] sm:$0xff] }
  0x47   : > { %413 = vadd.xlane.f32.xlu1 %v412_v40  ;;  %8728 = vst [vmem:[#allocation21_spill] sm:$0xff] %v4497_v35  ;;  %v431_v40 = vsel %vm334_vm0, %v4490_v16, 0.0 }
  0x48   : > { %409 = vadd.xlane.f32.xlu0 %v408_v42  ;;  %v440_v42 = vadd.f32 %v439_v28, %v232_v18  ;;  %v432_v56 = vadd.f32 %v431_v40, %v4497_v35  ;;  %v4512_v28 = vld [vmem:[%s4269_s18 + $0x1b0] sm:$0xff] }
  0x49   : > { %8730 = vst [vmem:[#allocation23_spill] sm:$0xff] %v4512_v28  ;;  %v242_v35 = vld [vmem:[%s4269_s18 + $0x1f0] sm:$0xff] }
  0x4e   : > { %429 = vadd.xlane.f32.xlu2 %v428_v59  ;;  %v237_v59 = vld [vmem:[%s4269_s18 + $0x1c8] sm:$0xff] }
  0x4f   : > { %425 = vadd.xlane.f32.xlu1 %v424_v3  ;;  %v4505_v3 = vld [vmem:[%s4269_s18 + $0x1b8] sm:$0xff]  ;;  %v447_v18 = vsel %vm334_vm0, %v237_v59, 0.0  ;;  %v244_v59 = vld [vmem:[%s4269_s18 + $0x200] sm:$0xff] }
  0x50   : > { %421 = vadd.xlane.f32.xlu0 %v420_v8  ;;  %8729 = vst [vmem:[#allocation22_spill] sm:$0xff] %v4505_v3  ;;  %v238_v8 = vld [vmem:[%s4269_s18 + $0x1d0] sm:$0xff]  ;;  %v443_v32 = vsel %vm334_vm0, %v4505_v3, 0.0  ;;  %v448_v40 = vadd.f32 %v447_v18, %v236_v12  ;;  %v455_v12 = vsel %vm334_vm0, %v241_v58, 0.0  ;;  %v251_v3 = vld [vmem:[%s4269_s18 + $0x238] sm:$0xff] }
  0x51   : > { %v452_v34 = vadd.f32 %v451_v11, %v238_v8  ;;  %v240_v11 = vld [vmem:[%s4269_s18 + $0x1e0] sm:$0xff] }
  0x56   : > { %441 = vadd.xlane.f32.xlu2 %v440_v42  ;;  %v444_v42 = vadd.f32 %v443_v32, %v4512_v28  ;;  %v456_v28 = vadd.f32 %v455_v12, %v240_v11  ;;  %v257_v12 = vld [vmem:[%s4269_s18 + $0x268] sm:$0xff] }
  0x57   : > { %437 = vadd.xlane.f32.xlu1 %v436_v52  ;;  %v245_v52 = vld [vmem:[%s4269_s18 + $0x208] sm:$0xff] }
  0x58   : > { %433 = vadd.xlane.f32.xlu0 %v432_v56  ;;  %v243_v56 = vld [vmem:[%s4269_s18 + $0x1f8] sm:$0xff]  ;;  %v463_v54 = vsel %vm334_vm0, %v245_v52, 0.0  ;;  %v475_v52 = vsel %vm334_vm0, %v251_v3, 0.0  ;;  %v256_v3 = vld [vmem:[%s4269_s18 + $0x260] sm:$0xff] }
  0x59   : > { %v459_v8 = vsel %vm334_vm0, %v243_v56, 0.0  ;;  %v464_v18 = vadd.f32 %v463_v54, %v244_v59  ;;  %v248_v56 = vld [vmem:[%s4269_s18 + $0x220] sm:$0xff]  ;;  %v246_v54 = vld [vmem:[%s4269_s18 + $0x210] sm:$0xff] }
  0x5a   : > { %v460_v32 = vadd.f32 %v459_v8, %v242_v35 }
  0x5e   : > { %453 = vadd.xlane.f32.xlu2 %v452_v34  ;;  %v249_v34 = vld [vmem:[%s4269_s18 + $0x228] sm:$0xff] }
  0x5f   : > { %449 = vadd.xlane.f32.xlu1 %v448_v40  ;;  %v247_v40 = vld [vmem:[%s4269_s18 + $0x218] sm:$0xff]  ;;  %v471_v58 = vsel %vm334_vm0, %v249_v34, 0.0  ;;  %v254_v34 = vld [vmem:[%s4269_s18 + $0x250] sm:$0xff] }
  0x60   : > { %445 = vadd.xlane.f32.xlu0 %v444_v42  ;;  %v250_v42 = vld [vmem:[%s4269_s18 + $0x230] sm:$0xff]  ;;  %v467_v35 = vsel %vm334_vm0, %v247_v40, 0.0  ;;  %v472_v8 = vadd.f32 %v471_v58, %v248_v56 }
  0x61   : > { %v476_v59 = vadd.f32 %v475_v52, %v250_v42  ;;  %v468_v11 = vadd.f32 %v467_v35, %v246_v54  ;;  %v252_v42 = vld [vmem:[%s4269_s18 + $0x240] sm:$0xff]  ;;  %v263_v35 = vld [vmem:[%s4269_s18 + $0x298] sm:$0xff] }
  0x66   : > { %465 = vadd.xlane.f32.xlu2 %v464_v18  ;;  %v255_v18 = vld [vmem:[%s4269_s18 + $0x258] sm:$0xff] }
  0x67   : > { %461 = vadd.xlane.f32.xlu1 %v460_v32  ;;  %v487_v32 = vsel %vm334_vm0, %v257_v12, 0.0  ;;  %v483_v40 = vsel %vm334_vm0, %v255_v18, 0.0  ;;  %v499_v12 = vsel %vm334_vm0, %v263_v35, 0.0  ;;  %v260_v18 = vld [vmem:[%s4269_s18 + $0x280] sm:$0xff] }
  0x68   : > { %457 = vadd.xlane.f32.xlu0 %v456_v28  ;;  %v253_v28 = vld [vmem:[%s4269_s18 + $0x248] sm:$0xff]  ;;  %v488_v56 = vadd.f32 %v487_v32, %v256_v3  ;;  %v484_v58 = vadd.f32 %v483_v40, %v254_v34  ;;  %v258_v3 = vld [vmem:[%s4269_s18 + $0x270] sm:$0xff] }
  0x69   : > { %v479_v52 = vsel %vm334_vm0, %v253_v28, 0.0 }
  0x6a   : > { %v480_v54 = vadd.f32 %v479_v52, %v252_v42  ;;  %v269_v52 = vld [vmem:[%s4269_s18 + $0x2c8] sm:$0xff] }
  0x6b   : > { %v511_v35 = vsel %vm334_vm0, %v269_v52, 0.0  ;;  %v272_v52 = vld [vmem:[%s4269_s18 + $0x2e0] sm:$0xff] }
  0x6e   : > { %477 = vadd.xlane.f32.xlu2 %v476_v59  ;;  %v261_v59 = vld [vmem:[%s4269_s18 + $0x288] sm:$0xff] }
  0x6f   : > { %473 = vadd.xlane.f32.xlu1 %v472_v8  ;;  %v259_v8 = vld [vmem:[%s4269_s18 + $0x278] sm:$0xff]  ;;  %v495_v28 = vsel %vm334_vm0, %v261_v59, 0.0  ;;  %v266_v59 = vld [vmem:[%s4269_s18 + $0x2b0] sm:$0xff] }
  0x70   : > { %469 = vadd.xlane.f32.xlu0 %v468_v11  ;;  %v262_v11 = vld [vmem:[%s4269_s18 + $0x290] sm:$0xff]  ;;  %v491_v32 = vsel %vm334_vm0, %v259_v8, 0.0  ;;  %v496_v40 = vadd.f32 %v495_v28, %v260_v18 }
  0x71   : > { %v500_v34 = vadd.f32 %v499_v12, %v262_v11  ;;  %v492_v42 = vadd.f32 %v491_v32, %v258_v3  ;;  %v264_v11 = vld [vmem:[%s4269_s18 + $0x2a0] sm:$0xff]  ;;  %v275_v32 = vld [vmem:[%s4269_s18 + $0x2f8] sm:$0xff] }
  0x76   : > { %489 = vadd.xlane.f32.xlu2 %v488_v56  ;;  %v267_v56 = vld [vmem:[%s4269_s18 + $0x2b8] sm:$0xff] }
  0x77   : > { %485 = vadd.xlane.f32.xlu1 %v484_v58  ;;  %v265_v58 = vld [vmem:[%s4269_s18 + $0x2a8] sm:$0xff]  ;;  %v507_v8 = vsel %vm334_vm0, %v267_v56, 0.0  ;;  %v519_v56 = vsel %vm334_vm0, %v273_v47, 0.0  ;;  %v280_v47 = vld [vmem:[%s4269_s18 + $0x320] sm:$0xff] }
  0x78   : > { %481 = vadd.xlane.f32.xlu0 %v480_v54  ;;  %v268_v54 = vld [vmem:[%s4269_s18 + $0x2c0] sm:$0xff]  ;;  %v503_v12 = vsel %vm334_vm0, %v265_v58, 0.0  ;;  %v508_v28 = vadd.f32 %v507_v8, %v266_v59  ;;  %v270_v58 = vld [vmem:[%s4269_s18 + $0x2d0] sm:$0xff] }
  0x79   : > { %v512_v18 = vadd.f32 %v511_v35, %v268_v54  ;;  %v504_v3 = vadd.f32 %v503_v12, %v264_v11  ;;  %v520_v12 = vadd.f32 %v519_v56, %v272_v52 }
  0x7e   : > { %501 = vadd.xlane.f32.xlu2 %v500_v34  ;;  %v271_v34 = vld [vmem:[%s4269_s18 + $0x2d8] sm:$0xff] }
  0x7f   : > { %497 = vadd.xlane.f32.xlu1 %v496_v40  ;;  %v274_v40 = vld [vmem:[%s4269_s18 + $0x2f0] sm:$0xff]  ;;  %v515_v54 = vsel %vm334_vm0, %v271_v34, 0.0 }
  0x80   : > { %493 = vadd.xlane.f32.xlu0 %v492_v42  ;;  %v523_v42 = vsel %vm334_vm0, %v275_v32, 0.0  ;;  %v277_v32 = vld [vmem:[%s4269_s18 + $0x308] sm:$0xff] }
  0x81   : > { %v524_v11 = vadd.f32 %v523_v42, %v274_v40  ;;  %v527_v40 = vsel %vm334_vm0, %v277_v32, 0.0 }
  0x86   : > { %513 = vadd.xlane.f32.xlu2 %v512_v18  ;;  %v516_v18 = vadd.f32 %v515_v54, %v270_v58 }
  0x87   : > { %509 = vadd.xlane.f32.xlu1 %v508_v28  ;;  %v281_v28 = vld [vmem:[%s4269_s18 + $0x328] sm:$0xff] }
  0x88   : > { %505 = vadd.xlane.f32.xlu0 %v504_v3  ;;  %v279_v3 = vld [vmem:[%s4269_s18 + $0x318] sm:$0xff]  ;;  %v535_v34 = vsel %vm334_vm0, %v281_v28, 0.0 }
  0x89   : > { %v4571_v35 = vpop.xlane.xlu2 %353  ;;  %v531_v16 = vsel %vm334_vm0, %v279_v3, 0.0  ;;  %v536_v58 = vadd.f32 %v535_v34, %v280_v47  ;;  %v283_v28 = vld [vmem:[%s4269_s18 + $0x338] sm:$0xff]  ;;  %v286_v3 = vld [vmem:[%s4269_s18 + $0x350] sm:$0xff] }
  0x8a   : > { %v4573_v59 = vpop.xlane.xlu1 %345  ;;  %v532_v54 = vadd.f32 %v531_v16, %v278_v45 }
  0x8b   : > { %v4575_v8 = vpop.xlane.xlu0 %337 }
  0x8e   : > { %525 = vadd.xlane.f32.xlu2 %v524_v11  ;;  %v528_v11 = vadd.f32 %v527_v40, %v276_v44  ;;  %v539_v44 = vsel %vm334_vm0, %v283_v28, 0.0 }
  0x8f   : > { %521 = vadd.xlane.f32.xlu1 %v520_v12  ;;  %v287_v12 = vld [vmem:[%s4269_s18 + $0x358] sm:$0xff] }
  0x90   : > { %517 = vadd.xlane.f32.xlu0 %v516_v18  ;;  %v285_v18 = vld [vmem:[%s4269_s18 + $0x348] sm:$0xff]  ;;  %v547_v32 = vsel %vm334_vm0, %v287_v12, 0.0 }
  0x91   : > { %v4586_v42 = vpop.xlane.xlu2 %357  ;;  %v543_v57 = vsel %vm334_vm0, %v285_v18, 0.0  ;;  %v548_v34 = vadd.f32 %v547_v32, %v286_v3  ;;  %v289_v12 = vld [vmem:[%s4269_s18 + $0x368] sm:$0xff]  ;;  %v292_v18 = vld [vmem:[%s4269_s18 + $0x380] sm:$0xff] }
  0x92   : > { %v4588_v52 = vpop.xlane.xlu1 %349  ;;  %v544_v40 = vadd.f32 %v543_v57, %v284_v30 }
  0x93   : > { %v4590_v56 = vpop.xlane.xlu0 %341 }
  0x96   : > { %537 = vadd.xlane.f32.xlu2 %v536_v58  ;;  %v540_v58 = vadd.f32 %v539_v44, %v282_v23  ;;  %v551_v23 = vsel %vm334_vm0, %v289_v12, 0.0 }
  0x97   : > { %533 = vadd.xlane.f32.xlu1 %v532_v54  ;;  %v293_v54 = vld [vmem:[%s4269_s18 + $0x388] sm:$0xff] }
  0x98   : > { %529 = vadd.xlane.f32.xlu0 %v528_v11  ;;  %v291_v11 = vld [vmem:[%s4269_s18 + $0x378] sm:$0xff]  ;;  %v559_v28 = vsel %vm334_vm0, %v293_v54, 0.0 }
  0x99   : > { %v4601_v45 = vpop.xlane.xlu2 %369  ;;  %v555_v46 = vsel %vm334_vm0, %v291_v11, 0.0  ;;  %v560_v32 = vadd.f32 %v559_v28, %v292_v18  ;;  %v295_v54 = vld [vmem:[%s4269_s18 + $0x398] sm:$0xff]  ;;  %v298_v11 = vld [vmem:[%s4269_s18 + $0x3b0] sm:$0xff] }
  0x9a   : > { %v4603_v16 = vpop.xlane.xlu1 %365  ;;  %v556_v44 = vadd.f32 %v555_v46, %v290_v21 }
  0x9b   : > { %v4605_v47 = vpop.xlane.xlu0 %361 }
  0x9e   : > { %549 = vadd.xlane.f32.xlu2 %v548_v34  ;;  %v552_v34 = vadd.f32 %v551_v23, %v288_v20  ;;  %v563_v20 = vsel %vm334_vm0, %v295_v54, 0.0 }
  0x9f   : > { %545 = vadd.xlane.f32.xlu1 %v544_v40  ;;  %v299_v40 = vld [vmem:[%s4269_s18 + $0x3b8] sm:$0xff] }
  0xa0   : > { %541 = vadd.xlane.f32.xlu0 %v540_v58  ;;  %v297_v58 = vld [vmem:[%s4269_s18 + $0x3a8] sm:$0xff]  ;;  %v571_v12 = vsel %vm334_vm0, %v299_v40, 0.0 }
  0xa1   : > { %v4616_v30 = vpop.xlane.xlu2 %381  ;;  %v567_v33 = vsel %vm334_vm0, %v297_v58, 0.0  ;;  %v572_v28 = vadd.f32 %v571_v12, %v298_v11  ;;  %v301_v40 = vld [vmem:[%s4269_s18 + $0x3c8] sm:$0xff]  ;;  %v304_v58 = vld [vmem:[%s4269_s18 + $0x3e0] sm:$0xff] }
  0xa2   : > { %v4618_v57 = vpop.xlane.xlu1 %377  ;;  %v568_v23 = vadd.f32 %v567_v33, %v296_v7 }
  0xa3   : > { %v4620_v3 = vpop.xlane.xlu0 %373 }
  0xa6   : > { %561 = vadd.xlane.f32.xlu2 %v560_v32  ;;  %v564_v32 = vadd.f32 %v563_v20, %v294_v63  ;;  %v575_v63 = vsel %vm334_vm0, %v301_v40, 0.0 }
  0xa7   : > { %557 = vadd.xlane.f32.xlu1 %v556_v44  ;;  %v305_v44 = vld [vmem:[%s4269_s18 + $0x3e8] sm:$0xff] }
  0xa8   : > { %553 = vadd.xlane.f32.xlu0 %v552_v34  ;;  %v303_v34 = vld [vmem:[%s4269_s18 + $0x3d8] sm:$0xff]  ;;  %v583_v54 = vsel %vm334_vm0, %v305_v44, 0.0 }
  0xa9   : > { %v4631_v21 = vpop.xlane.xlu2 %393  ;;  %v579_v22 = vsel %vm334_vm0, %v303_v34, 0.0  ;;  %v584_v12 = vadd.f32 %v583_v54, %v304_v58  ;;  %v307_v44 = vld [vmem:[%s4269_s18 + $0x3f8] sm:$0xff]  ;;  %v310_v34 = vld [vmem:[%s4269_s18 + $0x410] sm:$0xff] }
  0xaa   : > { %v4633_v46 = vpop.xlane.xlu1 %389  ;;  %v580_v20 = vadd.f32 %v579_v22, %v302_v61 }
  0xab   : > { %v4635_v18 = vpop.xlane.xlu0 %385 }
  0xae   : > { %573 = vadd.xlane.f32.xlu2 %v572_v28  ;;  %v576_v28 = vadd.f32 %v575_v63, %v300_v60  ;;  %v587_v60 = vsel %vm334_vm0, %v307_v44, 0.0 }
  0xaf   : > { %569 = vadd.xlane.f32.xlu1 %v568_v23  ;;  %v311_v23 = vld [vmem:[%s4269_s18 + $0x418] sm:$0xff] }
  0xb0   : > { %565 = vadd.xlane.f32.xlu0 %v564_v32  ;;  %v309_v32 = vld [vmem:[%s4269_s18 + $0x408] sm:$0xff]  ;;  %v595_v40 = vsel %vm334_vm0, %v311_v23, 0.0 }
  0xb1   : > { %v4646_v7 = vpop.xlane.xlu2 %405  ;;  %v596_v54 = vadd.f32 %v595_v40, %v310_v34  ;;  %v313_v23 = vld [vmem:[%s4269_s18 + $0x428] sm:$0xff] }
  0xb2   : > { %8731 = vst [vmem:[#allocation24_spill] sm:$0xff] %v4646_v7  ;;  %v4648_v33 = vpop.xlane.xlu1 %401 }
  0xb3   : > { %8732 = vst [vmem:[#allocation25_spill] sm:$0xff] %v4648_v33  ;;  %v4650_v11 = vpop.xlane.xlu0 %397  ;;  %v591_v33 = vsel %vm334_vm0, %v309_v32, 0.0  ;;  %v316_v32 = vld [vmem:[%s4269_s18 + $0x440] sm:$0xff] }
  0xb4   : > { %v592_v63 = vadd.f32 %v591_v33, %v308_v53  ;;  %v599_v53 = vsel %vm334_vm0, %v313_v23, 0.0 }
  0xb6   : > { %585 = vadd.xlane.f32.xlu2 %v584_v12  ;;  %v588_v12 = vadd.f32 %v587_v60, %v306_v9 }
  0xb7   : > { %581 = vadd.xlane.f32.xlu1 %v580_v20  ;;  %v317_v20 = vld [vmem:[%s4269_s18 + $0x448] sm:$0xff] }
  0xb8   : > { %577 = vadd.xlane.f32.xlu0 %v576_v28  ;;  %v315_v28 = vld [vmem:[%s4269_s18 + $0x438] sm:$0xff]  ;;  %v607_v44 = vsel %vm334_vm0, %v317_v20, 0.0 }
  0xb9   : > { %v4661_v61 = vpop.xlane.xlu2 %417  ;;  %v608_v40 = vadd.f32 %v607_v44, %v316_v32  ;;  %v319_v20 = vld [vmem:[%s4269_s18 + $0x458] sm:$0xff] }
  0xba   : > { %8733 = vst [vmem:[#allocation26_spill] sm:$0xff] %v4661_v61  ;;  %v4663_v22 = vpop.xlane.xlu1 %413  ;;  %v314_v61 = vld [vmem:[%s4269_s18 + $0x430] sm:$0xff] }
  0xbb   : > { %8734 = vst [vmem:[#allocation27_spill] sm:$0xff] %v4663_v22  ;;  %v4665_v58 = vpop.xlane.xlu0 %409  ;;  %v603_v22 = vsel %vm334_vm0, %v315_v28, 0.0  ;;  %v322_v28 = vld [vmem:[%s4269_s18 + $0x470] sm:$0xff] }
  0xbc   : > { %8735 = vst [vmem:[#allocation28_spill] sm:$0xff] %v4665_v58  ;;  %v312_v58 = vld [vmem:[%s4269_s18 + $0x420] sm:$0xff]  ;;  %v604_v60 = vadd.f32 %v603_v22, %v314_v61  ;;  %v611_v61 = vsel %vm334_vm0, %v319_v20, 0.0 }
  0xbd   : > { %v328_v20 = vld [vmem:[%s4269_s18 + $0x4a0] sm:$0xff] }
  0xbe   : > { %597 = vadd.xlane.f32.xlu2 %v596_v54  ;;  %v600_v54 = vadd.f32 %v599_v53, %v312_v58 }
  0xbf   : > { %593 = vadd.xlane.f32.xlu1 %v592_v63  ;;  %v323_v63 = vld [vmem:[%s4269_s18 + $0x478] sm:$0xff] }
  0xc0   : > { %589 = vadd.xlane.f32.xlu0 %v588_v12  ;;  %v321_v12 = vld [vmem:[%s4269_s18 + $0x468] sm:$0xff]  ;;  %v619_v23 = vsel %vm334_vm0, %v323_v63, 0.0  ;;  %v327_v63 = vld [vmem:[%s4269_s18 + $0x498] sm:$0xff] }
  0xc1   : > { %v4676_v9 = vpop.xlane.xlu2 %429  ;;  %v620_v44 = vadd.f32 %v619_v23, %v322_v28  ;;  %v627_v7 = vsel %vm334_vm0, %v327_v63, 0.0  ;;  %v331_v63 = vld [vmem:[%s4269_s18 + $0x4b8] sm:$0xff] }
  0xc2   : > { %8736 = vst [vmem:[#allocation29_spill] sm:$0xff] %v4676_v9  ;;  %v4678_v33 = vpop.xlane.xlu1 %425  ;;  %v320_v9 = vld [vmem:[%s4269_s18 + $0x460] sm:$0xff] }
  0xc3   : > { %8737 = vst [vmem:[#allocation30_spill] sm:$0xff] %v4678_v33  ;;  %v4680_v34 = vpop.xlane.xlu0 %421  ;;  %v615_v33 = vsel %vm334_vm0, %v321_v12, 0.0  ;;  %v325_v12 = vld [vmem:[%s4269_s18 + $0x488] sm:$0xff] }
  0xc4   : > { %8738 = vst [vmem:[#allocation31_spill] sm:$0xff] %v4680_v34  ;;  %v318_v34 = vld [vmem:[%s4269_s18 + $0x450] sm:$0xff]  ;;  %v616_v53 = vadd.f32 %v615_v33, %v320_v9  ;;  %v623_v9 = vsel %vm334_vm0, %v325_v12, 0.0 }
  0xc6   : > { %609 = vadd.xlane.f32.xlu2 %v608_v40  ;;  %v612_v40 = vadd.f32 %v611_v61, %v318_v34 }
  0xc7   : > { %605 = vadd.xlane.f32.xlu1 %v604_v60  ;;  %v329_v60 = vld [vmem:[%s4269_s18 + $0x4a8] sm:$0xff] }
  0xc8   : > { %601 = vadd.xlane.f32.xlu0 %v600_v54  ;;  %v643_v54 = vmul.f32 0.0051020407, %v4575_v8 }
  0xc9   : > { %v4691_v22 = vpop.xlane.xlu2 %441 }
  0xca   : > { %8739 = vst [vmem:[#allocation32_spill] sm:$0xff] %v4691_v22  ;;  %v4693_v58 = vpop.xlane.xlu1 %437  ;;  %v631_v22 = vsel %vm334_vm0, %v329_v60, 0.0  ;;  %v4708_v33 = vsub.f32 %v4289_v6, %v643_v54  ;;  %v646_v60 = vmul.f32 0.0051020407, %v4588_v52  ;;  %v333_v6 = vld [vmem:[%s4269_s18 + $0x4c8] sm:$0xff] }
  0xcb   : > { %8740 = vst [vmem:[#allocation33_spill] sm:$0xff] %v4693_v58  ;;  %v4695_v32 = vpop.xlane.xlu0 %433  ;;  %v326_v58 = vld [vmem:[%s4269_s18 + $0x490] sm:$0xff]  ;;  %v632_v23 = vadd.f32 %v631_v22, %v328_v20  ;;  %v332_v22 = vld [vmem:[%s4269_s18 + $0x4c0] sm:$0xff] }
  0xcc   : > { %8741 = vst [vmem:[#allocation34_spill] sm:$0xff] %v4695_v32  ;;  %v324_v32 = vld [vmem:[%s4269_s18 + $0x480] sm:$0xff]  ;;  %v628_v61 = vadd.f32 %v627_v7, %v326_v58  ;;  %v875_v12 = vmul.f32 %v4708_v33, %v4708_v33  ;;  %v639_v7 = vsel %vm334_vm0, %v333_v6, 0.0  ;;  %v330_v58 = vld [vmem:[%s4269_s18 + $0x4b0] sm:$0xff] }
  0xcd   : > { %8742 = vst [vmem:[#allocation35_spill] sm:$0xff] %v4708_v33 }
  0xce   : > { %621 = vadd.xlane.f32.xlu2 %v620_v44  ;;  %v624_v44 = vadd.f32 %v623_v9, %v324_v32  ;;  %v4736_v32 = vsub.f32 %v4302_v13, %v646_v60  ;;  %v4753_v13 = vsub.f32 %v4313_v17, %v646_v60 }
  0xcf   : > { %617 = vadd.xlane.f32.xlu1 %v616_v53  ;;  %v4717_v53 = vsub.f32 %v4286_v5, %v643_v54  ;;  %v635_v5 = vsel %vm334_vm0, %v331_v63, 0.0 }
  0xd0   : > { %613 = vadd.xlane.f32.xlu0 %v612_v40  ;;  %v645_v40 = vmul.f32 0.0051020407, %v4573_v59  ;;  %8746 = vst [vmem:[#allocation39_spill] sm:$0xff] %v4736_v32  ;;  %v636_v6 = vadd.f32 %v635_v5, %v330_v58 }
  0xd1   : > { %v4710_v8 = vpop.xlane.xlu2 %453  ;;  %8744 = vst [vmem:[#allocation37_spill] sm:$0xff] %v4717_v53  ;;  %v874_v59 = vmul.f32 %v4717_v53, %v4717_v53 }
  0xd2   : > { %v4712_v34 = vpop.xlane.xlu1 %449  ;;  %v4733_v52 = vsub.f32 %v4283_v4, %v645_v40  ;;  %v4750_v4 = vsub.f32 %v4278_v2, %v645_v40  ;;  %8749 = vst [vmem:[#allocation42_spill] sm:$0xff] %v4753_v13 }
  0xd3   : > { %8743 = vst [vmem:[#allocation36_spill] sm:$0xff] %v4712_v34  ;;  %v4714_v28 = vpop.xlane.xlu0 %445  ;;  %v644_v34 = vmul.f32 0.0051020407, %v4590_v56  ;;  %v1028_v56 = vsel %vm334_vm0, %v875_v12, 0.0 }
  0xd4   : > { %8745 = vst [vmem:[#allocation38_spill] sm:$0xff] %v4733_v52  ;;  %v1029_v63 = vadd.f32 %v1028_v56, %v874_v59  ;;  %v879_v33 = vmul.f32 %v4733_v52, %v4733_v52  ;;  %v651_v56 = vmul.f32 0.0051020407, %v4601_v45 }
  0xd5   : > { %v4742_v20 = vsub.f32 %v4305_v14, %v644_v34  ;;  %8748 = vst [vmem:[#allocation41_spill] sm:$0xff] %v4750_v4  ;;  %v4756_v12 = vsub.f32 %v4318_v19, %v644_v34  ;;  %v649_v14 = vmul.f32 0.0051020407, %v4605_v47  ;;  %v878_v19 = vmul.f32 %v4750_v4, %v4750_v4 }
  0xd6   : > { %633 = vadd.xlane.f32.xlu2 %v632_v23  ;;  %v880_v47 = vmul.f32 %v4753_v13, %v4753_v13  ;;  %v670_v13 = vmul.f32 0.0051020407, %v4714_v28 }
  0xd7   : > { %629 = vadd.xlane.f32.xlu1 %v628_v61  ;;  %8747 = vst [vmem:[#allocation40_spill] sm:$0xff] %v4742_v20  ;;  %v647_v61 = vmul.f32 0.0051020407, %v4571_v35  ;;  %v881_v35 = vmul.f32 %v4736_v32, %v4736_v32  ;;  %v877_v2 = vmul.f32 %v4742_v20, %v4742_v20  ;;  %v4774_v34 = vsub.f32 %v4332_v26, %v649_v14 }
  0xd8   : > { %625 = vadd.xlane.f32.xlu0 %v624_v44  ;;  %v640_v44 = vadd.f32 %v639_v7, %v332_v22  ;;  %8750 = vst [vmem:[#allocation43_spill] sm:$0xff] %v4756_v12  ;;  %v648_v22 = vmul.f32 0.0051020407, %v4586_v42  ;;  %v1036_v42 = vsel %vm334_vm0, %v879_v33, 0.0 }
  0xd9   : > { %v4738_v54 = vpop.xlane.xlu2 %465  ;;  %v4767_v17 = vsub.f32 %v4275_v1, %v647_v61  ;;  %8752 = vst [vmem:[#allocation45_spill] sm:$0xff] %v4774_v34  ;;  %v1040_v60 = vsel %vm334_vm0, %v881_v35, 0.0  ;;  %v876_v1 = vmul.f32 %v4756_v12, %v4756_v12  ;;  %v1032_v59 = vsel %vm334_vm0, %v877_v2, 0.0  ;;  %v2262_v12 = vld [vmem:[%s5922_s22 + $0x8] sm:$0xff] }
  0xda   : > { %v4744_v9 = vpop.xlane.xlu1 %461  ;;  %v4783_v7 = vsub.f32 %v4297_v10, %v648_v22  ;;  %v4791_v26 = vsub.f32 %v4272_v0, %v647_v61  ;;  %v1041_v10 = vadd.f32 %v1040_v60, %v880_v47  ;;  %v652_v35 = vmul.f32 0.0051020407, %v4620_v3 }
  0xdb   : > { %v4746_v23 = vpop.xlane.xlu0 %457  ;;  %8751 = vst [vmem:[#allocation44_spill] sm:$0xff] %v4767_v17  ;;  %v883_v33 = vmul.f32 %v4767_v17, %v4767_v17  ;;  %v1033_v32 = vadd.f32 %v1032_v59, %v876_v1  ;;  %v887_v0 = vmul.f32 %v4774_v34, %v4774_v34  ;;  %v650_v61 = vmul.f32 0.0051020407, %v4603_v16  ;;  %v8793_v34 = vld [vmem:[#allocation31_spill] sm:$0xff] }
  0xdc   : > { %8753 = vst [vmem:[#allocation46_spill] sm:$0xff] %v4783_v7  ;;  %v885_v45 = vmul.f32 %v4783_v7, %v4783_v7  ;;  %v4833_v60 = vsub.f32 %v4335_v27, %v651_v56  ;;  %v654_v1 = vmul.f32 0.0051020407, %v4616_v30  ;;  %v4837_v59 = vsub.f32 %v4372_v43, %v652_v35 }
  0xdd   : > { %8754 = vst [vmem:[#allocation47_spill] sm:$0xff] %v4791_v26  ;;  %v1044_v3 = vsel %vm334_vm0, %v883_v33, 0.0 }
  0xde   : > { %1030 = vadd.xlane.f32.xlu2 %v1029_v63  ;;  %v4800_v63 = vsub.f32 %v4308_v15, %v648_v22  ;;  %v4811_v15 = vsub.f32 %v4326_v24, %v651_v56  ;;  %v4817_v22 = vsub.f32 %v4359_v38, %v652_v35  ;;  %8760 = vst [vmem:[#allocation53_spill] sm:$0xff] %v4833_v60  ;;  %v653_v56 = vmul.f32 0.0051020407, %v4618_v57 }
  0xdf   : > { %641 = vadd.xlane.f32.xlu1 %v640_v44  ;;  %v4797_v44 = vsub.f32 %v4345_v31, %v649_v14  ;;  %v882_v31 = vmul.f32 %v4791_v26, %v4791_v26  ;;  %8761 = vst [vmem:[#allocation54_spill] sm:$0xff] %v4837_v59  ;;  %v890_v30 = vmul.f32 %v4833_v60, %v4833_v60 }
  0xe0   : > { %637 = vadd.xlane.f32.xlu0 %v636_v6  ;;  %v1037_v6 = vadd.f32 %v1036_v42, %v878_v19  ;;  %8756 = vst [vmem:[#allocation49_spill] sm:$0xff] %v4800_v63  ;;  %v884_v2 = vmul.f32 %v4800_v63, %v4800_v63  ;;  %v4825_v19 = vsub.f32 %v4329_v25, %v650_v61  ;;  %v1048_v42 = vsel %vm334_vm0, %v885_v45, 0.0 }
  0xe1   : > { %v4776_v40 = vpop.xlane.xlu2 %477  ;;  %8755 = vst [vmem:[#allocation48_spill] sm:$0xff] %v4797_v44  ;;  %v886_v14 = vmul.f32 %v4797_v44, %v4797_v44  ;;  %v1045_v38 = vadd.f32 %v1044_v3, %v882_v31  ;;  %v891_v25 = vmul.f32 %v4811_v15, %v4811_v15  ;;  %v893_v27 = vmul.f32 %v4817_v22, %v4817_v22 }
  0xe2   : > { %v4785_v58 = vpop.xlane.xlu1 %473  ;;  %8757 = vst [vmem:[#allocation50_spill] sm:$0xff] %v4811_v15  ;;  %v889_v43 = vmul.f32 %v4825_v19, %v4825_v19  ;;  %v892_v35 = vmul.f32 %v4837_v59, %v4837_v59  ;;  %v4867_v3 = vsub.f32 %v4356_v37, %v653_v56  ;;  %v664_v44 = vmul.f32 0.0051020407, %v8793_v34 }
  0xe3   : > { %v4787_v5 = vpop.xlane.xlu0 %469  ;;  %8758 = vst [vmem:[#allocation51_spill] sm:$0xff] %v4817_v22  ;;  %v1064_v31 = vsel %vm334_vm0, %v893_v27, 0.0 }
  0xe4   : > { %8759 = vst [vmem:[#allocation52_spill] sm:$0xff] %v4825_v19 }
  0xe5   : > { %8765 = vst [vmem:[#allocation58_spill] sm:$0xff] %v4867_v3 }
  0xe6   : > { %1042 = vadd.xlane.f32.xlu2 %v1041_v10  ;;  %v655_v10 = vmul.f32 0.0051020407, %v4635_v18  ;;  %v1060_v18 = vsel %vm334_vm0, %v891_v25, 0.0  ;;  %v4884_v25 = vsub.f32 %v4367_v41, %v653_v56 }
  0xe7   : > { %1038 = vadd.xlane.f32.xlu1 %v1037_v6  ;;  %v4842_v6 = vsub.f32 %v4340_v29, %v650_v61  ;;  %v4853_v29 = vsub.f32 %v4353_v36, %v654_v1 }
  0xe8   : > { %1034 = vadd.xlane.f32.xlu0 %v1033_v32  ;;  %v1052_v32 = vsel %vm334_vm0, %v887_v0, 0.0  ;;  %v1049_v0 = vadd.f32 %v1048_v42, %v884_v2  ;;  %v4859_v61 = vsub.f32 %v4386_v50, %v655_v10  ;;  %v1056_v2 = vsel %vm334_vm0, %v889_v43, 0.0  ;;  %8768 = vst [vmem:[#allocation61_spill] sm:$0xff] %v4884_v25 }
  0xe9   : > { %v4819_v16 = vpop.xlane.xlu2 %489  ;;  %v1053_v33 = vadd.f32 %v1052_v32, %v886_v14  ;;  %8762 = vst [vmem:[#allocation55_spill] sm:$0xff] %v4842_v6  ;;  %v888_v45 = vmul.f32 %v4842_v6, %v4842_v6  ;;  %v4875_v32 = vsub.f32 %v4362_v39, %v654_v1  ;;  %v1061_v50 = vadd.f32 %v1060_v18, %v890_v30 }
  0xea   : > { %v4827_v24 = vpop.xlane.xlu1 %485  ;;  %8763 = vst [vmem:[#allocation56_spill] sm:$0xff] %v4853_v29  ;;  %v657_v42 = vmul.f32 0.0051020407, %v4631_v21  ;;  %v897_v37 = vmul.f32 %v4853_v29, %v4853_v29  ;;  %v899_v39 = vmul.f32 %v4859_v61, %v4859_v61  ;;  %v656_v1 = vmul.f32 0.0051020407, %v4633_v46 }
  0xeb   : > { %v4829_v47 = vpop.xlane.xlu0 %481  ;;  %8764 = vst [vmem:[#allocation57_spill] sm:$0xff] %v4859_v61  ;;  %v1057_v27 = vadd.f32 %v1056_v2, %v888_v45  ;;  %v896_v21 = vmul.f32 %v4875_v32, %v4875_v32  ;;  %v894_v43 = vmul.f32 %v4884_v25, %v4884_v25  ;;  %v8773_v2 = vld [vmem:[#allocation24_spill] sm:$0xff]  ;;  %v8808_v25 = vld [vmem:[#allocation34_spill] sm:$0xff] }
  0xec   : > { %8766 = vst [vmem:[#allocation59_spill] sm:$0xff] %v4875_v32  ;;  %v4895_v41 = vsub.f32 %v4380_v48, %v657_v42  ;;  %v1076_v30 = vsel %vm334_vm0, %v899_v39, 0.0  ;;  %v4909_v18 = vsub.f32 %v4383_v49, %v656_v1  ;;  %v8776_v39 = vld [vmem:[#allocation2_spill] sm:$0xff]  ;;  %v667_v29 = vmul.f32 0.0051020407, %v8808_v25 }
  0xed   : > { %v4926_v61 = vsub.f32 %v8776_v39, %v656_v1 }
  0xee   : > { %1054 = vadd.xlane.f32.xlu2 %v1053_v33  ;;  %v1065_v33 = vadd.f32 %v1064_v31, %v892_v35  ;;  %8769 = vst [vmem:[#allocation62_spill] sm:$0xff] %v4895_v41  ;;  %v4917_v31 = vsub.f32 %v4389_v51, %v657_v42  ;;  %v903_v49 = vmul.f32 %v4895_v41, %v4895_v41  ;;  %v8779_v42 = vld [vmem:[#allocation25_spill] sm:$0xff] }
  0xef   : > { %1050 = vadd.xlane.f32.xlu1 %v1049_v0  ;;  %v658_v0 = vmul.f32 0.0051020407, %v4650_v11  ;;  %v1072_v11 = vsel %vm334_vm0, %v897_v37, 0.0  ;;  %8771 = vst [vmem:[#allocation64_spill] sm:$0xff] %v4909_v18 }
  0xf0   : > { %1046 = vadd.xlane.f32.xlu0 %v1045_v38  ;;  %v4879_v38 = vsub.f32 %v4399_v55, %v655_v10  ;;  %v895_v55 = vmul.f32 %v4867_v3, %v4867_v3  ;;  %8772 = vst [vmem:[#allocation65_spill] sm:$0xff] %v4917_v31 }
  0xf1   : > { %v4861_v57 = vpop.xlane.xlu2 %501  ;;  %v4901_v56 = vsub.f32 %v4413_v62, %v658_v0  ;;  %v1073_v62 = vadd.f32 %v1072_v11, %v896_v21  ;;  %v902_v21 = vmul.f32 %v4917_v31, %v4917_v31  ;;  %v8780_v11 = vld [vmem:[#allocation3_spill] sm:$0xff] }
  0xf2   : > { %v4869_v36 = vpop.xlane.xlu1 %497  ;;  %8767 = vst [vmem:[#allocation60_spill] sm:$0xff] %v4879_v38  ;;  %v898_v10 = vmul.f32 %v4879_v38, %v4879_v38  ;;  %v1068_v45 = vsel %vm334_vm0, %v895_v55, 0.0  ;;  %v8778_v38 = vld [vmem:[#allocation28_spill] sm:$0xff]  ;;  %v659_v55 = vmul.f32 0.0051020407, %v8779_v42  ;;  %v8786_v42 = vld [vmem:[#allocation5_spill] sm:$0xff] }
  0xf3   : > { %v4871_v14 = vpop.xlane.xlu0 %493  ;;  %8770 = vst [vmem:[#allocation63_spill] sm:$0xff] %v4901_v56  ;;  %v661_v22 = vmul.f32 0.0051020407, %v8778_v38  ;;  %v1069_v59 = vadd.f32 %v1068_v45, %v894_v43  ;;  %v905_v51 = vmul.f32 %v4901_v56, %v4901_v56  ;;  %v1084_v38 = vsel %vm334_vm0, %v903_v49, 0.0  ;;  %v8782_v43 = vld [vmem:[#allocation10_spill] sm:$0xff] }
  0xf4   : > { %v8788_v56 = vld [vmem:[#allocation26_spill] sm:$0xff]  ;;  %v682_v6 = vmul.f32 0.0051020407, %v4871_v14 }
  0xf6   : > { %1066 = vadd.xlane.f32.xlu2 %v1065_v33  ;;  %v8774_v33 = vld [vmem:[#allocation7_spill] sm:$0xff] }
  0xf7   : > { %1062 = vadd.xlane.f32.xlu1 %v1061_v50  ;;  %v660_v50 = vmul.f32 0.0051020407, %v8773_v2  ;;  %v4921_v37 = vsub.f32 %v8774_v33, %v658_v0  ;;  %8777 = vst [vmem:[#allocation7_spill] sm:$0xff] %v4926_v61  ;;  %v901_v0 = vmul.f32 %v4909_v18, %v4909_v18  ;;  %v8784_v2 = vld [vmem:[#allocation4_spill] sm:$0xff]  ;;  %v8789_v18 = vld [vmem:[#allocation13_spill] sm:$0xff] }
  0xf8   : > { %1058 = vadd.xlane.f32.xlu0 %v1057_v27  ;;  %v1077_v27 = vadd.f32 %v1076_v30, %v898_v10  ;;  %v4943_v30 = vsub.f32 %v8782_v43, %v661_v22  ;;  %v4951_v33 = vsub.f32 %v8784_v2, %v659_v55  ;;  %v1085_v43 = vadd.f32 %v1084_v38, %v902_v21  ;;  %v8791_v2 = vld [vmem:[#allocation6_spill] sm:$0xff] }
  0xf9   : > { %v4903_v46 = vpop.xlane.xlu2 %513  ;;  %8775 = vst [vmem:[#allocation24_spill] sm:$0xff] %v4921_v37  ;;  %v4937_v1 = vsub.f32 %v8780_v11, %v660_v50  ;;  %v904_v10 = vmul.f32 %v4921_v37, %v4921_v37  ;;  %v1080_v49 = vsel %vm334_vm0, %v901_v0, 0.0  ;;  %v4959_v11 = vsub.f32 %v8786_v42, %v660_v50  ;;  %v8794_v0 = vld [vmem:[#allocation27_spill] sm:$0xff] }
  0xfa   : > { %v4911_v48 = vpop.xlane.xlu1 %509  ;;  %8783 = vst [vmem:[#allocation28_spill] sm:$0xff] %v4943_v30  ;;  %v663_v37 = vmul.f32 0.0051020407, %v8788_v56  ;;  %v4963_v41 = vsub.f32 %v8789_v18, %v661_v22  ;;  %v4968_v31 = vsub.f32 %v8791_v2, %v659_v55  ;;  %v911_v50 = vmul.f32 %v4943_v30, %v4943_v30  ;;  %v8795_v18 = vld [vmem:[#allocation8_spill] sm:$0xff]  ;;  %v8803_v30 = vld [vmem:[#allocation29_spill] sm:$0xff] }
  0xfb   : > { %v4913_v35 = vpop.xlane.xlu0 %505  ;;  %8781 = vst [vmem:[#allocation2_spill] sm:$0xff] %v4937_v1  ;;  %v662_v21 = vmul.f32 0.0051020407, %v8794_v0  ;;  %v907_v22 = vmul.f32 %v4951_v33, %v4951_v33  ;;  %v908_v56 = vmul.f32 %v4959_v11, %v4959_v11  ;;  %v8801_v0 = vld [vmem:[#allocation11_spill] sm:$0xff] }
  0xfc   : > { %8785 = vst [vmem:[#allocation25_spill] sm:$0xff] %v4951_v33  ;;  %v4979_v55 = vsub.f32 %v8795_v18, %v663_v37  ;;  %v910_v38 = vmul.f32 %v4963_v41, %v4963_v41  ;;  %v5001_v18 = vsub.f32 %v8801_v0, %v663_v37  ;;  %v8804_v33 = vld [vmem:[#allocation19_spill] sm:$0xff] }
  0xfd   : > { %8787 = vst [vmem:[#allocation3_spill] sm:$0xff] %v4959_v11 }
  0xfe   : > { %1078 = vadd.xlane.f32.xlu2 %v1077_v27  ;;  %8790 = vst [vmem:[#allocation10_spill] sm:$0xff] %v4963_v41  ;;  %v666_v41 = vmul.f32 0.0051020407, %v8803_v30  ;;  %v914_v30 = vmul.f32 %v5001_v18, %v5001_v18 }
  0xff   : > { %1074 = vadd.xlane.f32.xlu1 %v1073_v62  ;;  %v900_v62 = vmul.f32 %v4926_v61, %v4926_v61  ;;  %8792 = vst [vmem:[#allocation4_spill] sm:$0xff] %v4968_v31 }
 0x100   : > { %1070 = vadd.xlane.f32.xlu0 %v1069_v59  ;;  %v1088_v59 = vsel %vm334_vm0, %v905_v51, 0.0  ;;  %v909_v51 = vmul.f32 %v4937_v1, %v4937_v1  ;;  %8796 = vst [vmem:[#allocation5_spill] sm:$0xff] %v4979_v55  ;;  %v5005_v1 = vsub.f32 %v8804_v33, %v664_v44  ;;  %v8810_v33 = vld [vmem:[#allocation14_spill] sm:$0xff] }
 0x101   : > { %v4945_v45 = vpop.xlane.xlu2 %525  ;;  %v1089_v61 = vadd.f32 %v1088_v59, %v904_v10  ;;  %v1081_v3 = vadd.f32 %v1080_v49, %v900_v62  ;;  %v8797_v10 = vld [vmem:[#allocation16_spill] sm:$0xff]  ;;  %v906_v59 = vmul.f32 %v4968_v31, %v4968_v31  ;;  %v8799_v49 = vld [vmem:[#allocation9_spill] sm:$0xff]  ;;  %8802 = vst [vmem:[#allocation6_spill] sm:$0xff] %v5001_v18 }
 0x102   : > { %v4953_v27 = vpop.xlane.xlu1 %521  ;;  %v1096_v34 = vsel %vm334_vm0, %v909_v51, 0.0  ;;  %v4985_v62 = vsub.f32 %v8797_v10, %v664_v44  ;;  %v4993_v42 = vsub.f32 %v8799_v49, %v662_v21  ;;  %v1092_v51 = vsel %vm334_vm0, %v907_v22, 0.0  ;;  %8805 = vst [vmem:[#allocation31_spill] sm:$0xff] %v5005_v1  ;;  %v8806_v49 = vld [vmem:[#allocation12_spill] sm:$0xff]  ;;  %v8809_v22 = vld [vmem:[#allocation30_spill] sm:$0xff] }
 0x103   : > { %v4955_v39 = vpop.xlane.xlu0 %517  ;;  %v1097_v10 = vadd.f32 %v1096_v34, %v908_v56  ;;  %v5010_v11 = vsub.f32 %v8806_v49, %v662_v21  ;;  %v1093_v32 = vadd.f32 %v1092_v51, %v906_v59  ;;  %v665_v56 = vmul.f32 0.0051020407, %v8809_v22  ;;  %v8814_v51 = vld [vmem:[#allocation15_spill] sm:$0xff]  ;;  %v8816_v22 = vld [vmem:[#allocation17_spill] sm:$0xff] }
 0x104   : > { %8798 = vst [vmem:[#allocation26_spill] sm:$0xff] %v4985_v62  ;;  %v917_v37 = vmul.f32 %v4985_v62, %v4985_v62  ;;  %v913_v44 = vmul.f32 %v4993_v42, %v4993_v42  ;;  %v5021_v21 = vsub.f32 %v8810_v33, %v666_v41  ;;  %v916_v34 = vmul.f32 %v5005_v1, %v5005_v1  ;;  %v8818_v62 = vld [vmem:[#allocation32_spill] sm:$0xff] }
 0x105   : > { %8800 = vst [vmem:[#allocation13_spill] sm:$0xff] %v4993_v42  ;;  %v5035_v0 = vsub.f32 %v8814_v51, %v665_v56  ;;  %v5043_v33 = vsub.f32 %v8816_v22, %v666_v41  ;;  %v669_v1 = vmul.f32 0.0051020407, %v8818_v62  ;;  %v8819_v42 = vld [vmem:[#allocation21_spill] sm:$0xff]  ;;  %v4120_v62 = vld [vmem:[%s4269_s18 + $0x1a8] sm:$0xff] }
 0x106   : > { %1090 = vadd.xlane.f32.xlu2 %v1089_v61  ;;  %8807 = vst [vmem:[#allocation27_spill] sm:$0xff] %v5010_v11  ;;  %v921_v51 = vmul.f32 %v5021_v21, %v5021_v21 }
 0x107   : > { %1086 = vadd.xlane.f32.xlu1 %v1085_v43  ;;  %8811 = vst [vmem:[#allocation8_spill] sm:$0xff] %v5021_v21  ;;  %v4123_v21 = vld [vmem:[%s4269_s18 + $0x190] sm:$0xff] }
 0x108   : > { %1082 = vadd.xlane.f32.xlu0 %v1081_v3  ;;  %v1100_v3 = vsel %vm334_vm0, %v911_v50, 0.0  ;;  %v915_v50 = vmul.f32 %v4979_v55, %v4979_v55  ;;  %8815 = vst [vmem:[#allocation9_spill] sm:$0xff] %v5035_v0  ;;  %v8821_v55 = vld [vmem:[#allocation18_spill] sm:$0xff]  ;;  %v1120_v28 = vsel %vm334_vm0, %v921_v51, 0.0 }
 0x109   : > { %v4987_v61 = vpop.xlane.xlu2 %537  ;;  %v1101_v31 = vadd.f32 %v1100_v3, %v910_v38  ;;  %v8812_v38 = vld [vmem:[#allocation20_spill] sm:$0xff]  ;;  %v912_v3 = vmul.f32 %v5010_v11, %v5010_v11  ;;  %8817 = vst [vmem:[#allocation11_spill] sm:$0xff] %v5043_v33  ;;  %v5047_v11 = vsub.f32 %v8819_v42, %v667_v29  ;;  %v5052_v18 = vsub.f32 %v8821_v55, %v665_v56 }
 0x10a   : > { %v4995_v43 = vpop.xlane.xlu1 %533  ;;  %v1108_v25 = vsel %vm334_vm0, %v915_v50, 0.0  ;;  %v5027_v59 = vsub.f32 %v8812_v38, %v667_v29  ;;  %v1104_v50 = vsel %vm334_vm0, %v913_v44, 0.0  ;;  %v919_v29 = vmul.f32 %v5035_v0, %v5035_v0  ;;  %v8829_v0 = vld [vmem:[#allocation23_spill] sm:$0xff] }
 0x10b   : > { %v4997_v2 = vpop.xlane.xlu0 %529  ;;  %v1109_v38 = vadd.f32 %v1108_v25, %v914_v30  ;;  %8820 = vst [vmem:[#allocation29_spill] sm:$0xff] %v5047_v11  ;;  %v1105_v44 = vadd.f32 %v1104_v50, %v912_v3  ;;  %v8823_v30 = vld [vmem:[#allocation33_spill] sm:$0xff]  ;;  %v920_v55 = vmul.f32 %v5043_v33, %v5043_v33  ;;  %v5063_v42 = vsub.f32 %v4120_v62, %v669_v1  ;;  %v4122_v62 = vld [vmem:[%s4269_s18 + $0x1a0] sm:$0xff] }
 0x10c   : > { %8813 = vst [vmem:[#allocation16_spill] sm:$0xff] %v5027_v59  ;;  %v923_v41 = vmul.f32 %v5027_v59, %v5027_v59  ;;  %v668_v25 = vmul.f32 0.0051020407, %v8823_v30  ;;  %v922_v56 = vmul.f32 %v5047_v11, %v5047_v11  ;;  %v918_v50 = vmul.f32 %v5052_v18, %v5052_v18 }
 0x10d   : > { %8822 = vst [vmem:[#allocation19_spill] sm:$0xff] %v5052_v18  ;;  %v1116_v30 = vsel %vm334_vm0, %v919_v29, 0.0  ;;  %v1121_v59 = vadd.f32 %v1120_v28, %v920_v55  ;;  %v672_v11 = vmul.f32 0.0051020407, %v4710_v8  ;;  %v5089_v18 = vsub.f32 %v8829_v0, %v670_v13  ;;  %v8832_v55 = vld [vmem:[#allocation36_spill] sm:$0xff]  ;;  %v4124_v0 = vld [vmem:[%s4269_s18 + $0x1d8] sm:$0xff] }
 0x10e   : > { %1102 = vadd.xlane.f32.xlu2 %v1101_v31  ;;  %8824 = vst [vmem:[#allocation12_spill] sm:$0xff] %v5063_v42  ;;  %v1124_v22 = vsel %vm334_vm0, %v923_v41, 0.0  ;;  %v5094_v33 = vsub.f32 %v4123_v21, %v668_v25  ;;  %v673_v29 = vmul.f32 0.0051020407, %v4746_v23  ;;  %v1117_v19 = vadd.f32 %v1116_v30, %v918_v50  ;;  %v4126_v30 = vld [vmem:[%s4269_s18 + $0x1c8] sm:$0xff] }
 0x10f   : > { %1098 = vadd.xlane.f32.xlu1 %v1097_v10  ;;  %8830 = vst [vmem:[#allocation20_spill] sm:$0xff] %v5089_v18  ;;  %v1125_v41 = vadd.f32 %v1124_v22, %v922_v56  ;;  %v671_v8 = vmul.f32 0.0051020407, %v8832_v55  ;;  %v928_v28 = vmul.f32 %v5089_v18, %v5089_v18  ;;  %v4125_v56 = vld [vmem:[%s4269_s18 + $0x1e8] sm:$0xff] }
 0x110   : > { %1094 = vadd.xlane.f32.xlu0 %v1093_v32  ;;  %v1112_v32 = vsel %vm334_vm0, %v917_v37, 0.0  ;;  %8831 = vst [vmem:[#allocation15_spill] sm:$0xff] %v5094_v33  ;;  %v5111_v50 = vsub.f32 %v4125_v56, %v673_v29 }
 0x111   : > { %v5029_v31 = vpop.xlane.xlu2 %549  ;;  %v1113_v37 = vadd.f32 %v1112_v32, %v916_v34  ;;  %v8825_v34 = vld [vmem:[#allocation22_spill] sm:$0xff] }
 0x112   : > { %v5037_v10 = vpop.xlane.xlu1 %545  ;;  %v5069_v3 = vsub.f32 %v8825_v34, %v670_v13  ;;  %v5085_v34 = vsub.f32 %v4122_v62, %v669_v1  ;;  %8834 = vst [vmem:[#allocation32_spill] sm:$0xff] %v5111_v50  ;;  %v5119_v62 = vsub.f32 %v4126_v30, %v671_v8 }
 0x113   : > { %v5039_v49 = vpop.xlane.xlu0 %541 }
 0x114   : > { %8826 = vst [vmem:[#allocation34_spill] sm:$0xff] %v5069_v3  ;;  %v929_v1 = vmul.f32 %v5069_v3, %v5069_v3  ;;  %v926_v21 = vmul.f32 %v5085_v34, %v5085_v34  ;;  %v675_v3 = vmul.f32 0.0051020407, %v4738_v54  ;;  %v935_v54 = vmul.f32 %v5111_v50, %v5111_v50  ;;  %v4134_v50 = vld [vmem:[%s4269_s18 + $0x1f0] sm:$0xff] }
 0x115   : > { %8828 = vst [vmem:[#allocation14_spill] sm:$0xff] %v5085_v34  ;;  %v4129_v34 = vld [vmem:[%s4269_s18 + $0x1c0] sm:$0xff] }
 0x116   : > { %1114 = vadd.xlane.f32.xlu2 %v1113_v37  ;;  %8835 = vst [vmem:[#allocation21_spill] sm:$0xff] %v5119_v62 }
 0x117   : > { %1110 = vadd.xlane.f32.xlu1 %v1109_v38  ;;  %v4121_v38 = vld [vmem:[%s4269_s18 + $0x198] sm:$0xff] }
 0x118   : > { %1106 = vadd.xlane.f32.xlu0 %v1105_v44  ;;  %v5077_v37 = vsub.f32 %v4121_v38, %v668_v25  ;;  %v927_v38 = vmul.f32 %v5063_v42, %v5063_v42  ;;  %v5105_v25 = vsub.f32 %v4124_v0, %v672_v11  ;;  %v4127_v0 = vld [vmem:[%s4269_s18 + $0x1d0] sm:$0xff] }
 0x119   : > { %v5071_v32 = vpop.xlane.xlu2 %561  ;;  %v5127_v56 = vsub.f32 %v4127_v0, %v672_v11  ;;  %v676_v11 = vmul.f32 0.0051020407, %v4787_v5 }
 0x11a   : > { %8827 = vst [vmem:[#allocation30_spill] sm:$0xff] %v5077_v37  ;;  %v5079_v44 = vpop.xlane.xlu1 %557  ;;  %v925_v13 = vmul.f32 %v5077_v37, %v5077_v37  ;;  %v1132_v23 = vsel %vm334_vm0, %v927_v38, 0.0  ;;  %v674_v37 = vmul.f32 0.0051020407, %v4744_v9  ;;  %v933_v42 = vmul.f32 %v5105_v25, %v5105_v25 }
 0x11b   : > { %v5081_v51 = vpop.xlane.xlu0 %553  ;;  %8833 = vst [vmem:[#allocation17_spill] sm:$0xff] %v5105_v25  ;;  %v1133_v18 = vadd.f32 %v1132_v23, %v926_v21  ;;  %v931_v9 = vmul.f32 %v5119_v62, %v5119_v62 }
 0x11c   : > { %v1128_v55 = vsel %vm334_vm0, %v925_v13, 0.0  ;;  %8836 = vst [vmem:[#allocation18_spill] sm:$0xff] %v5127_v56  ;;  %v5137_v13 = vsub.f32 %v4129_v34, %v671_v8  ;;  %v932_v34 = vmul.f32 %v5127_v56, %v5127_v56  ;;  %v4131_v8 = vld [vmem:[%s4269_s18 + $0x1f8] sm:$0xff]  ;;  %v1144_v21 = vsel %vm334_vm0, %v933_v42, 0.0 }
 0x11d   : > { %v5150_v5 = vsub.f32 %v4131_v8, %v674_v37  ;;  %v1140_v42 = vsel %vm334_vm0, %v931_v9, 0.0 }
 0x11e   : > { %1126 = vadd.xlane.f32.xlu2 %v1125_v41  ;;  %8838 = vst [vmem:[#allocation22_spill] sm:$0xff] %v5137_v13 }
 0x11f   : > { %1122 = vadd.xlane.f32.xlu1 %v1121_v59  ;;  %v1136_v59 = vsel %vm334_vm0, %v929_v1, 0.0  ;;  %8840 = vst [vmem:[#allocation36_spill] sm:$0xff] %v5150_v5  ;;  %v937_v9 = vmul.f32 %v5150_v5, %v5150_v5 }
 0x120   : > { %1118 = vadd.xlane.f32.xlu0 %v1117_v19  ;;  %v924_v19 = vmul.f32 %v5094_v33, %v5094_v33  ;;  %v4128_v33 = vld [vmem:[%s4269_s18 + $0x1e0] sm:$0xff]  ;;  %v1137_v30 = vadd.f32 %v1136_v59, %v928_v28  ;;  %v4132_v28 = vld [vmem:[%s4269_s18 + $0x218] sm:$0xff] }
 0x121   : > { %v5113_v22 = vpop.xlane.xlu2 %573  ;;  %v5132_v1 = vsub.f32 %v4128_v33, %v673_v29  ;;  %v4130_v33 = vld [vmem:[%s4269_s18 + $0x208] sm:$0xff] }
 0x122   : > { %v5121_v41 = vpop.xlane.xlu1 %569  ;;  %v1129_v0 = vadd.f32 %v1128_v55, %v924_v19  ;;  %v5145_v29 = vsub.f32 %v4130_v33, %v675_v3  ;;  %v5156_v19 = vsub.f32 %v4132_v28, %v676_v11  ;;  %v1148_v55 = vsel %vm334_vm0, %v935_v54, 0.0  ;;  %v4133_v33 = vld [vmem:[%s4269_s18 + $0x200] sm:$0xff]  ;;  %v4135_v54 = vld [vmem:[%s4269_s18 + $0x210] sm:$0xff] }
 0x123   : > { %v5123_v38 = vpop.xlane.xlu0 %565  ;;  %8837 = vst [vmem:[#allocation33_spill] sm:$0xff] %v5132_v1  ;;  %v934_v23 = vmul.f32 %v5132_v1, %v5132_v1  ;;  %v5169_v8 = vsub.f32 %v4133_v33, %v675_v3  ;;  %v5172_v1 = vsub.f32 %v4134_v50, %v674_v37  ;;  %v1145_v28 = vadd.f32 %v1144_v21, %v932_v34  ;;  %v4136_v21 = vld [vmem:[%s4269_s18 + $0x238] sm:$0xff] }
 0x124   : > { %8839 = vst [vmem:[#allocation23_spill] sm:$0xff] %v5145_v29  ;;  %v939_v62 = vmul.f32 %v5145_v29, %v5145_v29  ;;  %v5178_v25 = vsub.f32 %v4135_v54, %v676_v11  ;;  %v677_v3 = vmul.f32 0.0051020407, %v4785_v58  ;;  %v679_v37 = vmul.f32 0.0051020407, %v4829_v47 }
 0x125   : > { %8841 = vst [vmem:[#allocation66_spill] sm:$0xff] %v5156_v19  ;;  %v1149_v56 = vadd.f32 %v1148_v55, %v934_v23  ;;  %v941_v34 = vmul.f32 %v5156_v19, %v5156_v19  ;;  %v936_v11 = vmul.f32 %v5172_v1, %v5172_v1  ;;  %v1152_v47 = vsel %vm334_vm0, %v937_v9, 0.0 }
 0x126   : > { %1138 = vadd.xlane.f32.xlu2 %v1137_v30  ;;  %8842 = vst [vmem:[#allocation67_spill] sm:$0xff] %v5169_v8  ;;  %v1156_v58 = vsel %vm334_vm0, %v939_v62, 0.0  ;;  %v4139_v62 = vld [vmem:[%s4269_s18 + $0x230] sm:$0xff] }
 0x127   : > { %1134 = vadd.xlane.f32.xlu1 %v1133_v18  ;;  %v930_v18 = vmul.f32 %v5137_v13, %v5137_v13  ;;  %8843 = vst [vmem:[#allocation68_spill] sm:$0xff] %v5172_v1  ;;  %v678_v13 = vmul.f32 0.0051020407, %v4776_v40  ;;  %v938_v40 = vmul.f32 %v5169_v8, %v5169_v8  ;;  %v1160_v54 = vsel %vm334_vm0, %v941_v34, 0.0 }
 0x128   : > { %1130 = vadd.xlane.f32.xlu0 %v1129_v0  ;;  %8844 = vst [vmem:[#allocation69_spill] sm:$0xff] %v5178_v25  ;;  %v1153_v5 = vadd.f32 %v1152_v47, %v936_v11  ;;  %v681_v8 = vmul.f32 0.0051020407, %v4819_v16  ;;  %v4142_v11 = vld [vmem:[%s4269_s18 + $0x268] sm:$0xff] }
 0x129   : > { %v5158_v59 = vpop.xlane.xlu2 %585  ;;  %v1141_v50 = vadd.f32 %v1140_v42, %v930_v18  ;;  %v5191_v23 = vsub.f32 %v4136_v21, %v678_v13  ;;  %v4137_v18 = vld [vmem:[%s4269_s18 + $0x228] sm:$0xff]  ;;  %v5211_v9 = vsub.f32 %v4139_v62, %v678_v13  ;;  %v1157_v19 = vadd.f32 %v1156_v58, %v938_v40 }
 0x12a   : > { %v5163_v30 = vpop.xlane.xlu1 %581  ;;  %v5198_v55 = vsub.f32 %v4137_v18, %v677_v3  ;;  %v4138_v42 = vld [vmem:[%s4269_s18 + $0x248] sm:$0xff]  ;;  %v4141_v18 = vld [vmem:[%s4269_s18 + $0x240] sm:$0xff]  ;;  %v5236_v58 = vsub.f32 %v4142_v11, %v681_v8 }
 0x12b   : > { %v5165_v0 = vpop.xlane.xlu0 %577  ;;  %8845 = vst [vmem:[#allocation70_spill] sm:$0xff] %v5191_v23  ;;  %v5201_v33 = vsub.f32 %v4138_v42, %v679_v37  ;;  %v5217_v42 = vsub.f32 %v4141_v18, %v679_v37  ;;  %v945_v34 = vmul.f32 %v5191_v23, %v5191_v23  ;;  %v944_v37 = vmul.f32 %v5211_v9, %v5211_v9  ;;  %v4145_v11 = vld [vmem:[%s4269_s18 + $0x260] sm:$0xff] }
 0x12c   : > { %8846 = vst [vmem:[#allocation71_spill] sm:$0xff] %v5198_v55  ;;  %v943_v13 = vmul.f32 %v5198_v55, %v5198_v55 }
 0x12d   : > { %8847 = vst [vmem:[#allocation72_spill] sm:$0xff] %v5201_v33  ;;  %v1168_v16 = vsel %vm334_vm0, %v945_v34, 0.0  ;;  %v946_v40 = vmul.f32 %v5217_v42, %v5217_v42 }
 0x12e   : > { %1150 = vadd.xlane.f32.xlu2 %v1149_v56  ;;  %v940_v56 = vmul.f32 %v5178_v25, %v5178_v25  ;;  %8848 = vst [vmem:[#allocation73_spill] sm:$0xff] %v5211_v9  ;;  %v4140_v25 = vld [vmem:[%s4269_s18 + $0x220] sm:$0xff]  ;;  %v1169_v34 = vadd.f32 %v1168_v16, %v944_v37  ;;  %v4148_v16 = vld [vmem:[%s4269_s18 + $0x2a8] sm:$0xff] }
 0x12f   : > { %1146 = vadd.xlane.f32.xlu1 %v1145_v28  ;;  %v5214_v1 = vsub.f32 %v4140_v25, %v677_v3  ;;  %8850 = vst [vmem:[#allocation75_spill] sm:$0xff] %v5217_v42  ;;  %v947_v25 = vmul.f32 %v5201_v33, %v5201_v33  ;;  %v680_v3 = vmul.f32 0.0051020407, %v4827_v24  ;;  %v4143_v24 = vld [vmem:[%s4269_s18 + $0x278] sm:$0xff]  ;;  %v5253_v33 = vsub.f32 %v4145_v11, %v681_v8  ;;  %v4146_v42 = vld [vmem:[%s4269_s18 + $0x270] sm:$0xff] }
 0x130   : > { %1142 = vadd.xlane.f32.xlu0 %v1141_v50  ;;  %v1161_v29 = vadd.f32 %v1160_v54, %v940_v56  ;;  %8851 = vst [vmem:[#allocation76_spill] sm:$0xff] %v5236_v58  ;;  %v4144_v56 = vld [vmem:[%s4269_s18 + $0x258] sm:$0xff]  ;;  %v684_v8 = vmul.f32 0.0051020407, %v4861_v57 }
 0x131   : > { %v5203_v28 = vpop.xlane.xlu2 %597  ;;  %8849 = vst [vmem:[#allocation74_spill] sm:$0xff] %v5214_v1  ;;  %v942_v14 = vmul.f32 %v5214_v1, %v5214_v1  ;;  %v1172_v47 = vsel %vm334_vm0, %v947_v25, 0.0  ;;  %v5246_v54 = vsub.f32 %v4144_v56, %v680_v3  ;;  %v685_v25 = vmul.f32 0.0051020407, %v4913_v35 }
 0x132   : > { %v5206_v50 = vpop.xlane.xlu1 %593  ;;  %8854 = vst [vmem:[#allocation79_spill] sm:$0xff] %v5253_v33  ;;  %v1173_v1 = vadd.f32 %v1172_v47, %v946_v40  ;;  %v951_v56 = vmul.f32 %v5236_v58, %v5236_v58  ;;  %v950_v35 = vmul.f32 %v5253_v33, %v5253_v33  ;;  %v4149_v40 = vld [vmem:[%s4269_s18 + $0x298] sm:$0xff] }
 0x133   : > { %v5208_v21 = vpop.xlane.xlu0 %589  ;;  %8853 = vst [vmem:[#allocation78_spill] sm:$0xff] %v5246_v54 }
 0x136   : > { %1162 = vadd.xlane.f32.xlu2 %v1161_v29  ;;  %v5239_v29 = vsub.f32 %v4143_v24, %v682_v6  ;;  %v5256_v24 = vsub.f32 %v4146_v42, %v682_v6  ;;  %v949_v6 = vmul.f32 %v5246_v54, %v5246_v54  ;;  %v683_v42 = vmul.f32 0.0051020407, %v4869_v36 }
 0x137   : > { %1158 = vadd.xlane.f32.xlu1 %v1157_v19  ;;  %v1164_v19 = vsel %vm334_vm0, %v943_v13, 0.0  ;;  %v4147_v13 = vld [vmem:[%s4269_s18 + $0x250] sm:$0xff] }
 0x138   : > { %1154 = vadd.xlane.f32.xlu0 %v1153_v5  ;;  %8852 = vst [vmem:[#allocation77_spill] sm:$0xff] %v5239_v29  ;;  %v1165_v55 = vadd.f32 %v1164_v19, %v942_v14  ;;  %v5259_v23 = vsub.f32 %v4147_v13, %v680_v3  ;;  %v953_v37 = vmul.f32 %v5239_v29, %v5239_v29  ;;  %v1176_v11 = vsel %vm334_vm0, %v949_v6, 0.0  ;;  %v4150_v13 = vld [vmem:[%s4269_s18 + $0x288] sm:$0xff]  ;;  %v4151_v29 = vld [vmem:[%s4269_s18 + $0x2a0] sm:$0xff] }
 0x139   : > { %v5241_v5 = vpop.xlane.xlu2 %609  ;;  %8855 = vst [vmem:[#allocation80_spill] sm:$0xff] %v5256_v24  ;;  %v952_v3 = vmul.f32 %v5256_v24, %v5256_v24  ;;  %v5275_v14 = vsub.f32 %v4148_v16, %v685_v25  ;;  %v5284_v19 = vsub.f32 %v4149_v40, %v684_v8  ;;  %v5292_v16 = vsub.f32 %v4150_v13, %v683_v42  ;;  %v4153_v6 = vld [vmem:[%s4269_s18 + $0x280] sm:$0xff] }
 0x13a   : > { %v5248_v62 = vpop.xlane.xlu1 %605  ;;  %8856 = vst [vmem:[#allocation81_spill] sm:$0xff] %v5259_v23  ;;  %v948_v36 = vmul.f32 %v5259_v23, %v5259_v23  ;;  %v688_v40 = vmul.f32 0.0051020407, %v4955_v39  ;;  %v5304_v9 = vsub.f32 %v4153_v6, %v683_v42  ;;  %v687_v13 = vmul.f32 0.0051020407, %v4903_v46  ;;  %v4154_v42 = vld [vmem:[%s4269_s18 + $0x2d8] sm:$0xff] }
 0x13b   : > { %v5250_v18 = vpop.xlane.xlu0 %601  ;;  %8857 = vst [vmem:[#allocation82_spill] sm:$0xff] %v5275_v14  ;;  %v959_v33 = vmul.f32 %v5275_v14, %v5275_v14  ;;  %v955_v39 = vmul.f32 %v5292_v16, %v5292_v16  ;;  %v4158_v14 = vld [vmem:[%s4269_s18 + $0x2c0] sm:$0xff] }
 0x13c   : > { %8858 = vst [vmem:[#allocation83_spill] sm:$0xff] %v5284_v19  ;;  %v1177_v58 = vadd.f32 %v1176_v11, %v948_v36  ;;  %v4156_v11 = vld [vmem:[%s4269_s18 + $0x2b8] sm:$0xff] }
 0x13d   : > { %8859 = vst [vmem:[#allocation84_spill] sm:$0xff] %v5292_v16  ;;  %v1188_v6 = vsel %vm334_vm0, %v955_v39, 0.0  ;;  %v691_v16 = vmul.f32 0.0051020407, %v4997_v2  ;;  %v690_v39 = vmul.f32 0.0051020407, %v4945_v45 }
 0x13e   : > { %1174 = vadd.xlane.f32.xlu2 %v1173_v1  ;;  %v1180_v1 = vsel %vm334_vm0, %v951_v56, 0.0  ;;  %v5295_v56 = vsub.f32 %v4151_v29, %v685_v25  ;;  %8862 = vst [vmem:[#allocation87_spill] sm:$0xff] %v5304_v9  ;;  %v957_v29 = vmul.f32 %v5284_v19, %v5284_v19  ;;  %v686_v25 = vmul.f32 0.0051020407, %v4911_v48 }
 0x13f   : > { %1170 = vadd.xlane.f32.xlu1 %v1169_v34  ;;  %v1181_v24 = vadd.f32 %v1180_v1, %v950_v35  ;;  %v5315_v35 = vsub.f32 %v4154_v42, %v688_v40  ;;  %v1196_v48 = vsel %vm334_vm0, %v959_v33, 0.0  ;;  %v4157_v42 = vld [vmem:[%s4269_s18 + $0x2d0] sm:$0xff] }
 0x140   : > { %1166 = vadd.xlane.f32.xlu0 %v1165_v55  ;;  %v1184_v55 = vsel %vm334_vm0, %v953_v37, 0.0  ;;  %8860 = vst [vmem:[#allocation85_spill] sm:$0xff] %v5295_v56  ;;  %v4152_v37 = vld [vmem:[%s4269_s18 + $0x290] sm:$0xff]  ;;  %v1192_v36 = vsel %vm334_vm0, %v957_v29, 0.0  ;;  %v5337_v33 = vsub.f32 %v4157_v42, %v688_v40 }
 0x141   : > { %v5277_v57 = vpop.xlane.xlu2 %621  ;;  %v1185_v54 = vadd.f32 %v1184_v55, %v952_v3  ;;  %v5298_v23 = vsub.f32 %v4152_v37, %v684_v8  ;;  %v958_v8 = vmul.f32 %v5295_v56, %v5295_v56  ;;  %8863 = vst [vmem:[#allocation88_spill] sm:$0xff] %v5315_v35  ;;  %v954_v55 = vmul.f32 %v5304_v9, %v5304_v9  ;;  %v4159_v9 = vld [vmem:[%s4269_s18 + $0x2b0] sm:$0xff] }
 0x142   : > { %v5286_v47 = vpop.xlane.xlu1 %617  ;;  %v5333_v37 = vsub.f32 %v4156_v11, %v686_v25  ;;  %8866 = vst [vmem:[#allocation91_spill] sm:$0xff] %v5337_v33  ;;  %v5340_v56 = vsub.f32 %v4158_v14, %v687_v13  ;;  %v965_v29 = vmul.f32 %v5315_v35, %v5315_v35  ;;  %v5346_v11 = vsub.f32 %v4159_v9, %v686_v25  ;;  %v4164_v35 = vld [vmem:[%s4269_s18 + $0x2f0] sm:$0xff] }
 0x143   : > { %v5288_v34 = vpop.xlane.xlu0 %613  ;;  %8861 = vst [vmem:[#allocation86_spill] sm:$0xff] %v5298_v23  ;;  %v689_v14 = vmul.f32 0.0051020407, %v4953_v27  ;;  %v964_v9 = vmul.f32 %v5337_v33, %v5337_v33  ;;  %v5382_v33 = vsub.f32 %v4164_v35, %v690_v39  ;;  %v692_v35 = vmul.f32 0.0051020407, %v4995_v43 }
 0x144   : > { %8865 = vst [vmem:[#allocation90_spill] sm:$0xff] %v5333_v37  ;;  %v961_v2 = vmul.f32 %v5333_v37, %v5333_v37  ;;  %v1208_v27 = vsel %vm334_vm0, %v965_v29, 0.0  ;;  %v694_v37 = vmul.f32 0.0051020407, %v5039_v49 }
 0x145   : > { %8867 = vst [vmem:[#allocation92_spill] sm:$0xff] %v5340_v56 }
 0x146   : > { %1186 = vadd.xlane.f32.xlu2 %v1185_v54  ;;  %v956_v54 = vmul.f32 %v5298_v23, %v5298_v23  ;;  %8868 = vst [vmem:[#allocation93_spill] sm:$0xff] %v5346_v11  ;;  %v1189_v23 = vadd.f32 %v1188_v6, %v954_v55  ;;  %v960_v55 = vmul.f32 %v5346_v11, %v5346_v11  ;;  %v4162_v6 = vld [vmem:[%s4269_s18 + $0x2e8] sm:$0xff]  ;;  %v4165_v11 = vld [vmem:[%s4269_s18 + $0x2e0] sm:$0xff] }
 0x147   : > { %1182 = vadd.xlane.f32.xlu1 %v1181_v24  ;;  %v4155_v24 = vld [vmem:[%s4269_s18 + $0x2c8] sm:$0xff]  ;;  %v5375_v42 = vsub.f32 %v4162_v6, %v689_v14  ;;  %8873 = vst [vmem:[#allocation98_spill] sm:$0xff] %v5382_v33  ;;  %v5388_v6 = vsub.f32 %v4165_v11, %v689_v14 }
 0x148   : > { %1178 = vadd.xlane.f32.xlu0 %v1177_v58  ;;  %v5323_v58 = vsub.f32 %v4155_v24, %v687_v13  ;;  %v1197_v24 = vadd.f32 %v1196_v48, %v958_v8  ;;  %v1193_v19 = vadd.f32 %v1192_v36, %v956_v54  ;;  %v4160_v13 = vld [vmem:[%s4269_s18 + $0x308] sm:$0xff]  ;;  %v962_v8 = vmul.f32 %v5340_v56, %v5340_v56 }
 0x149   : > { %v5317_v46 = vpop.xlane.xlu2 %633  ;;  %v5357_v25 = vsub.f32 %v4160_v13, %v691_v16  ;;  %8871 = vst [vmem:[#allocation96_spill] sm:$0xff] %v5375_v42  ;;  %v4163_v13 = vld [vmem:[%s4269_s18 + $0x300] sm:$0xff]  ;;  %v967_v49 = vmul.f32 %v5375_v42, %v5375_v42  ;;  %v697_v42 = vmul.f32 0.0051020407, %v5081_v51 }
 0x14a   : > { %8864 = vst [vmem:[#allocation89_spill] sm:$0xff] %v5323_v58  ;;  %v5325_v3 = vpop.xlane.xlu1 %629  ;;  %v963_v40 = vmul.f32 %v5323_v58, %v5323_v58  ;;  %v5379_v29 = vsub.f32 %v4163_v13, %v691_v16 }
 0x14b   : > { %v5327_v1 = vpop.xlane.xlu0 %625  ;;  %8869 = vst [vmem:[#allocation94_spill] sm:$0xff] %v5357_v25 }
 0x14c   : > { %v1204_v36 = vsel %vm334_vm0, %v963_v40, 0.0  ;;  %8872 = vst [vmem:[#allocation97_spill] sm:$0xff] %v5379_v29  ;;  %v971_v40 = vmul.f32 %v5357_v25, %v5357_v25  ;;  %v970_v11 = vmul.f32 %v5379_v29, %v5379_v29  ;;  %v4170_v25 = vld [vmem:[%s4269_s18 + $0x320] sm:$0xff] }
 0x14d   : > { %v1205_v58 = vadd.f32 %v1204_v36, %v962_v8  ;;  %8874 = vst [vmem:[#allocation99_spill] sm:$0xff] %v5388_v6 }
 0x14e   : > { %1198 = vadd.xlane.f32.xlu2 %v1197_v24  ;;  %v1200_v24 = vsel %vm334_vm0, %v961_v2, 0.0  ;;  %v693_v2 = vmul.f32 0.0051020407, %v4987_v61  ;;  %v1220_v43 = vsel %vm334_vm0, %v971_v40, 0.0 }
 0x14f   : > { %1194 = vadd.xlane.f32.xlu1 %v1193_v19  ;;  %v4161_v19 = vld [vmem:[%s4269_s18 + $0x2f8] sm:$0xff]  ;;  %v1201_v56 = vadd.f32 %v1200_v24, %v960_v55  ;;  %v966_v55 = vmul.f32 %v5388_v6, %v5388_v6  ;;  %v4171_v6 = vld [vmem:[%s4269_s18 + $0x310] sm:$0xff] }
 0x150   : > { %1190 = vadd.xlane.f32.xlu0 %v1189_v23  ;;  %v5365_v54 = vsub.f32 %v4161_v19, %v690_v39  ;;  %v1209_v19 = vadd.f32 %v1208_v27, %v964_v9  ;;  %v4166_v39 = vld [vmem:[%s4269_s18 + $0x338] sm:$0xff]  ;;  %v968_v9 = vmul.f32 %v5382_v33, %v5382_v33  ;;  %v5424_v29 = vsub.f32 %v4170_v25, %v693_v2 }
 0x151   : > { %v5359_v45 = vpop.xlane.xlu2 %1030  ;;  %v5399_v14 = vsub.f32 %v4166_v39, %v694_v37  ;;  %v4168_v24 = vld [vmem:[%s4269_s18 + $0x318] sm:$0xff]  ;;  %v4169_v39 = vld [vmem:[%s4269_s18 + $0x330] sm:$0xff]  ;;  %v695_v25 = vmul.f32 0.0051020407, %v5037_v10 }
 0x152   : > { %8870 = vst [vmem:[#allocation95_spill] sm:$0xff] %v5365_v54  ;;  %v5367_v23 = vpop.xlane.xlu1 %641  ;;  %v969_v16 = vmul.f32 %v5365_v54, %v5365_v54  ;;  %v5417_v13 = vsub.f32 %v4168_v24, %v692_v35  ;;  %v5421_v40 = vsub.f32 %v4169_v39, %v694_v37  ;;  %v5430_v24 = vsub.f32 %v4171_v6, %v692_v35 }
 0x153   : > { %v5369_v48 = vpop.xlane.xlu0 %637  ;;  %8875 = vst [vmem:[#allocation100_spill] sm:$0xff] %v5399_v14 }
 0x154   : > { %v1216_v36 = vsel %vm334_vm0, %v969_v16, 0.0  ;;  %8877 = vst [vmem:[#allocation102_spill] sm:$0xff] %v5417_v13  ;;  %v977_v16 = vmul.f32 %v5399_v14, %v5399_v14  ;;  %v973_v51 = vmul.f32 %v5417_v13, %v5417_v13  ;;  %v976_v6 = vmul.f32 %v5421_v40, %v5421_v40  ;;  %v4176_v14 = vld [vmem:[%s4269_s18 + $0x350] sm:$0xff] }
 0x155   : > { %8878 = vst [vmem:[#allocation103_spill] sm:$0xff] %v5421_v40  ;;  %v1217_v54 = vadd.f32 %v1216_v36, %v968_v9  ;;  %v700_v13 = vmul.f32 0.0051020407, %v5123_v38 }
 0x156   : > { %1210 = vadd.xlane.f32.xlu2 %v1209_v19  ;;  %v1212_v19 = vsel %vm334_vm0, %v967_v49, 0.0  ;;  %8879 = vst [vmem:[#allocation104_spill] sm:$0xff] %v5424_v29  ;;  %v696_v49 = vmul.f32 0.0051020407, %v5029_v31  ;;  %v1232_v10 = vsel %vm334_vm0, %v977_v16, 0.0 }
 0x157   : > { %1206 = vadd.xlane.f32.xlu1 %v1205_v58  ;;  %v4167_v58 = vld [vmem:[%s4269_s18 + $0x328] sm:$0xff]  ;;  %8880 = vst [vmem:[#allocation105_spill] sm:$0xff] %v5430_v24  ;;  %v1213_v33 = vadd.f32 %v1212_v19, %v966_v55  ;;  %v972_v55 = vmul.f32 %v5430_v24, %v5430_v24  ;;  %v4177_v24 = vld [vmem:[%s4269_s18 + $0x340] sm:$0xff] }
 0x158   : > { %1202 = vadd.xlane.f32.xlu0 %v1201_v56  ;;  %v5407_v8 = vsub.f32 %v4167_v58, %v693_v2  ;;  %v1221_v58 = vadd.f32 %v1220_v43, %v970_v11  ;;  %v4172_v2 = vld [vmem:[%s4269_s18 + $0x368] sm:$0xff]  ;;  %v974_v11 = vmul.f32 %v5424_v29, %v5424_v29  ;;  %v5466_v40 = vsub.f32 %v4176_v14, %v696_v49 }
 0x159   : > { %v5401_v61 = vpop.xlane.xlu2 %1042  ;;  %v5441_v35 = vsub.f32 %v4172_v2, %v697_v42  ;;  %v4174_v19 = vld [vmem:[%s4269_s18 + $0x348] sm:$0xff]  ;;  %v4175_v2 = vld [vmem:[%s4269_s18 + $0x360] sm:$0xff]  ;;  %v698_v14 = vmul.f32 0.0051020407, %v5079_v44 }
 0x15a   : > { %8876 = vst [vmem:[#allocation101_spill] sm:$0xff] %v5407_v8  ;;  %v5409_v56 = vpop.xlane.xlu1 %1038  ;;  %v975_v37 = vmul.f32 %v5407_v8, %v5407_v8  ;;  %v5459_v39 = vsub.f32 %v4174_v19, %v695_v25  ;;  %v5463_v16 = vsub.f32 %v4175_v2, %v697_v42  ;;  %v5472_v19 = vsub.f32 %v4177_v24, %v695_v25 }
 0x15b   : > { %v5411_v27 = vpop.xlane.xlu0 %1034  ;;  %8881 = vst [vmem:[#allocation106_spill] sm:$0xff] %v5441_v35 }
 0x15c   : > { %v1228_v36 = vsel %vm334_vm0, %v975_v37, 0.0  ;;  %8883 = vst [vmem:[#allocation108_spill] sm:$0xff] %v5459_v39  ;;  %v983_v37 = vmul.f32 %v5441_v35, %v5441_v35  ;;  %v979_v38 = vmul.f32 %v5459_v39, %v5459_v39  ;;  %v982_v24 = vmul.f32 %v5463_v16, %v5463_v16  ;;  %v4182_v35 = vld [vmem:[%s4269_s18 + $0x380] sm:$0xff] }
 0x15d   : > { %8884 = vst [vmem:[#allocation109_spill] sm:$0xff] %v5463_v16  ;;  %v1229_v8 = vadd.f32 %v1228_v36, %v974_v11  ;;  %v703_v39 = vmul.f32 0.0051020407, %v5165_v0 }
 0x15e   : > { %1222 = vadd.xlane.f32.xlu2 %v1221_v58  ;;  %v1224_v58 = vsel %vm334_vm0, %v973_v51, 0.0  ;;  %8885 = vst [vmem:[#allocation110_spill] sm:$0xff] %v5466_v40  ;;  %v699_v51 = vmul.f32 0.0051020407, %v5071_v32  ;;  %v1244_v44 = vsel %vm334_vm0, %v983_v37, 0.0 }
 0x15f   : > { %1218 = vadd.xlane.f32.xlu1 %v1217_v54  ;;  %v4173_v54 = vld [vmem:[%s4269_s18 + $0x358] sm:$0xff]  ;;  %8886 = vst [vmem:[#allocation111_spill] sm:$0xff] %v5472_v19  ;;  %v1225_v29 = vadd.f32 %v1224_v58, %v972_v55  ;;  %v978_v55 = vmul.f32 %v5472_v19, %v5472_v19  ;;  %v4183_v19 = vld [vmem:[%s4269_s18 + $0x370] sm:$0xff] }
 0x160   : > { %1214 = vadd.xlane.f32.xlu0 %v1213_v33  ;;  %v5449_v9 = vsub.f32 %v4173_v54, %v696_v49  ;;  %v1233_v54 = vadd.f32 %v1232_v10, %v976_v6  ;;  %v4178_v49 = vld [vmem:[%s4269_s18 + $0x398] sm:$0xff]  ;;  %v980_v6 = vmul.f32 %v5466_v40, %v5466_v40  ;;  %v5508_v16 = vsub.f32 %v4182_v35, %v699_v51 }
 0x161   : > { %v5443_v31 = vpop.xlane.xlu2 %1054  ;;  %v5483_v25 = vsub.f32 %v4178_v49, %v700_v13  ;;  %v4180_v58 = vld [vmem:[%s4269_s18 + $0x378] sm:$0xff]  ;;  %v4181_v49 = vld [vmem:[%s4269_s18 + $0x390] sm:$0xff]  ;;  %v701_v35 = vmul.f32 0.0051020407, %v5121_v41 }
 0x162   : > { %8882 = vst [vmem:[#allocation107_spill] sm:$0xff] %v5449_v9  ;;  %v5451_v33 = vpop.xlane.xlu1 %1050  ;;  %v981_v42 = vmul.f32 %v5449_v9, %v5449_v9  ;;  %v5501_v2 = vsub.f32 %v4180_v58, %v698_v14  ;;  %v5505_v37 = vsub.f32 %v4181_v49, %v700_v13  ;;  %v5514_v58 = vsub.f32 %v4183_v19, %v698_v14 }
 0x163   : > { %v5453_v43 = vpop.xlane.xlu0 %1046  ;;  %8887 = vst [vmem:[#allocation112_spill] sm:$0xff] %v5483_v25 }
 0x164   : > { %v1240_v36 = vsel %vm334_vm0, %v981_v42, 0.0  ;;  %8889 = vst [vmem:[#allocation114_spill] sm:$0xff] %v5501_v2  ;;  %v989_v42 = vmul.f32 %v5483_v25, %v5483_v25  ;;  %v985_v0 = vmul.f32 %v5501_v2, %v5501_v2  ;;  %v988_v19 = vmul.f32 %v5505_v37, %v5505_v37  ;;  %v4188_v25 = vld [vmem:[%s4269_s18 + $0x3b0] sm:$0xff] }
 0x165   : > { %8890 = vst [vmem:[#allocation115_spill] sm:$0xff] %v5505_v37  ;;  %v1241_v9 = vadd.f32 %v1240_v36, %v980_v6  ;;  %v706_v2 = vmul.f32 0.0051020407, %v5208_v21 }
 0x166   : > { %1234 = vadd.xlane.f32.xlu2 %v1233_v54  ;;  %v1236_v54 = vsel %vm334_vm0, %v979_v38, 0.0  ;;  %8891 = vst [vmem:[#allocation116_spill] sm:$0xff] %v5508_v16  ;;  %v702_v38 = vmul.f32 0.0051020407, %v5113_v22  ;;  %v1256_v41 = vsel %vm334_vm0, %v989_v42, 0.0 }
 0x167   : > { %1230 = vadd.xlane.f32.xlu1 %v1229_v8  ;;  %v4179_v8 = vld [vmem:[%s4269_s18 + $0x388] sm:$0xff]  ;;  %8892 = vst [vmem:[#allocation117_spill] sm:$0xff] %v5514_v58  ;;  %v1237_v40 = vadd.f32 %v1236_v54, %v978_v55  ;;  %v984_v55 = vmul.f32 %v5514_v58, %v5514_v58  ;;  %v4189_v58 = vld [vmem:[%s4269_s18 + $0x3a0] sm:$0xff] }
 0x168   : > { %1226 = vadd.xlane.f32.xlu0 %v1225_v29  ;;  %v5491_v11 = vsub.f32 %v4179_v8, %v699_v51  ;;  %v1245_v8 = vadd.f32 %v1244_v44, %v982_v24  ;;  %v4184_v51 = vld [vmem:[%s4269_s18 + $0x3c8] sm:$0xff]  ;;  %v986_v24 = vmul.f32 %v5508_v16, %v5508_v16  ;;  %v5550_v37 = vsub.f32 %v4188_v25, %v702_v38 }
 0x169   : > { %v5485_v32 = vpop.xlane.xlu2 %1066  ;;  %v5525_v14 = vsub.f32 %v4184_v51, %v703_v39  ;;  %v4186_v54 = vld [vmem:[%s4269_s18 + $0x3a8] sm:$0xff]  ;;  %v4187_v51 = vld [vmem:[%s4269_s18 + $0x3c0] sm:$0xff]  ;;  %v704_v25 = vmul.f32 0.0051020407, %v5163_v30 }
 0x16a   : > { %8888 = vst [vmem:[#allocation113_spill] sm:$0xff] %v5491_v11  ;;  %v5493_v29 = vpop.xlane.xlu1 %1062  ;;  %v987_v13 = vmul.f32 %v5491_v11, %v5491_v11  ;;  %v5543_v49 = vsub.f32 %v4186_v54, %v701_v35  ;;  %v5547_v42 = vsub.f32 %v4187_v51, %v703_v39  ;;  %v5556_v54 = vsub.f32 %v4189_v58, %v701_v35 }
 0x16b   : > { %v5495_v10 = vpop.xlane.xlu0 %1058  ;;  %8893 = vst [vmem:[#allocation118_spill] sm:$0xff] %v5525_v14 }
 0x16c   : > { %v1252_v36 = vsel %vm334_vm0, %v987_v13, 0.0  ;;  %8895 = vst [vmem:[#allocation120_spill] sm:$0xff] %v5543_v49  ;;  %v995_v13 = vmul.f32 %v5525_v14, %v5525_v14  ;;  %v991_v21 = vmul.f32 %v5543_v49, %v5543_v49  ;;  %v994_v58 = vmul.f32 %v5547_v42, %v5547_v42  ;;  %v4194_v14 = vld [vmem:[%s4269_s18 + $0x3e0] sm:$0xff] }
 0x16d   : > { %8896 = vst [vmem:[#allocation121_spill] sm:$0xff] %v5547_v42  ;;  %v1253_v11 = vadd.f32 %v1252_v36, %v986_v24  ;;  %v709_v49 = vmul.f32 0.0051020407, %v5250_v18 }
 0x16e   : > { %1246 = vadd.xlane.f32.xlu2 %v1245_v8  ;;  %v1248_v8 = vsel %vm334_vm0, %v985_v0, 0.0  ;;  %8897 = vst [vmem:[#allocation122_spill] sm:$0xff] %v5550_v37  ;;  %v705_v0 = vmul.f32 0.0051020407, %v5158_v59  ;;  %v1268_v30 = vsel %vm334_vm0, %v995_v13, 0.0 }
 0x16f   : > { %1242 = vadd.xlane.f32.xlu1 %v1241_v9  ;;  %v4185_v9 = vld [vmem:[%s4269_s18 + $0x3b8] sm:$0xff]  ;;  %8898 = vst [vmem:[#allocation123_spill] sm:$0xff] %v5556_v54  ;;  %v1249_v16 = vadd.f32 %v1248_v8, %v984_v55  ;;  %v990_v55 = vmul.f32 %v5556_v54, %v5556_v54  ;;  %v4195_v54 = vld [vmem:[%s4269_s18 + $0x3d0] sm:$0xff] }
 0x170   : > { %1238 = vadd.xlane.f32.xlu0 %v1237_v40  ;;  %v5533_v6 = vsub.f32 %v4185_v9, %v702_v38  ;;  %v1257_v9 = vadd.f32 %v1256_v41, %v988_v19  ;;  %v4190_v38 = vld [vmem:[%s4269_s18 + $0x3f8] sm:$0xff]  ;;  %v992_v19 = vmul.f32 %v5550_v37, %v5550_v37  ;;  %v5592_v42 = vsub.f32 %v4194_v14, %v705_v0 }
 0x171   : > { %v5527_v22 = vpop.xlane.xlu2 %1078  ;;  %v5567_v35 = vsub.f32 %v4190_v38, %v706_v2  ;;  %v4192_v8 = vld [vmem:[%s4269_s18 + $0x3d8] sm:$0xff]  ;;  %v4193_v38 = vld [vmem:[%s4269_s18 + $0x3f0] sm:$0xff]  ;;  %v707_v14 = vmul.f32 0.0051020407, %v5206_v50 }
 0x172   : > { %8894 = vst [vmem:[#allocation119_spill] sm:$0xff] %v5533_v6  ;;  %v5535_v40 = vpop.xlane.xlu1 %1074  ;;  %v993_v39 = vmul.f32 %v5533_v6, %v5533_v6  ;;  %v5585_v51 = vsub.f32 %v4192_v8, %v704_v25  ;;  %v5589_v13 = vsub.f32 %v4193_v38, %v706_v2  ;;  %v5598_v8 = vsub.f32 %v4195_v54, %v704_v25 }
 0x173   : > { %v5537_v44 = vpop.xlane.xlu0 %1070  ;;  %8899 = vst [vmem:[#allocation124_spill] sm:$0xff] %v5567_v35 }
 0x174   : > { %v1264_v36 = vsel %vm334_vm0, %v993_v39, 0.0  ;;  %8901 = vst [vmem:[#allocation126_spill] sm:$0xff] %v5585_v51  ;;  %v1001_v39 = vmul.f32 %v5567_v35, %v5567_v35  ;;  %v997_v18 = vmul.f32 %v5585_v51, %v5585_v51  ;;  %v1000_v54 = vmul.f32 %v5589_v13, %v5589_v13  ;;  %v4200_v35 = vld [vmem:[%s4269_s18 + $0x410] sm:$0xff] }
 0x175   : > { %8902 = vst [vmem:[#allocation127_spill] sm:$0xff] %v5589_v13  ;;  %v1265_v6 = vadd.f32 %v1264_v36, %v992_v19  ;;  %v712_v51 = vmul.f32 0.0051020407, %v5288_v34 }
 0x176   : > { %1258 = vadd.xlane.f32.xlu2 %v1257_v9  ;;  %v1260_v9 = vsel %vm334_vm0, %v991_v21, 0.0  ;;  %8903 = vst [vmem:[#allocation128_spill] sm:$0xff] %v5592_v42  ;;  %v708_v21 = vmul.f32 0.0051020407, %v5203_v28  ;;  %v1280_v50 = vsel %vm334_vm0, %v1001_v39, 0.0 }
 0x177   : > { %1254 = vadd.xlane.f32.xlu1 %v1253_v11  ;;  %v4191_v11 = vld [vmem:[%s4269_s18 + $0x3e8] sm:$0xff]  ;;  %8904 = vst [vmem:[#allocation129_spill] sm:$0xff] %v5598_v8  ;;  %v1261_v37 = vadd.f32 %v1260_v9, %v990_v55  ;;  %v996_v55 = vmul.f32 %v5598_v8, %v5598_v8  ;;  %v4201_v8 = vld [vmem:[%s4269_s18 + $0x400] sm:$0xff] }
 0x178   : > { %1250 = vadd.xlane.f32.xlu0 %v1249_v16  ;;  %v5575_v24 = vsub.f32 %v4191_v11, %v705_v0  ;;  %v1269_v11 = vadd.f32 %v1268_v30, %v994_v58  ;;  %v4196_v0 = vld [vmem:[%s4269_s18 + $0x428] sm:$0xff]  ;;  %v998_v58 = vmul.f32 %v5592_v42, %v5592_v42  ;;  %v5634_v13 = vsub.f32 %v4200_v35, %v708_v21 }
 0x179   : > { %v5569_v59 = vpop.xlane.xlu2 %1090  ;;  %v5609_v25 = vsub.f32 %v4196_v0, %v709_v49  ;;  %v4198_v9 = vld [vmem:[%s4269_s18 + $0x408] sm:$0xff]  ;;  %v4199_v0 = vld [vmem:[%s4269_s18 + $0x420] sm:$0xff]  ;;  %v710_v35 = vmul.f32 0.0051020407, %v5248_v62 }
 0x17a   : > { %8900 = vst [vmem:[#allocation125_spill] sm:$0xff] %v5575_v24  ;;  %v5577_v16 = vpop.xlane.xlu1 %1086  ;;  %v999_v2 = vmul.f32 %v5575_v24, %v5575_v24  ;;  %v5627_v38 = vsub.f32 %v4198_v9, %v707_v14  ;;  %v5631_v39 = vsub.f32 %v4199_v0, %v709_v49  ;;  %v5640_v9 = vsub.f32 %v4201_v8, %v707_v14 }
 0x17b   : > { %v5579_v41 = vpop.xlane.xlu0 %1082  ;;  %8905 = vst [vmem:[#allocation130_spill] sm:$0xff] %v5609_v25 }
 0x17c   : > { %v1276_v36 = vsel %vm334_vm0, %v999_v2, 0.0  ;;  %8907 = vst [vmem:[#allocation132_spill] sm:$0xff] %v5627_v38  ;;  %v1007_v2 = vmul.f32 %v5609_v25, %v5609_v25  ;;  %v1003_v34 = vmul.f32 %v5627_v38, %v5627_v38  ;;  %v1006_v8 = vmul.f32 %v5631_v39, %v5631_v39 }
 0x17d   : > { %8908 = vst [vmem:[#allocation133_spill] sm:$0xff] %v5631_v39  ;;  %v1277_v24 = vadd.f32 %v1276_v36, %v998_v58  ;;  %v4206_v39 = vld [vmem:[%s4269_s18 + $0x440] sm:$0xff] }
 0x17e   : > { %1270 = vadd.xlane.f32.xlu2 %v1269_v11  ;;  %v1272_v11 = vsel %vm334_vm0, %v997_v18, 0.0  ;;  %8909 = vst [vmem:[#allocation134_spill] sm:$0xff] %v5634_v13  ;;  %v711_v18 = vmul.f32 0.0051020407, %v5241_v5  ;;  %v1292_v62 = vsel %vm334_vm0, %v1007_v2, 0.0 }
 0x17f   : > { %1266 = vadd.xlane.f32.xlu1 %v1265_v6  ;;  %v4197_v6 = vld [vmem:[%s4269_s18 + $0x418] sm:$0xff]  ;;  %8910 = vst [vmem:[#allocation135_spill] sm:$0xff] %v5640_v9  ;;  %v1273_v42 = vadd.f32 %v1272_v11, %v996_v55  ;;  %v1002_v55 = vmul.f32 %v5640_v9, %v5640_v9  ;;  %v1293_v25 = vadd.f32 %v1292_v62, %v1006_v8  ;;  %v4207_v9 = vld [vmem:[%s4269_s18 + $0x430] sm:$0xff] }
 0x180   : > { %1262 = vadd.xlane.f32.xlu0 %v1261_v37  ;;  %v5617_v19 = vsub.f32 %v4197_v6, %v708_v21  ;;  %v1281_v6 = vadd.f32 %v1280_v50, %v1000_v54  ;;  %v4202_v21 = vld [vmem:[%s4269_s18 + $0x458] sm:$0xff]  ;;  %v1004_v54 = vmul.f32 %v5634_v13, %v5634_v13  ;;  %v5677_v38 = vsub.f32 %v4206_v39, %v711_v18 }
 0x181   : > { %v5611_v28 = vpop.xlane.xlu2 %1102  ;;  %v5651_v14 = vsub.f32 %v4202_v21, %v712_v51  ;;  %v4204_v11 = vld [vmem:[%s4269_s18 + $0x438] sm:$0xff]  ;;  %v4205_v21 = vld [vmem:[%s4269_s18 + $0x450] sm:$0xff] }
 0x182   : > { %8906 = vst [vmem:[#allocation131_spill] sm:$0xff] %v5617_v19  ;;  %v5619_v37 = vpop.xlane.xlu1 %1098  ;;  %v1005_v49 = vmul.f32 %v5617_v19, %v5617_v19  ;;  %v5669_v0 = vsub.f32 %v4204_v11, %v710_v35  ;;  %v5673_v2 = vsub.f32 %v4205_v21, %v712_v51  ;;  %v5682_v11 = vsub.f32 %v4207_v9, %v710_v35  ;;  %v4211_v21 = vld [vmem:[%s4269_s18 + $0x480] sm:$0xff] }
 0x183   : > { %v5621_v30 = vpop.xlane.xlu0 %1094  ;;  %8911 = vst [vmem:[#allocation136_spill] sm:$0xff] %v5651_v14 }
 0x184   : > { %v1288_v36 = vsel %vm334_vm0, %v1005_v49, 0.0  ;;  %8913 = vst [vmem:[#allocation138_spill] sm:$0xff] %v5669_v0  ;;  %v1013_v49 = vmul.f32 %v5651_v14, %v5651_v14  ;;  %v1009_v39 = vmul.f32 %v5669_v0, %v5669_v0  ;;  %v4212_v0 = vld [vmem:[%s4269_s18 + $0x470] sm:$0xff] }
 0x185   : > { %8914 = vst [vmem:[#allocation139_spill] sm:$0xff] %v5673_v2  ;;  %v1289_v19 = vadd.f32 %v1288_v36, %v1004_v54  ;;  %v1008_v36 = vmul.f32 %v5682_v11, %v5682_v11 }
 0x186   : > { %1282 = vadd.xlane.f32.xlu2 %v1281_v6  ;;  %v1284_v6 = vsel %vm334_vm0, %v1003_v34, 0.0  ;;  %8915 = vst [vmem:[#allocation140_spill] sm:$0xff] %v5677_v38  ;;  %v714_v34 = vmul.f32 0.0051020407, %v5277_v57  ;;  %v1012_v57 = vmul.f32 %v5673_v2, %v5673_v2  ;;  %v1337_v2 = vmul.f32 0.0051020407, %v5411_v27 }
 0x187   : > { %1278 = vadd.xlane.f32.xlu1 %v1277_v24  ;;  %v4203_v24 = vld [vmem:[%s4269_s18 + $0x448] sm:$0xff]  ;;  %8916 = vst [vmem:[#allocation141_spill] sm:$0xff] %v5682_v11  ;;  %v1285_v13 = vadd.f32 %v1284_v6, %v1002_v55  ;;  %v718_v11 = vmul.f32 0.0051020407, %v5369_v48 }
 0x188   : > { %1274 = vadd.xlane.f32.xlu0 %v1273_v42  ;;  %v5659_v58 = vsub.f32 %v4203_v24, %v711_v18  ;;  %v715_v24 = vmul.f32 0.0051020407, %v5327_v1  ;;  %v713_v1 = vmul.f32 0.0051020407, %v5286_v47  ;;  %v4208_v18 = vld [vmem:[%s4269_s18 + $0x488] sm:$0xff]  ;;  %v1304_v47 = vsel %vm334_vm0, %v1013_v49, 0.0 }
 0x189   : > { %v5653_v5 = vpop.xlane.xlu2 %1114  ;;  %v4210_v55 = vld [vmem:[%s4269_s18 + $0x468] sm:$0xff]  ;;  %v1336_v49 = vmul.f32 0.0051020407, %v5359_v45 }
 0x18a   : > { %8912 = vst [vmem:[#allocation137_spill] sm:$0xff] %v5659_v58  ;;  %v5661_v42 = vpop.xlane.xlu1 %1110  ;;  %v1011_v51 = vmul.f32 %v5659_v58, %v5659_v58  ;;  %v5691_v8 = vsub.f32 %v4208_v18, %v715_v24  ;;  %v5711_v6 = vsub.f32 %v4210_v55, %v713_v1  ;;  %v5714_v18 = vsub.f32 %v4211_v21, %v715_v24  ;;  %v4213_v21 = vld [vmem:[%s4269_s18 + $0x460] sm:$0xff] }
 0x18b   : > { %v5663_v50 = vpop.xlane.xlu0 %1106  ;;  %v5722_v58 = vsub.f32 %v4212_v0, %v714_v34  ;;  %v5728_v45 = vsub.f32 %v4213_v21, %v713_v1  ;;  %v716_v0 = vmul.f32 0.0051020407, %v5325_v3  ;;  %v1338_v1 = vmul.f32 0.0051020407, %v5409_v56 }
 0x18c   : > { %8917 = vst [vmem:[#allocation142_spill] sm:$0xff] %v5691_v8  ;;  %v1019_v14 = vmul.f32 %v5691_v8, %v5691_v8  ;;  %v1015_v27 = vmul.f32 %v5711_v6, %v5711_v6  ;;  %v1018_v48 = vmul.f32 %v5714_v18, %v5714_v18 }
 0x18d   : > { %8919 = vst [vmem:[#allocation144_spill] sm:$0xff] %v5711_v6  ;;  %v4218_v6 = vld [vmem:[%s4269_s18 + $0x4a0] sm:$0xff] }
 0x18e   : > { %1294 = vadd.xlane.f32.xlu2 %v1293_v25  ;;  %v1010_v25 = vmul.f32 %v5677_v38, %v5677_v38  ;;  %8920 = vst [vmem:[#allocation145_spill] sm:$0xff] %v5714_v18  ;;  %v1339_v18 = vmul.f32 0.0051020407, %v5401_v61 }
 0x18f   : > { %1290 = vadd.xlane.f32.xlu1 %v1289_v19  ;;  %v4209_v19 = vld [vmem:[%s4269_s18 + $0x478] sm:$0xff]  ;;  %8921 = vst [vmem:[#allocation146_spill] sm:$0xff] %v5722_v58 }
 0x190   : > { %1286 = vadd.xlane.f32.xlu0 %v1285_v13  ;;  %v5701_v35 = vsub.f32 %v4209_v19, %v714_v34  ;;  %v1300_v13 = vsel %vm334_vm0, %v1011_v51, 0.0  ;;  %v1296_v19 = vsel %vm334_vm0, %v1009_v39, 0.0  ;;  %v1305_v51 = vadd.f32 %v1304_v47, %v1012_v57  ;;  %8922 = vst [vmem:[#allocation147_spill] sm:$0xff] %v5728_v45  ;;  %v4214_v47 = vld [vmem:[%s4269_s18 + $0x4b8] sm:$0xff] }
 0x191   : > { %v5695_v9 = vpop.xlane.xlu2 %1126  ;;  %v1301_v55 = vadd.f32 %v1300_v13, %v1010_v25  ;;  %v717_v39 = vmul.f32 0.0051020407, %v5317_v46  ;;  %v1297_v38 = vadd.f32 %v1296_v19, %v1008_v36  ;;  %v5736_v34 = vadd.f32 1e-05, %v1336_v49  ;;  %v4215_v49 = vld [vmem:[%s4269_s18 + $0x4a8] sm:$0xff]  ;;  %v4216_v19 = vld [vmem:[%s4269_s18 + $0x498] sm:$0xff] }
 0x192   : > { %8918 = vst [vmem:[#allocation143_spill] sm:$0xff] %v5701_v35  ;;  %v5703_v54 = vpop.xlane.xlu1 %1122  ;;  %v1017_v24 = vmul.f32 %v5701_v35, %v5701_v35  ;;  %v5739_v57 = vadd.f32 1e-05, %v1337_v2  ;;  %v1316_v46 = vsel %vm334_vm0, %v1019_v14, 0.0  ;;  %v1016_v25 = vmul.f32 %v5722_v58, %v5722_v58 }
 0x193   : > { %v5705_v62 = vpop.xlane.xlu0 %1118  ;;  %v5745_v3 = vsub.f32 %v4214_v47, %v718_v11  ;;  %v1014_v36 = vmul.f32 %v5728_v45, %v5728_v45  ;;  %v5752_v56 = vsub.f32 %v4215_v49, %v717_v39  ;;  %3966 = vrsqrt.f32 %v5736_v34  ;;  %v4217_v47 = vld [vmem:[%s4269_s18 + $0x4b0] sm:$0xff] }
 0x194   : > { %v1312_v14 = vsel %vm334_vm0, %v1017_v24, 0.0  ;;  %v1317_v21 = vadd.f32 %v1316_v46, %v1018_v48  ;;  %v5765_v8 = vsub.f32 %v4217_v47, %v718_v11  ;;  %v5767_v49 = vadd.f32 1e-05, %v1338_v1  ;;  %v4219_v11 = vld [vmem:[%s4269_s18 + $0x490] sm:$0xff] }
 0x195   : > { %8923 = vst [vmem:[#allocation148_spill] sm:$0xff] %v5745_v3  ;;  %3968 = vrsqrt.f32 %v5739_v57  ;;  %v5772_v24 = vsub.f32 %v4218_v6, %v717_v39  ;;  %v1340_v45 = vmul.f32 0.0051020407, %v5453_v43  ;;  %v1313_v35 = vadd.f32 %v1312_v14, %v1016_v25 }
 0x196   : > { %1306 = vadd.xlane.f32.xlu2 %v1305_v51  ;;  %8924 = vst [vmem:[#allocation149_spill] sm:$0xff] %v5752_v56  ;;  %v5760_v51 = vsub.f32 %v4216_v19, %v716_v0  ;;  %v1025_v19 = vmul.f32 %v5745_v3, %v5745_v3  ;;  %v5780_v48 = vsub.f32 %v4219_v11, %v716_v0  ;;  %v719_v6 = vmul.f32 0.0051020407, %v5367_v23 }
 0x197   : > { %1302 = vadd.xlane.f32.xlu1 %v1301_v55  ;;  %v1308_v55 = vsel %vm334_vm0, %v1015_v27, 0.0  ;;  %8926 = vst [vmem:[#allocation151_spill] sm:$0xff] %v5765_v8  ;;  %v1023_v27 = vmul.f32 %v5752_v56, %v5752_v56  ;;  %v1024_v39 = vmul.f32 %v5765_v8, %v5765_v8  ;;  %3970 = vrsqrt.f32 %v5767_v49 }
 0x198   : > { %1298 = vadd.xlane.f32.xlu0 %v1297_v38  ;;  %8925 = vst [vmem:[#allocation150_spill] sm:$0xff] %v5760_v51  ;;  %v1309_v1 = vadd.f32 %v1308_v55, %v1014_v36  ;;  %v1021_v61 = vmul.f32 %v5760_v51, %v5760_v51  ;;  %v5788_v43 = vadd.f32 1e-05, %v1339_v18  ;;  %v1022_v0 = vmul.f32 %v5772_v24, %v5772_v24 }
 0x199   : > { %v5747_v13 = vpop.xlane.xlu2 %1138  ;;  %8927 = vst [vmem:[#allocation152_spill] sm:$0xff] %v5772_v24  ;;  %v5790_v46 = vpop.eup %3966  ;;  %v1342_v25 = vmul.f32 0.0051020407, %v5443_v31  ;;  %v5795_v36 = vadd.f32 1e-05, %v1340_v45  ;;  %v1020_v18 = vmul.f32 %v5780_v48, %v5780_v48  ;;  %v1324_v31 = vsel %vm334_vm0, %v1023_v27, 0.0 }
 0x19a   : > { %v5754_v2 = vpop.xlane.xlu1 %1134  ;;  %8928 = vst [vmem:[#allocation153_spill] sm:$0xff] %v5780_v48  ;;  %v1345_v55 = vmul.f32 0.0051020407, %v5485_v32  ;;  %v4220_v45 = vld [vmem:[%s4269_s18 + $0x4c8] sm:$0xff]  ;;  %v1491_v3 = vmul.f32 %v5790_v46, %v5736_v34  ;;  %3972 = vrsqrt.f32 %v5788_v43  ;;  %v1325_v27 = vadd.f32 %v1324_v31, %v1022_v0  ;;  %v4221_v48 = vld [vmem:[%s4269_s18 + $0x4c0] sm:$0xff] }
 0x19b   : > { %v5756_v38 = vpop.xlane.xlu0 %1130  ;;  %v5800_v14 = vpop.eup %3968  ;;  %v5811_v11 = vsub.f32 %v4220_v45, %v719_v6  ;;  %v5820_v51 = vadd.f32 1e-05, %v1342_v25  ;;  %3974 = vrsqrt.f32 %v5795_v36  ;;  %vm1497_vm1 = vweird.f32 %v5790_v46 }
 0x19c   : > { %v1501_v8 = vmul.f32 %v5800_v14, %v5739_v57  ;;  %v1492_v25 = vmul.f32 %v5790_v46, %v1491_v3  ;;  %vm1507_vm2 = vweird.f32 %v5800_v14  ;;  %vm1496_vm3 = vweird.f32 %v5736_v34  ;;  %v2261_v34 = vld [vmem:[%s5922_s22] sm:$0xff] }
 0x19d   : > { %8929 = vst [vmem:[#allocation154_spill] sm:$0xff] %v5811_v11  ;;  %v5823_v45 = vpop.eup %3970  ;;  %3976 = vrsqrt.f32 %v5820_v51  ;;  %vm5908_vm4 = vmor %vm1496_vm3, %vm1497_vm1  ;;  %vm1516_vm5 = vweird.f32 %v5767_v49  ;;  %vm1526_vm6 = vweird.f32 %v5788_v43  ;;  %vm1506_vm7 = vweird.f32 %v5739_v57 }
 0x19e   : > { %1318 = vadd.xlane.f32.xlu2 %v1317_v21  ;;  %v1511_v0 = vmul.f32 %v5823_v45, %v5767_v49  ;;  %v1502_v31 = vmul.f32 %v5800_v14, %v1501_v8  ;;  %v1344_v8 = vmul.f32 0.0051020407, %v5493_v29  ;;  %vm1517_vm8 = vweird.f32 %v5823_v45  ;;  %vm5930_vm10 = vmor %vm1506_vm7, %vm1507_vm2 }
 0x19f   : > { %1314 = vadd.xlane.f32.xlu1 %v1313_v35  ;;  %v1328_v35 = vsel %vm334_vm0, %v1025_v19, 0.0  ;;  %v1320_v19 = vsel %vm334_vm0, %v1021_v61, 0.0  ;;  %v5828_v61 = vadd.f32 1e-05, %v1345_v55  ;;  %v1348_v55 = vmul.f32 0.0051020407, %v5527_v22  ;;  %vm5975_vm11 = vmor %vm1516_vm5, %vm1517_vm8 }
 0x1a0   : > { %1310 = vadd.xlane.f32.xlu0 %v1309_v1  ;;  %v1341_v1 = vmul.f32 0.0051020407, %v5451_v33  ;;  %v1329_v32 = vadd.f32 %v1328_v35, %v1024_v39  ;;  %v5826_v33 = vsub.f32 %v4221_v48, %v719_v6  ;;  %v1321_v56 = vadd.f32 %v1320_v19, %v1020_v18  ;;  %v5841_v6 = vpop.eup %3972 }
 0x1a1   : > { %v5797_v23 = vpop.xlane.xlu2 %1150  ;;  %v1027_v39 = vmul.f32 %v5811_v11, %v5811_v11  ;;  %3978 = vrsqrt.f32 %v5828_v61  ;;  %v1343_v11 = vmul.f32 0.0051020407, %v5495_v10  ;;  %v1512_v22 = vmul.f32 %v5823_v45, %v1511_v0 }
 0x1a2   : > { %v5805_v21 = vpop.xlane.xlu1 %1146  ;;  %8930 = vst [vmem:[#allocation155_spill] sm:$0xff] %v5826_v33  ;;  %v5832_v35 = vadd.f32 1e-05, %v1341_v1  ;;  %v1026_v18 = vmul.f32 %v5826_v33, %v5826_v33  ;;  %v5851_v1 = vpop.eup %3974  ;;  %v1521_v33 = vmul.f32 %v5841_v6, %v5788_v43  ;;  %v1503_v24 = vmul.f32 0.5, %v1502_v31 }
 0x1a3   : > { %v5807_v47 = vpop.xlane.xlu0 %1142  ;;  %v1332_v19 = vsel %vm334_vm0, %v1027_v39, 0.0  ;;  %v1531_v58 = vmul.f32 %v5851_v1, %v5795_v36  ;;  %v5862_v15 = vadd.f32 1e-05, %v1348_v55  ;;  %v5864_v39 = vpop.eup %3976  ;;  %v5866_v60 = vadd.f32 1e-05, %v1344_v8 }
 0x1a4   : > { %3980 = vrsqrt.f32 %v5832_v35  ;;  %v1333_v29 = vadd.f32 %v1332_v19, %v1026_v18  ;;  %v1513_v31 = vmul.f32 0.5, %v1512_v22  ;;  %v1522_v53 = vmul.f32 %v5841_v6, %v1521_v33 }
 0x1a5   : > { %v1504_v17 = vsub.f32 1.5, %v1503_v24  ;;  %v1551_v18 = vmul.f32 %v5864_v39, %v5820_v51  ;;  %v1532_v8 = vmul.f32 %v5851_v1, %v1531_v58  ;;  %3982 = vrsqrt.f32 %v5862_v15 }
 0x1a6   : > { %1330 = vadd.xlane.f32.xlu2 %v1329_v32  ;;  %v4230_v32 = vmov 0   ;;  %3984 = vrsqrt.f32 %v5866_v60  ;;  %v1347_v33 = vmul.f32 0.0051020407, %v5535_v40  ;;  %v1346_v22 = vmul.f32 0.0051020407, %v5537_v44 }
 0x1a7   : > { %1326 = vadd.xlane.f32.xlu1 %v1325_v27  ;;  %3964 = vset.pattern.permute.xlu2 %v4230_v32  ;;  %v1493_v27 = vmul.f32 0.5, %v1492_v25  ;;  %v5868_v25 = vpop.eup %3978  ;;  %v1523_v26 = vmul.f32 0.5, %v1522_v53  ;;  %v1505_v7 = vmul.f32 %v5800_v14, %v1504_v17  ;;  %v1552_v40 = vmul.f32 %v5864_v39, %v1551_v18 }
 0x1a8   : > { %1322 = vadd.xlane.f32.xlu0 %v1321_v56  ;;  %3963 = vset.pattern.permute.xlu1 %v4230_v32  ;;  %v1581_v24 = vmul.f32 %v5868_v25, %v5828_v61  ;;  %v1533_v63 = vmul.f32 0.5, %v1532_v8  ;;  %v5916_v17 = vadd.f32 1e-05, %v1347_v33  ;;  %vm1527_vm9 = vweird.f32 %v5841_v6 }
 0x1a9   : > { %v5839_v48 = vpop.xlane.xlu2 %1162  ;;  %3965 = vset.pattern.permute.xlu0 %v4230_v32  ;;  %v1494_v10 = vsub.f32 1.5, %v1493_v27  ;;  %v5870_v32 = vadd.f32 1e-05, %v1343_v11  ;;  %v1351_v11 = vmul.f32 0.0051020407, %v5569_v59  ;;  %v1509_v33 = vsel %vm5930_vm10, %v5800_v14, %v1505_v7  ;;  %vm5998_vm15 = vmor %vm1526_vm6, %vm1527_vm9 }
 0x1aa   : > { %v5847_v3 = vpop.xlane.xlu1 %1158  ;;  %v5872_v0 = vpop.eup %3980  ;;  %v1582_v53 = vmul.f32 %v5868_v25, %v1581_v24  ;;  %v1534_v4 = vsub.f32 1.5, %v1533_v63  ;;  %v1349_v63 = vmul.f32 0.0051020407, %v5579_v41  ;;  %vm1536_vm12 = vweird.f32 %v5795_v36 }
 0x1ab   : > { %v5849_v56 = vpop.xlane.xlu0 %1154  ;;  %v1495_v58 = vmul.f32 %v5790_v46, %v1494_v10  ;;  %v1541_v59 = vmul.f32 %v5872_v0, %v5832_v35  ;;  %3986 = vrsqrt.f32 %v5870_v32  ;;  %v5904_v10 = vadd.f32 1e-05, %v1351_v11  ;;  %v5924_v44 = vpop.eup %3982 }
 0x1ac   : > { %v5937_v18 = vpop.eup %3984  ;;  %v1524_v11 = vsub.f32 1.5, %v1523_v26  ;;  %v1354_v26 = vmul.f32 0.0051020407, %v5611_v28  ;;  %v1583_v7 = vmul.f32 0.5, %v1582_v53  ;;  %v1611_v20 = vmul.f32 %v5924_v44, %v5862_v15 }
 0x1ad   : > { %v1542_v57 = vmul.f32 %v5872_v0, %v1541_v59  ;;  %v1499_v52 = vsel %vm5908_vm4, %v5790_v46, %v1495_v58  ;;  %3988 = vrsqrt.f32 %v5904_v10  ;;  %v1350_v46 = vmul.f32 0.0051020407, %v5577_v16 }
 0x1ae   : > { %3990 = vrsqrt.f32 %v5916_v17  ;;  %v2417_v58 = vmul.f32 %v2262_v12, %v1509_v33  ;;  %v1525_v28 = vmul.f32 %v5841_v6, %v1524_v11  ;;  %v1535_v12 = vmul.f32 %v5851_v1, %v1534_v4  ;;  %v2263_v4 = vld [vmem:[%s5922_s22 + $0x10] sm:$0xff] }
 0x1af   : > { %v1543_v14 = vmul.f32 0.5, %v1542_v57  ;;  %vm1537_vm13 = vweird.f32 %v5851_v1  ;;  %v5982_v41 = vadd.f32 1e-05, %v1354_v26  ;;  %vm1546_vm14 = vweird.f32 %v5832_v35  ;;  %v2265_v26 = vld [vmem:[%s5922_s22 + $0x20] sm:$0xff] }
 0x1b0   : > { %1334 = vadd.xlane.f32.xlu0 %v1333_v29  ;;  %v1514_v29 = vsub.f32 1.5, %v1513_v31  ;;  %v5935_v31 = vadd.f32 1e-05, %v1346_v22  ;;  %v5951_v22 = vmul.f32 0.5, %v1552_v40  ;;  %v1571_v40 = vmul.f32 %v5937_v18, %v5866_v60  ;;  %vm6012_vm2 = vmor %vm1536_vm12, %vm1537_vm13 }
 0x1b1   : > { %v5875_v55 = vpop.xlane.xlu2 %1174  ;;  %v5949_v59 = vpop.eup %3986  ;;  %v1612_v57 = vmul.f32 %v5924_v44, %v1611_v20  ;;  %v5986_v11 = vadd.f32 1e-05, %v1350_v46  ;;  %vm1547_vm1 = vweird.f32 %v5872_v0  ;;  %v6004_v20 = vadd.f32 1e-05, %v1349_v63 }
 0x1b2   : > { %v5882_v19 = vpop.xlane.xlu1 %1170  ;;  %v1515_v8 = vmul.f32 %v5823_v45, %v1514_v29  ;;  %3992 = vrsqrt.f32 %v5935_v31  ;;  %v1561_v53 = vmul.f32 %v5949_v59, %v5870_v32  ;;  %vm1587_vm3 = vweird.f32 %v5868_v25  ;;  %vm6070_vm7 = vmor %vm1546_vm14, %vm1547_vm1 }
 0x1b3   : > { %v5884_v27 = vpop.xlane.xlu0 %1166  ;;  %v5992_v33 = vpop.eup %3988  ;;  %3994 = vrsqrt.f32 %v5982_v41  ;;  %v1357_v36 = vmul.f32 0.0051020407, %v5653_v5  ;;  %vm1586_vm4 = vweird.f32 %v5828_v61  ;;  %vm1557_vm5 = vweird.f32 %v5864_v39 }
 0x1b4   : > { %8931 = vst [vmem:[#allocation156_spill] sm:$0xff] %v5884_v27  ;;  %v1519_v49 = vsel %vm5975_vm11, %v5823_v45, %v1515_v8  ;;  %v6006_v45 = vpop.eup %3990  ;;  %v1572_v8 = vmul.f32 %v5937_v18, %v1571_v40  ;;  %3996 = vrsqrt.f32 %v5986_v11  ;;  %vm6052_vm6 = vmor %vm1586_vm4, %vm1587_vm3  ;;  %vm1556_vm8 = vweird.f32 %v5820_v51 }
 0x1b5   : > { %v2418_v40 = vmul.f32 %v2263_v4, %v1519_v49  ;;  %v1601_v5 = vmul.f32 %v6006_v45, %v5916_v17  ;;  %3998 = vrsqrt.f32 %v6004_v20  ;;  %v1352_v49 = vmul.f32 0.0051020407, %v5621_v30  ;;  %vm6094_vm12 = vmor %vm1556_vm8, %vm1557_vm5 }
 0x1b6   : > { %v1573_v4 = vmul.f32 0.5, %v1572_v8  ;;  %v6056_v30 = vadd.f32 1e-05, %v1357_v36  ;;  %v2270_v8 = vld [vmem:[%s5922_s22 + $0x48] sm:$0xff]  ;;  %vm1616_vm9 = vweird.f32 %v5862_v15  ;;  %vm1576_vm10 = vweird.f32 %v5866_v60 }
 0x1b7   : > { %vm1567_vm11 = vweird.f32 %v5949_v59  ;;  %vm1617_vm13 = vweird.f32 %v5924_v44  ;;  %vm1577_vm14 = vweird.f32 %v5937_v18  ;;  %vm1607_vm3 = vweird.f32 %v6006_v45 }
 0x1b8   : > { %v6025_v63 = vpop.eup %3992  ;;  %4000 = vrsqrt.f32 %v6056_v30  ;;  %vm6124_vm1 = vmor %vm1616_vm9, %vm1617_vm13  ;;  %vm1596_vm4 = vweird.f32 %v5935_v31  ;;  %vm1646_vm8 = vweird.f32 %v5904_v10 }
 0x1b9   : > { %v5940_v24 = vpop.xlane.xlu2 %1186  ;;  %vm6161_vm5 = vmor %vm1576_vm10, %vm1577_vm14  ;;  %vm1606_vm10 = vweird.f32 %v5916_v17 }
 0x1ba   : > { %v5955_v29 = vpop.xlane.xlu1 %1182  ;;  %vm6223_vm13 = vmor %vm1606_vm10, %vm1607_vm3 }
 0x1bb   : > { %v5957_v27 = vpop.xlane.xlu0 %1178 }
 0x1bc   : > { %8936 = vst [vmem:[#allocation157_spill] sm:$0xff] %v5957_v27  ;;  %v2416_v27 = vmul.f32 %v2261_v34, %v1499_v52  ;;  %v1584_v52 = vsub.f32 1.5, %v1583_v7  ;;  %v1544_v34 = vsub.f32 1.5, %v1543_v14  ;;  %v1554_v7 = vsub.f32 1.5, %v5951_v22  ;;  %v2264_v14 = vld [vmem:[%s5922_s22 + $0x18] sm:$0xff] }
 0x1bd   : > { %v1562_v22 = vmul.f32 %v5949_v59, %v1561_v53  ;;  %v1539_v53 = vsel %vm6012_vm2, %v5851_v1, %v1535_v12 }
 0x1be   : > { %2500 = vperm.xlu2 %3964, %v2417_v58   ;;  %v1585_v16 = vmul.f32 %v5868_v25, %v1584_v52  ;;  %v1545_v12 = vmul.f32 %v5872_v0, %v1544_v34  ;;  %v1555_v34 = vmul.f32 %v5864_v39, %v1554_v7  ;;  %v1602_v7 = vmul.f32 %v6006_v45, %v1601_v5 }
 0x1bf   : > { %v1563_v52 = vmul.f32 0.5, %v1562_v22 }
 0x1c0   : > { %2495 = vperm.xlu1 %3963, %v2416_v27   ;;  %v1529_v27 = vsel %vm5998_vm15, %v5841_v6, %v1525_v28  ;;  %v1641_v6 = vmul.f32 %v5992_v33, %v5904_v10  ;;  %v1549_v51 = vsel %vm6070_vm7, %v5872_v0, %v1545_v12  ;;  %v1603_v36 = vmul.f32 0.5, %v1602_v7 }
 0x1c1   : > { %v6019_v46 = vpop.xlane.xlu2 %1198  ;;  %v2419_v1 = vmul.f32 %v2264_v14, %v1529_v27  ;;  %v2420_v27 = vmul.f32 %v2265_v26, %v1539_v53  ;;  %v1589_v14 = vsel %vm6052_vm6, %v5868_v25, %v1585_v16  ;;  %v1564_v53 = vsub.f32 1.5, %v1563_v52 }
 0x1c2   : > { %8943 = vst [vmem:[#allocation158_spill] sm:$0xff] %v6019_v46  ;;  %v6029_v58 = vpop.xlane.xlu1 %1194  ;;  %v1613_v46 = vmul.f32 0.5, %v1612_v57  ;;  %v1591_v57 = vmul.f32 %v6025_v63, %v5935_v31  ;;  %v1642_v22 = vmul.f32 %v5992_v33, %v1641_v6  ;;  %v2266_v6 = vld [vmem:[%s5922_s22 + $0x28] sm:$0xff]  ;;  %v2425_v52 = vmul.f32 %v2270_v8, %v1589_v14 }
 0x1c3   : > { %v6038_v28 = vpop.xlane.xlu0 %1190  ;;  %v2421_v14 = vmul.f32 %v2266_v6, %v1549_v51  ;;  %vm1566_vm15 = vweird.f32 %v5870_v32  ;;  %v2273_v51 = vld [vmem:[%s5922_s22 + $0x60] sm:$0xff]  ;;  %vm1647_vm6 = vweird.f32 %v5992_v33  ;;  %vm1597_vm7 = vweird.f32 %v6025_v63 }
 0x1c4   : > { %2505 = vperm.xlu0 %3965, %v2418_v40   ;;  %v1614_v61 = vsub.f32 1.5, %v1613_v46  ;;  %v6064_v40 = vpop.eup %3994  ;;  %v6077_v46 = vadd.f32 1e-05, %v1352_v49  ;;  %v1592_v35 = vmul.f32 %v6025_v63, %v1591_v57  ;;  %v1574_v49 = vsub.f32 1.5, %v1573_v4  ;;  %v2267_v4 = vld [vmem:[%s5922_s22 + $0x30] sm:$0xff]  ;;  %vm6139_vm2 = vmor %vm1566_vm15, %vm1567_vm11 }
 0x1c5   : > { %v6079_v25 = vpop.eup %3996  ;;  %v1643_v0 = vmul.f32 0.5, %v1642_v22  ;;  %v1671_v12 = vmul.f32 %v6064_v40, %v5982_v41  ;;  %vm6189_vm9 = vmor %vm1646_vm8, %vm1647_vm6  ;;  %v1356_v6 = vmul.f32 0.0051020407, %v5661_v42  ;;  %vm1677_vm14 = vweird.f32 %v6064_v40 }
 0x1c6   : > { %2510 = vperm.xlu2 %3964, %v2419_v1   ;;  %v6090_v26 = vpop.eup %3998  ;;  %v1615_v57 = vmul.f32 %v5924_v44, %v1614_v61  ;;  %4002 = vrsqrt.f32 %v6077_v46  ;;  %v1565_v61 = vmul.f32 %v5949_v59, %v1564_v53  ;;  %v1593_v22 = vmul.f32 0.5, %v1592_v35  ;;  %vm6207_vm11 = vmor %vm1596_vm4, %vm1597_vm7 }
 0x1c7   : > { %v1631_v8 = vmul.f32 %v6079_v25, %v5986_v11  ;;  %v1575_v7 = vmul.f32 %v5937_v18, %v1574_v49  ;;  %v1644_v53 = vsub.f32 1.5, %v1643_v0  ;;  %v1672_v35 = vmul.f32 %v6064_v40, %v1671_v12  ;;  %v6135_v15 = vpop.eup %4000  ;;  %v2268_v12 = vld [vmem:[%s5922_s22 + $0x38] sm:$0xff] }
 0x1c8   : > { %2515 = vperm.xlu1 %3963, %v2420_v27   ;;  %v1559_v27 = vsel %vm6094_vm12, %v5864_v39, %v1555_v34  ;;  %v1360_v39 = vmul.f32 0.0051020407, %v5695_v9  ;;  %v1619_v32 = vsel %vm6124_vm1, %v5924_v44, %v1615_v57  ;;  %v1604_v9 = vsub.f32 1.5, %v1603_v36 }
 0x1c9   : > { %v6084_v16 = vpop.xlane.xlu2 %1210  ;;  %v2422_v34 = vmul.f32 %v2267_v4, %v1559_v27  ;;  %v1594_v49 = vsub.f32 1.5, %v1593_v22  ;;  %v1632_v44 = vmul.f32 %v6079_v25, %v1631_v8  ;;  %v1569_v0 = vsel %vm6139_vm2, %v5949_v59, %v1565_v61 }
 0x1ca   : > { %8948 = vst [vmem:[#allocation159_spill] sm:$0xff] %v6084_v16  ;;  %v6100_v1 = vpop.xlane.xlu1 %1206  ;;  %v1353_v16 = vmul.f32 0.0051020407, %v5619_v37  ;;  %v6167_v4 = vadd.f32 1e-05, %v1360_v39  ;;  %v2428_v59 = vmul.f32 %v2273_v51, %v1619_v32  ;;  %v1673_v61 = vmul.f32 0.5, %v1672_v35 }
 0x1cb   : > { %v6105_v43 = vpop.xlane.xlu0 %1202  ;;  %v1701_v22 = vmul.f32 %v6135_v15, %v6056_v30  ;;  %v1579_v8 = vsel %vm6161_vm5, %v5937_v18, %v1575_v7  ;;  %v2269_v37 = vld [vmem:[%s5922_s22 + $0x40] sm:$0xff]  ;;  %v1595_v39 = vmul.f32 %v6025_v63, %v1594_v49  ;;  %v1605_v32 = vmul.f32 %v6006_v45, %v1604_v9 }
 0x1cc   : > { %8951 = vst [vmem:[#allocation160_spill] sm:$0xff] %v6105_v43  ;;  %2540 = vperm.xlu0 %3965, %v2425_v52   ;;  %v1621_v43 = vmul.f32 %v6090_v26, %v6004_v20  ;;  %v6145_v5 = vadd.f32 1e-05, %v1353_v16  ;;  %v6155_v27 = vpop.eup %4002  ;;  %v2424_v7 = vmul.f32 %v2269_v37, %v1579_v8  ;;  %v1674_v51 = vsub.f32 1.5, %v1673_v61  ;;  %v2271_v16 = vld [vmem:[%s5922_s22 + $0x50] sm:$0xff] }
 0x1cd   : > { %v1651_v35 = vmul.f32 %v6155_v27, %v6077_v46  ;;  %v1702_v49 = vmul.f32 %v6135_v15, %v1701_v22  ;;  %vm1626_vm12 = vweird.f32 %v6004_v20  ;;  %v1599_v17 = vsel %vm6207_vm11, %v6025_v63, %v1595_v39  ;;  %v2272_v39 = vld [vmem:[%s5922_s22 + $0x58] sm:$0xff]  ;;  %v2274_v20 = vld [vmem:[%s5922_s22 + $0x68] sm:$0xff] }
 0x1ce   : > { %2520 = vperm.xlu2 %3964, %v2421_v14   ;;  %v1622_v52 = vmul.f32 %v6090_v26, %v1621_v43  ;;  %v1355_v43 = vmul.f32 0.0051020407, %v5663_v50  ;;  %v1645_v14 = vmul.f32 %v5992_v33, %v1644_v53  ;;  %4004 = vrsqrt.f32 %v6145_v5 }
 0x1cf   : > { %v2423_v50 = vmul.f32 %v2268_v12, %v1569_v0  ;;  %4006 = vrsqrt.f32 %v6167_v4  ;;  %v1652_v12 = vmul.f32 %v6155_v27, %v1651_v35  ;;  %v1675_v63 = vmul.f32 %v6064_v40, %v1674_v51 }
 0x1d0   : > { %2525 = vperm.xlu1 %3963, %v2422_v34   ;;  %v1633_v34 = vmul.f32 0.5, %v1632_v44  ;;  %v1623_v53 = vmul.f32 0.5, %v1622_v52  ;;  %v6193_v10 = vadd.f32 1e-05, %v1355_v43  ;;  %v1649_v9 = vsel %vm6189_vm9, %v5992_v33, %v1645_v14  ;;  %v2276_v44 = vld [vmem:[%s5922_s22 + $0x78] sm:$0xff] }
 0x1d1   : > { %v6149_v57 = vpop.xlane.xlu2 %1222  ;;  %v2431_v61 = vmul.f32 %v2276_v44, %v1649_v9  ;;  %v6233_v22 = vadd.f32 1e-05, %v1356_v6  ;;  %v1703_v8 = vmul.f32 0.5, %v1702_v49  ;;  %vm1637_vm15 = vweird.f32 %v6079_v25  ;;  %v2279_v44 = vld [vmem:[%s5922_s22 + $0x90] sm:$0xff] }
 0x1d2   : > { %v6169_v36 = vpop.xlane.xlu1 %1218  ;;  %v1634_v42 = vsub.f32 1.5, %v1633_v34  ;;  %v1624_v0 = vsub.f32 1.5, %v1623_v53  ;;  %4008 = vrsqrt.f32 %v6193_v10  ;;  %vm1676_vm1 = vweird.f32 %v5982_v41 }
 0x1d3   : > { %v6174_v60 = vpop.xlane.xlu0 %1214  ;;  %v2426_v53 = vmul.f32 %v2271_v16, %v1599_v17  ;;  %vm1627_vm2 = vweird.f32 %v6090_v26  ;;  %vm6253_vm3 = vmor %vm1676_vm1, %vm1677_vm14  ;;  %v1358_v41 = vmul.f32 0.0051020407, %v5705_v62  ;;  %4010 = vrsqrt.f32 %v6233_v22  ;;  %v2277_v62 = vld [vmem:[%s5922_s22 + $0x80] sm:$0xff] }
 0x1d4   : > { %2555 = vperm.xlu0 %3965, %v2428_v59   ;;  %v6219_v31 = vpop.eup %4004  ;;  %v1359_v59 = vmul.f32 0.0051020407, %v5703_v54  ;;  %v1363_v54 = vmul.f32 0.0051020407, %v5747_v13  ;;  %v1625_v35 = vmul.f32 %v6090_v26, %v1624_v0  ;;  %v1704_v6 = vsub.f32 1.5, %v1703_v8  ;;  %vm6273_vm4 = vmor %vm1626_vm12, %vm1627_vm2 }
 0x1d5   : > { %v6241_v34 = vpop.eup %4006  ;;  %v1661_v18 = vmul.f32 %v6219_v31, %v6145_v5  ;;  %v1679_v9 = vsel %vm6253_vm3, %v6064_v40, %v1675_v63  ;;  %vm1636_vm5 = vweird.f32 %v5986_v11  ;;  %vm1707_vm7 = vweird.f32 %v6135_v15 }
 0x1d6   : > { %2530 = vperm.xlu2 %3964, %v2423_v50   ;;  %v1609_v50 = vsel %vm6223_vm13, %v6006_v45, %v1605_v32  ;;  %v1653_v45 = vmul.f32 0.5, %v1652_v12  ;;  %v1635_v32 = vmul.f32 %v6079_v25, %v1634_v42  ;;  %v6257_v13 = vadd.f32 1e-05, %v1359_v59  ;;  %vm6289_vm6 = vmor %vm1636_vm5, %vm1637_vm15 }
 0x1d7   : > { %v2427_v51 = vmul.f32 %v2272_v39, %v1609_v50  ;;  %v1731_v49 = vmul.f32 %v6241_v34, %v6167_v4  ;;  %v6277_v42 = vadd.f32 1e-05, %v1363_v54  ;;  %v1662_v0 = vmul.f32 %v6219_v31, %v1661_v18  ;;  %v2275_v50 = vld [vmem:[%s5922_s22 + $0x70] sm:$0xff] }
 0x1d8   : > { %2535 = vperm.xlu1 %3963, %v2424_v7   ;;  %v6267_v52 = vpop.eup %4008  ;;  %v1654_v40 = vsub.f32 1.5, %v1653_v45  ;;  %v1629_v17 = vsel %vm6273_vm4, %v6090_v26, %v1625_v35  ;;  %4012 = vrsqrt.f32 %v6257_v13  ;;  %v6295_v11 = vadd.f32 1e-05, %v1358_v41 }
 0x1d9   : > { %v6213_v33 = vpop.xlane.xlu2 %1234  ;;  %v2434_v43 = vmul.f32 %v2279_v44, %v1679_v9  ;;  %v1705_v59 = vmul.f32 %v6135_v15, %v1704_v6  ;;  %v1732_v26 = vmul.f32 %v6241_v34, %v1731_v49  ;;  %v1639_v8 = vsel %vm6289_vm6, %v6079_v25, %v1635_v32  ;;  %v6311_v35 = vpop.eup %4010 }
 0x1da   : > { %v6230_v14 = vpop.xlane.xlu1 %1230  ;;  %4014 = vrsqrt.f32 %v6277_v42  ;;  %v1366_v39 = vmul.f32 0.0051020407, %v5797_v23  ;;  %v1655_v18 = vmul.f32 %v6155_v27, %v1654_v40  ;;  %vm1657_vm8 = vweird.f32 %v6155_v27 }
 0x1db   : > { %v6235_v37 = vpop.xlane.xlu0 %1226  ;;  %vm1706_vm9 = vweird.f32 %v6056_v30  ;;  %v1362_v25 = vmul.f32 0.0051020407, %v5754_v2  ;;  %v1663_v45 = vmul.f32 0.5, %v1662_v0  ;;  %4016 = vrsqrt.f32 %v6295_v11 }
 0x1dc   : > { %2570 = vperm.xlu0 %3965, %v2431_v61   ;;  %v1681_v61 = vmul.f32 %v6267_v52, %v6193_v10  ;;  %vm6319_vm10 = vmor %vm1706_vm9, %vm1707_vm7  ;;  %v1361_v32 = vmul.f32 0.0051020407, %v5756_v38  ;;  %v2430_v7 = vmul.f32 %v2275_v50, %v1639_v8  ;;  %vm1656_vm11 = vweird.f32 %v6077_v46 }
 0x1dd   : > { %v1733_v41 = vmul.f32 0.5, %v1732_v26  ;;  %v1709_v2 = vsel %vm6319_vm10, %v6135_v15, %v1705_v59  ;;  %vm6335_vm12 = vmor %vm1656_vm11, %vm1657_vm8  ;;  %v1691_v38 = vmul.f32 %v6311_v35, %v6233_v22  ;;  %v6341_v46 = vadd.f32 1e-05, %v1366_v39 }
 0x1de   : > { %2545 = vperm.xlu2 %3964, %v2426_v53   ;;  %v2429_v53 = vmul.f32 %v2274_v20, %v1629_v17  ;;  %v1682_v30 = vmul.f32 %v6267_v52, %v1681_v61  ;;  %v6331_v6 = vpop.eup %4012  ;;  %v6343_v9 = vadd.f32 1e-05, %v1362_v25  ;;  %v1659_v15 = vsel %vm6335_vm12, %v6155_v27, %v1655_v18 }
 0x1df   : > { %v1664_v40 = vsub.f32 1.5, %v1663_v45  ;;  %v6353_v17 = vadd.f32 1e-05, %v1361_v32  ;;  %v1369_v59 = vmul.f32 0.0051020407, %v5839_v48  ;;  %v1692_v8 = vmul.f32 %v6311_v35, %v1691_v38 }
 0x1e0   : > { %2550 = vperm.xlu1 %3963, %v2427_v51   ;;  %v2282_v51 = vld [vmem:[%s5922_s22 + $0xa8] sm:$0xff]  ;;  %v6351_v0 = vpop.eup %4014  ;;  %v1683_v16 = vmul.f32 0.5, %v1682_v30  ;;  %v1365_v50 = vmul.f32 0.0051020407, %v5805_v21  ;;  %4018 = vrsqrt.f32 %v6341_v46  ;;  %v2432_v27 = vmul.f32 %v2277_v62, %v1659_v15 }
 0x1e1   : > { %v6281_v12 = vpop.xlane.xlu2 %1246  ;;  %v2437_v20 = vmul.f32 %v2282_v51, %v1709_v2  ;;  %v6358_v26 = vpop.eup %4016  ;;  %vm1667_vm13 = vweird.f32 %v6219_v31  ;;  %v1721_v39 = vmul.f32 %v6331_v6, %v6257_v13  ;;  %4020 = vrsqrt.f32 %v6343_v9  ;;  %v2278_v51 = vld [vmem:[%s5922_s22 + $0x88] sm:$0xff] }
 0x1e2   : > { %v6309_v54 = vpop.xlane.xlu1 %1242  ;;  %v1761_v48 = vmul.f32 %v6351_v0, %v6277_v42  ;;  %vm1737_vm14 = vweird.f32 %v6241_v34  ;;  %4022 = vrsqrt.f32 %v6353_v17  ;;  %v1364_v21 = vmul.f32 0.0051020407, %v5807_v47  ;;  %v2280_v47 = vld [vmem:[%s5922_s22 + $0x98] sm:$0xff] }
 0x1e3   : > { %v6301_v63 = vpop.xlane.xlu0 %1238  ;;  %v1684_v25 = vsub.f32 1.5, %v1683_v16  ;;  %v1711_v23 = vmul.f32 %v6358_v26, %v6295_v11  ;;  %v6378_v32 = vadd.f32 1e-05, %v1369_v59  ;;  %vm1666_vm15 = vweird.f32 %v6145_v5 }
 0x1e4   : > { %2585 = vperm.xlu0 %3965, %v2434_v43   ;;  %v1734_v43 = vsub.f32 1.5, %v1733_v41  ;;  %v6381_v30 = vadd.f32 1e-05, %v1365_v50  ;;  %vm6385_vm1 = vmor %vm1666_vm15, %vm1667_vm13  ;;  %v1722_v41 = vmul.f32 %v6331_v6, %v1721_v39  ;;  %vm1736_vm2 = vweird.f32 %v6167_v4 }
 0x1e5   : > { %v1762_v2 = vmul.f32 %v6351_v0, %v1761_v48  ;;  %vm1687_vm3 = vweird.f32 %v6267_v52  ;;  %vm6400_vm4 = vmor %vm1736_vm2, %vm1737_vm14  ;;  %v6404_v15 = vadd.f32 1e-05, %v1364_v21  ;;  %v1368_v4 = vmul.f32 0.0051020407, %v5847_v3 }
 0x1e6   : > { %2560 = vperm.xlu2 %3964, %v2429_v53   ;;  %v1665_v53 = vmul.f32 %v6219_v31, %v1664_v40  ;;  %v1735_v45 = vmul.f32 %v6241_v34, %v1734_v43  ;;  %v6395_v5 = vpop.eup %4018  ;;  %v1712_v16 = vmul.f32 %v6358_v26, %v1711_v23  ;;  %4024 = vrsqrt.f32 %v6378_v32 }
 0x1e7   : > { %v6410_v40 = vpop.eup %4020  ;;  %4026 = vrsqrt.f32 %v6381_v30  ;;  %vm1686_vm5 = vweird.f32 %v6193_v10  ;;  %v1723_v39 = vmul.f32 0.5, %v1722_v41  ;;  %v1763_v48 = vmul.f32 0.5, %v1762_v2 }
 0x1e8   : > { %2565 = vperm.xlu1 %3963, %v2430_v7   ;;  %v1693_v7 = vmul.f32 0.5, %v1692_v8  ;;  %v1669_v62 = vsel %vm6385_vm1, %v6219_v31, %v1665_v53  ;;  %v1739_v59 = vsel %vm6400_vm4, %v6241_v34, %v1735_v45  ;;  %v2285_v8 = vld [vmem:[%s5922_s22 + $0xc0] sm:$0xff]  ;;  %v6421_v3 = vpop.eup %4022  ;;  %v1367_v31 = vmul.f32 0.0051020407, %v5849_v56  ;;  %vm6430_vm6 = vmor %vm1686_vm5, %vm1687_vm3 }
 0x1e9   : > { %v6345_v44 = vpop.xlane.xlu2 %1258  ;;  %v1791_v53 = vmul.f32 %v6395_v5, %v6341_v46  ;;  %v1751_v21 = vmul.f32 %v6410_v40, %v6343_v9  ;;  %4028 = vrsqrt.f32 %v6404_v15  ;;  %v6437_v56 = vadd.f32 1e-05, %v1368_v4 }
 0x1ea   : > { %v6373_v18 = vpop.xlane.xlu1 %1254  ;;  %v1694_v50 = vsub.f32 1.5, %v1693_v7  ;;  %v2440_v10 = vmul.f32 %v2285_v8, %v1739_v59  ;;  %v1741_v45 = vmul.f32 %v6421_v3, %v6353_v17  ;;  %v1372_v23 = vmul.f32 0.0051020407, %v5875_v55  ;;  %v2281_v8 = vld [vmem:[%s5922_s22 + $0xa0] sm:$0xff] }
 0x1eb   : > { %v6356_v61 = vpop.xlane.xlu0 %1250  ;;  %vm1697_vm7 = vweird.f32 %v6311_v35  ;;  %v6448_v2 = vadd.f32 1e-05, %v1367_v31  ;;  %vm1696_vm8 = vweird.f32 %v6233_v22  ;;  %v1764_v55 = vsub.f32 1.5, %v1763_v48 }
 0x1ec   : > { %2600 = vperm.xlu0 %3965, %v2437_v20   ;;  %v1685_v20 = vmul.f32 %v6267_v52, %v1684_v25  ;;  %v1713_v25 = vmul.f32 0.5, %v1712_v16  ;;  %v1695_v41 = vmul.f32 %v6311_v35, %v1694_v50  ;;  %v6453_v4 = vpop.eup %4024  ;;  %v1724_v16 = vsub.f32 1.5, %v1723_v39  ;;  %vm6468_vm11 = vmor %vm1696_vm8, %vm1697_vm7 }
 0x1ed   : > { %vm1727_vm9 = vweird.f32 %v6331_v6  ;;  %vm1716_vm10 = vweird.f32 %v6295_v11  ;;  %4030 = vrsqrt.f32 %v6437_v56  ;;  %vm1767_vm12 = vweird.f32 %v6351_v0 }
 0x1ee   : > { %2575 = vperm.xlu2 %3964, %v2432_v27   ;;  %v2433_v27 = vmul.f32 %v2278_v51, %v1669_v62  ;;  %v1689_v7 = vsel %vm6430_vm6, %v6267_v52, %v1685_v20  ;;  %v1371_v51 = vmul.f32 0.0051020407, %v5882_v19  ;;  %v1792_v52 = vmul.f32 %v6395_v5, %v1791_v53  ;;  %v6459_v20 = vpop.eup %4026 }
 0x1ef   : > { %v1752_v19 = vmul.f32 %v6410_v40, %v1751_v21  ;;  %v2435_v59 = vmul.f32 %v2280_v47, %v1689_v7  ;;  %v1714_v50 = vsub.f32 1.5, %v1713_v25  ;;  %v1742_v31 = vmul.f32 %v6421_v3, %v1741_v45  ;;  %v6476_v39 = vpop.eup %4028 }
 0x1f0   : > { %2580 = vperm.xlu1 %3963, %v2433_v27   ;;  %v6474_v27 = vadd.f32 1e-05, %v1372_v23  ;;  %vm1726_vm13 = vweird.f32 %v6257_v13  ;;  %v1821_v48 = vmul.f32 %v6453_v4, %v6378_v32  ;;  %4032 = vrsqrt.f32 %v6448_v2 }
 0x1f1   : > { %v6393_v49 = vpop.xlane.xlu2 %1270  ;;  %v6482_v53 = vadd.f32 1e-05, %v1371_v51  ;;  %v1699_v34 = vsel %vm6468_vm11, %v6311_v35, %v1695_v41  ;;  %v1781_v25 = vmul.f32 %v6459_v20, %v6381_v30  ;;  %v1793_v45 = vmul.f32 0.5, %v1792_v52 }
 0x1f2   : > { %v6451_v38 = vpop.xlane.xlu1 %1266  ;;  %v2436_v23 = vmul.f32 %v2281_v8, %v1699_v34  ;;  %vm1717_vm14 = vweird.f32 %v6358_v26  ;;  %v1753_v7 = vmul.f32 0.5, %v1752_v19  ;;  %vm1766_vm15 = vweird.f32 %v6277_v42 }
 0x1f3   : > { %v6415_v43 = vpop.xlane.xlu0 %1262  ;;  %8981 = vst [vmem:[#allocation162_spill] sm:$0xff] %v6451_v38  ;;  %v1375_v47 = vmul.f32 0.0051020407, %v5940_v24  ;;  %v1725_v51 = vmul.f32 %v6331_v6, %v1724_v16  ;;  %v6496_v35 = vmul.f32 0.5, %v1742_v31  ;;  %v1771_v41 = vmul.f32 %v6476_v39, %v6404_v15  ;;  %vm6506_vm1 = vmor %vm1766_vm15, %vm1767_vm12  ;;  %v8988_v16 = vld [vmem:[#allocation156_spill] sm:$0xff] }
 0x1f4   : > { %8978 = vst [vmem:[#allocation161_spill] sm:$0xff] %v6415_v43  ;;  %2615 = vperm.xlu0 %3965, %v2440_v10   ;;  %v1765_v10 = vmul.f32 %v6351_v0, %v1764_v55  ;;  %4034 = vrsqrt.f32 %v6474_v27  ;;  %v6501_v55 = vpop.eup %4030  ;;  %v1715_v52 = vmul.f32 %v6358_v26, %v1714_v50  ;;  %v1822_v24 = vmul.f32 %v6453_v4, %v1821_v48  ;;  %v2288_v50 = vld [vmem:[%s5922_s22 + $0xd8] sm:$0xff]  ;;  %vm6533_vm5 = vmor %vm1716_vm10, %vm1717_vm14 }
 0x1f5   : > { %4036 = vrsqrt.f32 %v6482_v53  ;;  %v1370_v19 = vmul.f32 0.0051020407, %v8988_v16  ;;  %vm1757_vm2 = vweird.f32 %v6410_v40  ;;  %v1794_v8 = vsub.f32 1.5, %v1793_v45  ;;  %vm1728_vm10 = vmor %vm1726_vm13, %vm1727_vm9 }
 0x1f6   : > { %2590 = vperm.xlu2 %3964, %v2435_v59   ;;  %v1782_v59 = vmul.f32 %v6459_v20, %v1781_v25  ;;  %v1769_v22 = vsel %vm6506_vm1, %v6351_v0, %v1765_v10  ;;  %v6521_v34 = vpop.eup %4032  ;;  %v1754_v48 = vsub.f32 1.5, %v1753_v7  ;;  %vm1747_vm3 = vweird.f32 %v6421_v3 }
 0x1f7   : > { %vm1796_vm4 = vweird.f32 %v6341_v46  ;;  %vm1756_vm6 = vweird.f32 %v6343_v9  ;;  %v1744_v10 = vsub.f32 1.5, %v6496_v35  ;;  %vm1797_vm7 = vweird.f32 %v6395_v5 }
 0x1f8   : > { %2595 = vperm.xlu1 %3963, %v2436_v23   ;;  %v6525_v23 = vadd.f32 1e-05, %v1375_v47  ;;  %v1772_v45 = vmul.f32 %v6476_v39, %v1771_v41  ;;  %v1811_v7 = vmul.f32 %v6501_v55, %v6437_v56  ;;  %v2283_v47 = vld [vmem:[%s5922_s22 + $0xb0] sm:$0xff]  ;;  %vm1746_vm8 = vweird.f32 %v6353_v17  ;;  %vm6583_vm9 = vmor %vm1796_vm4, %vm1797_vm7 }
 0x1f9   : > { %v6457_v62 = vpop.xlane.xlu2 %1282  ;;  %v1823_v42 = vmul.f32 0.5, %v1822_v24  ;;  %v6545_v11 = vadd.f32 1e-05, %v1370_v19  ;;  %v2443_v16 = vmul.f32 %v2288_v50, %v1769_v22  ;;  %v6557_v41 = vmul.f32 0.5, %v1782_v59  ;;  %vm6615_vm13 = vmor %vm1756_vm6, %vm1757_vm2 }
 0x1fa   : > { %8982 = vst [vmem:[#allocation163_spill] sm:$0xff] %v6457_v62  ;;  %v6527_v25 = vpop.xlane.xlu1 %1278  ;;  %v6551_v35 = vpop.eup %4034  ;;  %v1801_v24 = vmul.f32 %v6521_v34, %v6448_v2  ;;  %v1374_v19 = vmul.f32 0.0051020407, %v5955_v29  ;;  %4038 = vrsqrt.f32 %v6525_v23  ;;  %v1729_v13 = vsel %vm1728_vm10, %v6331_v6, %v1725_v51  ;;  %vm1748_vm15 = vmor %vm1746_vm8, %vm1747_vm3 }
 0x1fb   : > { %v6487_v21 = vpop.xlane.xlu0 %1274  ;;  %8990 = vst [vmem:[#allocation165_spill] sm:$0xff] %v6527_v25  ;;  %v1795_v25 = vmul.f32 %v6395_v5, %v1794_v8  ;;  %v6563_v22 = vpop.eup %4036  ;;  %v6570_v59 = vmul.f32 0.5, %v1772_v45  ;;  %v1812_v8 = vmul.f32 %v6501_v55, %v1811_v7  ;;  %v1377_v62 = vmul.f32 0.0051020407, %v6029_v58 }
 0x1fc   : > { %8985 = vst [vmem:[#allocation164_spill] sm:$0xff] %v6487_v21  ;;  %v2284_v21 = vld [vmem:[%s5922_s22 + $0xb8] sm:$0xff]  ;;  %2630 = vperm.xlu0 %3965, %v2443_v16   ;;  %v1824_v29 = vsub.f32 1.5, %v1823_v42  ;;  %v1851_v38 = vmul.f32 %v6551_v35, %v6474_v27  ;;  %4040 = vrsqrt.f32 %v6545_v11  ;;  %v8994_v16 = vld [vmem:[#allocation158_spill] sm:$0xff]  ;;  %v1755_v6 = vmul.f32 %v6410_v40, %v1754_v48 }
 0x1fd   : > { %v2439_v43 = vmul.f32 %v2284_v21, %v1729_v13  ;;  %v1802_v58 = vmul.f32 %v6521_v34, %v1801_v24  ;;  %v1841_v21 = vmul.f32 %v6563_v22, %v6482_v53  ;;  %v6590_v45 = vadd.f32 1e-05, %v1374_v19  ;;  %v2291_v24 = vld [vmem:[%s5922_s22 + $0xf0] sm:$0xff]  ;;  %v2286_v13 = vld [vmem:[%s5922_s22 + $0xc8] sm:$0xff] }
 0x1fe   : > { %v1745_v48 = vmul.f32 %v6421_v3, %v1744_v10  ;;  %v1799_v46 = vsel %vm6583_vm9, %v6395_v5, %v1795_v25  ;;  %vm1786_vm11 = vweird.f32 %v6381_v30  ;;  %v1774_v19 = vsub.f32 1.5, %v6570_v59  ;;  %v2287_v59 = vld [vmem:[%s5922_s22 + $0xd0] sm:$0xff] }
 0x1ff   : > { %vm1827_vm12 = vweird.f32 %v6453_v4  ;;  %v6607_v10 = vadd.f32 1e-05, %v1377_v62  ;;  %vm1776_vm14 = vweird.f32 %v6404_v15  ;;  %v6621_v25 = vmul.f32 %v6453_v4, %v1824_v29 }
 0x200   : > { %2610 = vperm.xlu1 %3963, %v2439_v43   ;;  %v6604_v43 = vmul.f32 0.5, %v1812_v8  ;;  %v1376_v62 = vmul.f32 0.0051020407, %v6038_v28  ;;  %v6635_v9 = vmul.f32 0.5, %v1802_v58  ;;  %v1842_v8 = vmul.f32 %v6563_v22, %v1841_v21  ;;  %v8999_v28 = vld [vmem:[#allocation159_spill] sm:$0xff] }
 0x201   : > { %v6519_v31 = vpop.xlane.xlu2 %1294  ;;  %4042 = vrsqrt.f32 %v6590_v45  ;;  %v1759_v17 = vsel %vm6615_vm13, %v6410_v40, %v1755_v6  ;;  %vm1787_vm1 = vweird.f32 %v6459_v20  ;;  %vm1826_vm2 = vweird.f32 %v6378_v32 }
 0x202   : > { %8989 = vst [vmem:[#allocation156_spill] sm:$0xff] %v6519_v31  ;;  %v1719_v31 = vsel %vm6533_vm5, %v6358_v26, %v1715_v52  ;;  %v8993_v26 = vld [vmem:[#allocation157_spill] sm:$0xff]  ;;  %v2442_v21 = vmul.f32 %v2287_v59, %v1759_v17  ;;  %v1843_v40 = vmul.f32 0.5, %v1842_v8  ;;  %vm1777_vm3 = vweird.f32 %v6476_v39  ;;  %vm6667_vm4 = vmor %vm1826_vm2, %vm1827_vm12  ;;  %v2294_v59 = vld [vmem:[%s5922_s22 + $0x108] sm:$0xff] }
 0x203   : > { %v1373_v52 = vmul.f32 0.0051020407, %v8993_v26  ;;  %v2438_v50 = vmul.f32 %v2283_v47, %v1719_v31  ;;  %v6568_v0 = vpop.xlane.xlu0 %1286  ;;  %v1378_v31 = vmul.f32 0.0051020407, %v8994_v16  ;;  %v1784_v47 = vsub.f32 1.5, %v6557_v41  ;;  %v6609_v41 = vpop.eup %4038  ;;  %vm6689_vm6 = vmor %vm1786_vm11, %vm1787_vm1 }
 0x204   : > { %v1852_v26 = vmul.f32 %v6551_v35, %v1851_v38  ;;  %v2446_v38 = vmul.f32 %v2291_v24, %v1799_v46  ;;  %v6639_v29 = vpop.eup %4040  ;;  %v1381_v16 = vmul.f32 0.0051020407, %v8999_v28  ;;  %v1881_v51 = vmul.f32 %v6609_v41, %v6525_v23  ;;  %vm6706_vm10 = vmor %vm1776_vm14, %vm1777_vm3 }
 0x205   : > { %2605 = vperm.xlu2 %3964, %v2438_v50   ;;  %v6596_v42 = vadd.f32 1e-05, %v1373_v52  ;;  %v6624_v52 = vadd.f32 1e-05, %v1378_v31  ;;  %v6627_v50 = vpop.xlane.xlu1 %1290  ;;  %v1749_v31 = vsel %vm1748_vm15, %v6421_v3, %v1745_v48  ;;  %v6651_v24 = vadd.f32 1e-05, %v1376_v62 }
 0x206   : > { %2645 = vperm.xlu0 %3965, %v2446_v38   ;;  %v2441_v58 = vmul.f32 %v2286_v13, %v1749_v31  ;;  %v1853_v46 = vmul.f32 0.5, %v1852_v26  ;;  %v1380_v28 = vmul.f32 0.0051020407, %v6100_v1  ;;  %v1831_v6 = vmul.f32 %v6639_v29, %v6545_v11 }
 0x207   : > { %4044 = vrsqrt.f32 %v6596_v42  ;;  %v1785_v5 = vmul.f32 %v6459_v20, %v1784_v47  ;;  %v1775_v26 = vmul.f32 %v6476_v39, %v1774_v19  ;;  %v6671_v32 = vadd.f32 1e-05, %v1381_v16  ;;  %v6673_v62 = vpop.eup %4042 }
 0x208   : > { %4046 = vrsqrt.f32 %v6607_v10  ;;  %2625 = vperm.xlu1 %3963, %v2442_v21   ;;  %v1814_v13 = vsub.f32 1.5, %v6604_v43  ;;  %vm1856_vm5 = vweird.f32 %v6474_v27  ;;  %v1882_v47 = vmul.f32 %v6609_v41, %v1881_v51  ;;  %v9008_v51 = vld [vmem:[#allocation160_spill] sm:$0xff] }
 0x209   : > { %v6592_v7 = vpop.xlane.xlu2 %1306  ;;  %4048 = vrsqrt.f32 %v6624_v52  ;;  %v1829_v19 = vsel %vm6667_vm4, %v6453_v4, %v6621_v25  ;;  %vm1817_vm7 = vweird.f32 %v6501_v55  ;;  %v1804_v43 = vsub.f32 1.5, %v6635_v9  ;;  %v2289_v25 = vld [vmem:[%s5922_s22 + $0xe0] sm:$0xff] }
 0x20a   : > { %vm1806_vm8 = vweird.f32 %v6448_v2  ;;  %v1854_v16 = vsub.f32 1.5, %v1853_v46  ;;  %4050 = vrsqrt.f32 %v6651_v24  ;;  %v6697_v4 = vadd.f32 1e-05, %v1380_v28  ;;  %v2290_v46 = vld [vmem:[%s5922_s22 + $0xe8] sm:$0xff] }
 0x20b   : > { %v6654_v3 = vpop.xlane.xlu0 %1298  ;;  %v1844_v17 = vsub.f32 1.5, %v1843_v40  ;;  %v1832_v9 = vmul.f32 %v6639_v29, %v1831_v6  ;;  %v1384_v21 = vmul.f32 0.0051020407, %v6149_v57  ;;  %vm1816_vm9 = vweird.f32 %v6437_v56 }
 0x20c   : > { %9000 = vst [vmem:[#allocation157_spill] sm:$0xff] %v6654_v3  ;;  %4052 = vrsqrt.f32 %v6671_v32  ;;  %v2449_v15 = vmul.f32 %v2294_v59, %v1829_v19  ;;  %v1779_v40 = vsel %vm6706_vm10, %v6476_v39, %v1775_v26  ;;  %v1789_v6 = vsel %vm6689_vm6, %v6459_v20, %v1785_v5  ;;  %vm6806_vm6 = vmor %vm1816_vm9, %vm1817_vm7 }
 0x20d   : > { %2620 = vperm.xlu2 %3964, %v2441_v58   ;;  %v6683_v8 = vpop.eup %4044  ;;  %v1379_v58 = vmul.f32 0.0051020407, %v9008_v51  ;;  %v6718_v1 = vpop.xlane.xlu1 %1302  ;;  %v1871_v57 = vmul.f32 %v6673_v62, %v6590_v45  ;;  %v6728_v51 = vmul.f32 0.5, %v1882_v47  ;;  %4054 = vrsqrt.f32 %v6697_v4 }
 0x20e   : > { %v6700_v31 = vpop.eup %4046  ;;  %v1861_v3 = vmul.f32 %v6683_v8, %v6596_v42  ;;  %v1383_v39 = vmul.f32 0.0051020407, %v6169_v36  ;;  %2660 = vperm.xlu0 %3965, %v2449_v15   ;;  %v2445_v26 = vmul.f32 %v2290_v46, %v1789_v6  ;;  %v1855_v20 = vmul.f32 %v6551_v35, %v1854_v16  ;;  %v2292_v6 = vld [vmem:[%s5922_s22 + $0xf8] sm:$0xff] }
 0x20f   : > { %v6714_v28 = vpop.eup %4048  ;;  %v1901_v19 = vmul.f32 %v6700_v31, %v6607_v10  ;;  %vm1857_vm11 = vweird.f32 %v6551_v35  ;;  %v6740_v47 = vadd.f32 1e-05, %v1384_v21  ;;  %v1805_v36 = vmul.f32 %v6521_v34, %v1804_v43 }
 0x210   : > { %v1911_v5 = vmul.f32 %v6714_v28, %v6624_v52  ;;  %v6744_v38 = vpop.eup %4050  ;;  %vm1807_vm12 = vweird.f32 %v6521_v34  ;;  %v6749_v16 = vadd.f32 1e-05, %v1379_v58  ;;  %2640 = vperm.xlu1 %3963, %v2445_v26   ;;  %v6754_v21 = vmul.f32 %v6563_v22, %v1844_v17  ;;  %vm6766_vm15 = vmor %vm1856_vm5, %vm1857_vm11 }
 0x211   : > { %v6660_v48 = vpop.xlane.xlu2 %1318  ;;  %vm1847_vm13 = vweird.f32 %v6563_v22  ;;  %v1872_v46 = vmul.f32 %v6673_v62, %v1871_v57  ;;  %vm1887_vm14 = vweird.f32 %v6609_v41  ;;  %vm1837_vm1 = vweird.f32 %v6639_v29  ;;  %vm6782_vm3 = vmor %vm1806_vm8, %vm1807_vm12 }
 0x212   : > { %9001 = vst [vmem:[#allocation158_spill] sm:$0xff] %v6660_v48  ;;  %v2444_v48 = vmul.f32 %v2289_v25, %v1779_v40  ;;  %v1815_v25 = vmul.f32 %v6501_v55, %v1814_v13  ;;  %v2297_v13 = vld [vmem:[%s5922_s22 + $0x120] sm:$0xff]  ;;  %v6760_v43 = vpop.eup %4052  ;;  %v1884_v17 = vsub.f32 1.5, %v6728_v51  ;;  %vm1886_vm2 = vweird.f32 %v6525_v23 }
 0x213   : > { %v6751_v30 = vpop.xlane.xlu0 %1310  ;;  %v1902_v15 = vmul.f32 %v6700_v31, %v1901_v19  ;;  %v6775_v40 = vadd.f32 1e-05, %v1383_v39  ;;  %vm1846_vm4 = vweird.f32 %v6482_v53  ;;  %v1912_v57 = vmul.f32 %v6714_v28, %v1911_v5  ;;  %v6794_v19 = vpop.eup %4054  ;;  %vm6855_vm11 = vmor %vm1886_vm2, %vm1887_vm14 }
 0x214   : > { %9009 = vst [vmem:[#allocation159_spill] sm:$0xff] %v6751_v30  ;;  %4056 = vrsqrt.f32 %v6740_v47  ;;  %v1859_v51 = vsel %vm6766_vm15, %v6551_v35, %v1855_v20  ;;  %vm1836_vm5 = vweird.f32 %v6545_v11  ;;  %v1382_v2 = vmul.f32 0.0051020407, %v6174_v60  ;;  %vm6871_vm14 = vmor %vm1846_vm4, %vm1847_vm13 }
 0x215   : > { %2635 = vperm.xlu2 %3964, %v2444_v48   ;;  %v1833_v48 = vmul.f32 0.5, %v1832_v9  ;;  %v1862_v9 = vmul.f32 %v6683_v8, %v1861_v3  ;;  %v1891_v3 = vmul.f32 %v6744_v38, %v6651_v24  ;;  %4058 = vrsqrt.f32 %v6749_v16  ;;  %vm6887_vm15 = vmor %vm1836_vm5, %vm1837_vm1 }
 0x216   : > { %v2452_v39 = vmul.f32 %v2297_v13, %v1859_v51  ;;  %v1809_v26 = vsel %vm6782_vm3, %v6521_v34, %v1805_v36  ;;  %v1941_v20 = vmul.f32 %v6760_v43, %v6671_v32  ;;  %v1387_v58 = vmul.f32 0.0051020407, %v6213_v33  ;;  %v2293_v13 = vld [vmem:[%s5922_s22 + $0x100] sm:$0xff]  ;;  %v6819_v34 = vpop.xlane.xlu1 %1314 }
 0x217   : > { %v1834_v35 = vsub.f32 1.5, %v1833_v48  ;;  %v2447_v60 = vmul.f32 %v2292_v6, %v1809_v26  ;;  %v6814_v51 = vmul.f32 0.5, %v1872_v46  ;;  %v6816_v27 = vmul.f32 0.5, %v1862_v9 }
 0x218   : > { %4060 = vrsqrt.f32 %v6775_v40  ;;  %2675 = vperm.xlu0 %3965, %v2452_v39   ;;  %v1819_v56 = vsel %vm6806_vm6, %v6501_v55, %v1815_v25  ;;  %v6824_v36 = vmul.f32 0.5, %v1902_v15  ;;  %v1913_v48 = vmul.f32 0.5, %v1912_v57 }
 0x219   : > { %v6742_v59 = vpop.xlane.xlu2 %1330  ;;  %v1892_v33 = vmul.f32 %v6744_v38, %v1891_v3  ;;  %v1931_v46 = vmul.f32 %v6794_v19, %v6697_v4  ;;  %v1885_v6 = vmul.f32 %v6609_v41, %v1884_v17  ;;  %v6832_v26 = vadd.f32 1e-05, %v1382_v2 }
 0x21a   : > { %v1386_v39 = vmul.f32 0.0051020407, %v6230_v14  ;;  %v2448_v30 = vmul.f32 %v2293_v13, %v1819_v56  ;;  %v6835_v5 = vpop.eup %4056  ;;  %vm1867_vm7 = vweird.f32 %v6683_v8  ;;  %vm1916_vm8 = vweird.f32 %v6624_v52 }
 0x21b   : > { %v1942_v55 = vmul.f32 %v6760_v43, %v1941_v20  ;;  %v6840_v25 = vadd.f32 1e-05, %v1387_v58  ;;  %v6842_v15 = vpop.eup %4058  ;;  %v1835_v17 = vmul.f32 %v6639_v29, %v1834_v35  ;;  %v1874_v57 = vsub.f32 1.5, %v6814_v51  ;;  %v6848_v3 = vpop.xlane.xlu0 %1322 }
 0x21c   : > { %v1864_v14 = vsub.f32 1.5, %v6816_v27  ;;  %vm1917_vm10 = vweird.f32 %v6714_v28  ;;  %2655 = vperm.xlu1 %3963, %v2448_v30   ;;  %9017 = vst [vmem:[#allocation166_spill] sm:$0xff] %v6848_v3  ;;  %vm1877_vm9 = vweird.f32 %v6673_v62  ;;  %vm1866_vm12 = vweird.f32 %v6596_v42 }
 0x21d   : > { %2650 = vperm.xlu2 %3964, %v2447_v60   ;;  %v1904_v35 = vsub.f32 1.5, %v6824_v36  ;;  %v1914_v20 = vsub.f32 1.5, %v1913_v48  ;;  %v6861_v58 = vmul.f32 0.5, %v1892_v33  ;;  %v1932_v30 = vmul.f32 %v6794_v19, %v1931_v46  ;;  %v2300_v60 = vld [vmem:[%s5922_s22 + $0x138] sm:$0xff]  ;;  %v2295_v46 = vld [vmem:[%s5922_s22 + $0x110] sm:$0xff]  ;;  %vm6932_vm4 = vmor %vm1916_vm8, %vm1917_vm10 }
 0x21e   : > { %v6865_v13 = vpop.eup %4060  ;;  %v1971_v51 = vmul.f32 %v6835_v5, %v6740_v47  ;;  %4062 = vrsqrt.f32 %v6832_v26  ;;  %v6878_v27 = vadd.f32 1e-05, %v1386_v39  ;;  %v1889_v56 = vsel %vm6855_vm11, %v6609_v41, %v1885_v6  ;;  %v2296_v41 = vld [vmem:[%s5922_s22 + $0x118] sm:$0xff]  ;;  %vm6956_vm10 = vmor %vm1866_vm12, %vm1867_vm7 }
 0x21f   : > { %vm1876_vm13 = vweird.f32 %v6590_v45  ;;  %v1943_v36 = vmul.f32 0.5, %v1942_v55  ;;  %v1921_v48 = vmul.f32 %v6842_v15, %v6749_v16  ;;  %4064 = vrsqrt.f32 %v6840_v25 }
 0x220   : > { %v1385_v33 = vmul.f32 0.0051020407, %v6235_v37  ;;  %v1390_v6 = vmul.f32 0.0051020407, %v6281_v12  ;;  %v2455_v39 = vmul.f32 %v2300_v60, %v1889_v56  ;;  %v1839_v11 = vsel %vm6887_vm15, %v6639_v29, %v1835_v17  ;;  %v6916_v29 = vpop.xlane.xlu1 %1326  ;;  %vm1878_vm7 = vmor %vm1876_vm13, %vm1877_vm9 }
 0x221   : > { %v6829_v9 = vpop.permute.xlu2 %2500  ;;  %v1849_v55 = vsel %vm6871_vm14, %v6563_v22, %v6754_v21  ;;  %v1915_v2 = vmul.f32 %v6714_v28, %v1914_v20  ;;  %v1961_v37 = vmul.f32 %v6865_v13, %v6775_v40  ;;  %v1389_v3 = vmul.f32 0.0051020407, %v6309_v54 }
 0x222   : > { %9016 = vst [vmem:[#allocation160_spill] sm:$0xff] %v6829_v9  ;;  %v6907_v9 = vmul.f32 0.5, %v1932_v30  ;;  %v1972_v60 = vmul.f32 %v6835_v5, %v1971_v51  ;;  %4066 = vrsqrt.f32 %v6878_v27  ;;  %2690 = vperm.xlu0 %3965, %v2455_v39   ;;  %v2450_v17 = vmul.f32 %v2295_v46, %v1839_v11  ;;  %v2298_v11 = vld [vmem:[%s5922_s22 + $0x128] sm:$0xff] }
 0x223   : > { %v2451_v22 = vmul.f32 %v2296_v41, %v1849_v55  ;;  %v1875_v21 = vmul.f32 %v6673_v62, %v1874_v57  ;;  %v1865_v20 = vmul.f32 %v6683_v8, %v1864_v14  ;;  %vm1946_vm1 = vweird.f32 %v6671_v32  ;;  %v2299_v55 = vld [vmem:[%s5922_s22 + $0x130] sm:$0xff] }
 0x224   : > { %v1922_v30 = vmul.f32 %v6842_v15, %v1921_v48  ;;  %v6922_v54 = vadd.f32 1e-05, %v1385_v33  ;;  %v6924_v23 = vpop.eup %4062  ;;  %vm1906_vm2 = vweird.f32 %v6607_v10  ;;  %vm1907_vm3 = vweird.f32 %v6700_v31  ;;  %v2303_v48 = vld [vmem:[%s5922_s22 + $0x150] sm:$0xff] }
 0x225   : > { %vm1897_vm5 = vweird.f32 %v6744_v38  ;;  %v1944_v14 = vsub.f32 1.5, %v1943_v36  ;;  %v6937_v51 = vadd.f32 1e-05, %v1390_v6  ;;  %2665 = vperm.xlu2 %3964, %v2450_v17   ;;  %2670 = vperm.xlu1 %3963, %v2451_v22   ;;  %v6939_v56 = vpop.eup %4064  ;;  %v6942_v53 = vmul.f32 %v6700_v31, %v1904_v35  ;;  %v6963_v6 = vpop.xlane.xlu0 %1334 }
 0x226   : > { %vm1896_vm6 = vweird.f32 %v6651_v24  ;;  %vm1947_vm8 = vweird.f32 %v6760_v43  ;;  %v6946_v52 = vadd.f32 1e-05, %v1389_v3  ;;  %v1919_v36 = vsel %vm6932_vm4, %v6714_v28, %v1915_v2 }
 0x227   : > { %v1894_v33 = vsub.f32 1.5, %v6861_v58  ;;  %v1934_v46 = vsub.f32 1.5, %v6907_v9  ;;  %v1962_v3 = vmul.f32 %v6865_v13, %v1961_v37  ;;  %v1973_v41 = vmul.f32 0.5, %v1972_v60  ;;  %vm7007_vm14 = vmor %vm1946_vm1, %vm1947_vm8 }
 0x228   : > { %v6965_v39 = vmul.f32 0.5, %v1922_v30  ;;  %4068 = vrsqrt.f32 %v6922_v54  ;;  %v1388_v28 = vmul.f32 0.0051020407, %v6301_v63  ;;  %v1869_v42 = vsel %vm6956_vm10, %v6683_v8, %v1865_v20  ;;  %v6974_v58 = vpop.eup %4066  ;;  %vm7022_vm1 = vmor %vm1906_vm2, %vm1907_vm3 }
 0x229   : > { %v6912_v12 = vpop.permute.xlu2 %2510  ;;  %v1945_v9 = vmul.f32 %v6760_v43, %v1944_v14  ;;  %4070 = vrsqrt.f32 %v6937_v51  ;;  %v1393_v2 = vmul.f32 0.0051020407, %v6345_v44  ;;  %v2458_v63 = vmul.f32 %v2303_v48, %v1919_v36  ;;  %vm7040_vm2 = vmor %vm1896_vm6, %vm1897_vm5 }
 0x22a   : > { %v1951_v37 = vmul.f32 %v6924_v23, %v6832_v26  ;;  %v2001_v8 = vmul.f32 %v6939_v56, %v6840_v25  ;;  %4072 = vrsqrt.f32 %v6946_v52  ;;  %v1879_v60 = vsel %vm1878_vm7, %v6673_v62, %v1875_v21 }
 0x22b   : > { %v6991_v45 = vmul.f32 0.5, %v1962_v3  ;;  %v1974_v22 = vsub.f32 1.5, %v1973_v41  ;;  %2705 = vperm.xlu0 %3965, %v2458_v63   ;;  %v2453_v20 = vmul.f32 %v2298_v11, %v1869_v42  ;;  %v2454_v30 = vmul.f32 %v2299_v55, %v1879_v60 }
 0x22c   : > { %v1895_v57 = vmul.f32 %v6744_v38, %v1894_v33  ;;  %vm1937_vm9 = vweird.f32 %v6794_v19  ;;  %vm1976_vm11 = vweird.f32 %v6740_v47  ;;  %v1991_v14 = vmul.f32 %v6974_v58, %v6878_v27 }
 0x22d   : > { %v7000_v62 = vadd.f32 1e-05, %v1388_v28  ;;  %vm1936_vm12 = vweird.f32 %v6697_v4  ;;  %vm1927_vm15 = vweird.f32 %v6842_v15  ;;  %vm1977_vm13 = vweird.f32 %v6835_v5  ;;  %2680 = vperm.xlu2 %3964, %v2453_v20   ;;  %2685 = vperm.xlu1 %3963, %v2454_v30   ;;  %v2306_v28 = vld [vmem:[%s5922_s22 + $0x168] sm:$0xff] }
 0x22e   : > { %v1392_v36 = vmul.f32 0.0051020407, %v6373_v18  ;;  %v7014_v48 = vadd.f32 1e-05, %v1393_v2  ;;  %v7016_v35 = vpop.eup %4068  ;;  %vm1926_vm4 = vweird.f32 %v6749_v16  ;;  %v1952_v33 = vmul.f32 %v6924_v23, %v1951_v37  ;;  %v2302_v37 = vld [vmem:[%s5922_s22 + $0x148] sm:$0xff]  ;;  %vm7092_vm10 = vmor %vm1976_vm11, %vm1977_vm13 }
 0x22f   : > { %v2002_v18 = vmul.f32 %v6939_v56, %v2001_v8  ;;  %v1396_v3 = vmul.f32 0.0051020407, %v6393_v49  ;;  %v1949_v41 = vsel %vm7007_vm14, %v6760_v43, %v1945_v9  ;;  %v7034_v10 = vpop.eup %4070  ;;  %v7045_v11 = vmul.f32 %v6794_v19, %v1934_v46  ;;  %v2301_v46 = vld [vmem:[%s5922_s22 + $0x140] sm:$0xff]  ;;  %vm7107_vm11 = vmor %vm1936_vm12, %vm1937_vm9 }
 0x230   : > { %v1924_v49 = vsub.f32 1.5, %v6965_v39  ;;  %v1964_v55 = vsub.f32 1.5, %v6991_v45  ;;  %v1975_v43 = vmul.f32 %v6835_v5, %v1974_v22  ;;  %v7052_v2 = vpop.eup %4072  ;;  %v1992_v63 = vmul.f32 %v6974_v58, %v1991_v14  ;;  %vm7124_vm9 = vmor %vm1926_vm4, %vm1927_vm15 }
 0x231   : > { %v6989_v17 = vpop.permute.xlu2 %2520  ;;  %4074 = vrsqrt.f32 %v7000_v62  ;;  %v1899_v24 = vsel %vm7040_vm2, %v6744_v38, %v1895_v57  ;;  %v1909_v39 = vsel %vm7022_vm1, %v6700_v31, %v6942_v53  ;;  %v7065_v8 = vadd.f32 1e-05, %v1392_v36 }
 0x232   : > { %v6993_v44 = vpop.permute.xlu1 %2495  ;;  %4076 = vrsqrt.f32 %v7014_v48  ;;  %v1391_v60 = vmul.f32 0.0051020407, %v6356_v61  ;;  %v2461_v45 = vmul.f32 %v2306_v28, %v1949_v41  ;;  %v7069_v22 = vmul.f32 0.5, %v1952_v33 }
 0x233   : > { %v2003_v20 = vmul.f32 0.5, %v2002_v18  ;;  %v2031_v38 = vmul.f32 %v7034_v10, %v6937_v51  ;;  %v7073_v30 = vadd.f32 1e-05, %v1396_v3  ;;  %v1981_v31 = vmul.f32 %v7016_v35, %v6922_v54  ;;  %v9036_v3 = vld [vmem:[#allocation162_spill] sm:$0xff] }
 0x234   : > { %v2021_v53 = vmul.f32 %v7052_v2, %v6946_v52  ;;  %2720 = vperm.xlu0 %3965, %v2461_v45   ;;  %v2456_v14 = vmul.f32 %v2301_v46, %v1899_v24  ;;  %v2457_v61 = vmul.f32 %v2302_v37, %v1909_v39  ;;  %v1925_v36 = vmul.f32 %v6842_v15, %v1924_v49  ;;  %v2309_v24 = vld [vmem:[%s5922_s22 + $0x180] sm:$0xff] }
 0x235   : > { %vm1967_vm3 = vweird.f32 %v6865_v13  ;;  %vm1957_vm5 = vweird.f32 %v6924_v23  ;;  %v1993_v32 = vmul.f32 0.5, %v1992_v63  ;;  %vm2006_vm6 = vweird.f32 %v6840_v25 }
 0x236   : > { %v7050_v9 = vpop.permute.xlu0 %2505  ;;  %vm1966_vm8 = vweird.f32 %v6775_v40  ;;  %vm2007_vm7 = vweird.f32 %v6939_v56  ;;  %4078 = vrsqrt.f32 %v7065_v8  ;;  %v7098_v18 = vadd.f32 1e-05, %v1391_v60  ;;  %2695 = vperm.xlu2 %3964, %v2456_v14   ;;  %2700 = vperm.xlu1 %3963, %v2457_v61   ;;  %v2304_v14 = vld [vmem:[%s5922_s22 + $0x158] sm:$0xff] }
 0x237   : > { %v1395_v41 = vmul.f32 0.0051020407, %v9036_v3  ;;  %v7101_v28 = vpop.eup %4074  ;;  %vm1956_vm14 = vweird.f32 %v6832_v26  ;;  %v2004_v42 = vsub.f32 1.5, %v2003_v20  ;;  %v2032_v49 = vmul.f32 %v7034_v10, %v2031_v38  ;;  %v9042_v20 = vld [vmem:[#allocation161_spill] sm:$0xff]  ;;  %vm7178_vm2 = vmor %vm2006_vm6, %vm2007_vm7 }
 0x238   : > { %4080 = vrsqrt.f32 %v7073_v30  ;;  %v1979_v63 = vsel %vm7092_vm10, %v6835_v5, %v1975_v43  ;;  %v7118_v46 = vpop.eup %4076  ;;  %v7129_v39 = vmul.f32 %v6865_v13, %v1964_v55  ;;  %v1954_v37 = vsub.f32 1.5, %v7069_v22  ;;  %v2305_v22 = vld [vmem:[%s5922_s22 + $0x160] sm:$0xff]  ;;  %vm7190_vm10 = vmor %vm1966_vm8, %vm1967_vm3 }
 0x239   : > { %v7075_v57 = vpop.permute.xlu2 %2530  ;;  %v1982_v60 = vmul.f32 %v7016_v35, %v1981_v31  ;;  %v2022_v5 = vmul.f32 %v7052_v2, %v2021_v53  ;;  %v1994_v45 = vsub.f32 1.5, %v1993_v32  ;;  %v1394_v38 = vmul.f32 0.0051020407, %v9042_v20  ;;  %v9043_v53 = vld [vmem:[#allocation163_spill] sm:$0xff]  ;;  %vm7207_vm3 = vmor %vm1956_vm14, %vm1957_vm5 }
 0x23a   : > { %v7081_v21 = vpop.permute.xlu1 %2515  ;;  %v1929_v16 = vsel %vm7124_vm9, %v6842_v15, %v1925_v36  ;;  %v1939_v55 = vsel %vm7107_vm11, %v6794_v19, %v7045_v11  ;;  %4082 = vrsqrt.f32 %v7098_v18  ;;  %v7147_v31 = vadd.f32 1e-05, %v1395_v41 }
 0x23b   : > { %v1399_v61 = vmul.f32 0.0051020407, %v9043_v53  ;;  %v2464_v32 = vmul.f32 %v2309_v24, %v1979_v63  ;;  %v2005_v33 = vmul.f32 %v6939_v56, %v2004_v42  ;;  %v2033_v3 = vmul.f32 0.5, %v2032_v49  ;;  %v2312_v53 = vld [vmem:[%s5922_s22 + $0x198] sm:$0xff] }
 0x23c   : > { %v2011_v15 = vmul.f32 %v7101_v28, %v7000_v62  ;;  %v2061_v36 = vmul.f32 %v7118_v46, %v7014_v48  ;;  %v7157_v19 = vpop.eup %4078  ;;  %vm1997_vm12 = vweird.f32 %v6974_v58  ;;  %v1983_v11 = vmul.f32 0.5, %v1982_v60 }
 0x23d   : > { %v2023_v41 = vmul.f32 0.5, %v2022_v5  ;;  %2735 = vperm.xlu0 %3965, %v2464_v32   ;;  %v2459_v47 = vmul.f32 %v2304_v14, %v1929_v16  ;;  %v2460_v63 = vmul.f32 %v2305_v22, %v1939_v55  ;;  %v1955_v49 = vmul.f32 %v6924_v23, %v1954_v37  ;;  %v9048_v5 = vld [vmem:[#allocation165_spill] sm:$0xff] }
 0x23e   : > { %v7134_v43 = vpop.permute.xlu0 %2540  ;;  %v7162_v42 = vpop.eup %4080  ;;  %vm1987_vm15 = vweird.f32 %v7016_v35  ;;  %vm2036_vm13 = vweird.f32 %v6937_v51  ;;  %vm2037_vm1 = vweird.f32 %v7034_v10  ;;  %v7168_v20 = vadd.f32 1e-05, %v1394_v38 }
 0x23f   : > { %9041 = vst [vmem:[#allocation162_spill] sm:$0xff] %v7134_v43  ;;  %v7171_v60 = vmul.f32 %v6974_v58, %v1994_v45  ;;  %vm1996_vm4 = vweird.f32 %v6878_v27  ;;  %4084 = vrsqrt.f32 %v7147_v31  ;;  %v1398_v16 = vmul.f32 0.0051020407, %v9048_v5  ;;  %2710 = vperm.xlu2 %3964, %v2459_v47   ;;  %2715 = vperm.xlu1 %3963, %v2460_v63   ;;  %v2307_v63 = vld [vmem:[%s5922_s22 + $0x170] sm:$0xff]  ;;  %vm7256_vm11 = vmor %vm2036_vm13, %vm2037_vm1 }
 0x240   : > { %v7184_v14 = vadd.f32 1e-05, %v1399_v61  ;;  %vm1986_vm6 = vweird.f32 %v6922_v54  ;;  %v2034_v25 = vsub.f32 1.5, %v2033_v3  ;;  %v2012_v38 = vmul.f32 %v7101_v28, %v2011_v15  ;;  %v7201_v61 = vpop.eup %4082  ;;  %v9055_v5 = vld [vmem:[#allocation156_spill] sm:$0xff]  ;;  %vm7270_vm9 = vmor %vm1996_vm4, %vm1997_vm12 }
 0x241   : > { %v7155_v4 = vpop.permute.xlu2 %2545  ;;  %v2062_v55 = vmul.f32 %v7118_v46, %v2061_v36  ;;  %v2009_v22 = vsel %vm7178_vm2, %v6939_v56, %v2005_v33  ;;  %v1984_v32 = vsub.f32 1.5, %v1983_v11  ;;  %v2024_v3 = vsub.f32 1.5, %v2023_v41  ;;  %v9054_v33 = vld [vmem:[#allocation164_spill] sm:$0xff]  ;;  %v2308_v41 = vld [vmem:[%s5922_s22 + $0x178] sm:$0xff]  ;;  %vm7288_vm12 = vmor %vm1986_vm6, %vm1987_vm15 }
 0x242   : > { %9044 = vst [vmem:[#allocation161_spill] sm:$0xff] %v7155_v4  ;;  %v7160_v24 = vpop.permute.xlu1 %2525  ;;  %v2051_v15 = vmul.f32 %v7157_v19, %v7065_v8  ;;  %v2091_v36 = vmul.f32 %v7162_v42, %v7073_v30  ;;  %4086 = vrsqrt.f32 %v7168_v20  ;;  %v1397_v47 = vmul.f32 0.0051020407, %v9054_v33 }
 0x243   : > { %9045 = vst [vmem:[#allocation163_spill] sm:$0xff] %v7160_v24  ;;  %v1959_v26 = vsel %vm7207_vm3, %v6924_v23, %v1955_v49  ;;  %v1969_v11 = vsel %vm7190_vm10, %v6865_v13, %v7129_v39  ;;  %v7228_v37 = vadd.f32 1e-05, %v1398_v16  ;;  %4088 = vrsqrt.f32 %v7184_v14 }
 0x244   : > { %v2467_v43 = vmul.f32 %v2312_v53, %v2009_v22  ;;  %v2035_v33 = vmul.f32 %v7034_v10, %v2034_v25  ;;  %v2013_v24 = vmul.f32 0.5, %v2012_v38  ;;  %v2063_v4 = vmul.f32 0.5, %v2062_v55 }
 0x245   : > { %v2041_v23 = vmul.f32 %v7201_v61, %v7098_v18  ;;  %v7237_v40 = vpop.eup %4084  ;;  %v2052_v13 = vmul.f32 %v7157_v19, %v2051_v15  ;;  %v2092_v39 = vmul.f32 %v7162_v42, %v2091_v36  ;;  %v2462_v16 = vmul.f32 %v2307_v63, %v1959_v26 }
 0x246   : > { %v7215_v56 = vpop.permute.xlu0 %2555  ;;  %2750 = vperm.xlu0 %3965, %v2467_v43   ;;  %v2463_v45 = vmul.f32 %v2308_v41, %v1969_v11  ;;  %v1985_v25 = vmul.f32 %v7016_v35, %v1984_v32  ;;  %vm2027_vm5 = vweird.f32 %v7052_v2  ;;  %vm2066_vm8 = vweird.f32 %v7014_v48  ;;  %v2310_v41 = vld [vmem:[%s5922_s22 + $0x188] sm:$0xff] }
 0x247   : > { %9053 = vst [vmem:[#allocation165_spill] sm:$0xff] %v7215_v56  ;;  %v1402_v56 = vmul.f32 0.0051020407, %v9055_v5  ;;  %v7246_v38 = vadd.f32 1e-05, %v1397_v47  ;;  %v7249_v55 = vmul.f32 %v7052_v2, %v2024_v3  ;;  %vm2026_vm7 = vweird.f32 %v6946_v52  ;;  %2725 = vperm.xlu2 %3964, %v2462_v16   ;;  %v2318_v52 = vld [vmem:[%s5922_s22 + $0x1c8] sm:$0xff] }
 0x248   : > { %vm2017_vm14 = vweird.f32 %v7101_v28  ;;  %4090 = vrsqrt.f32 %v7228_v37  ;;  %2730 = vperm.xlu1 %3963, %v2463_v45   ;;  %v7264_v53 = vpop.eup %4086  ;;  %vm2016_vm13 = vweird.f32 %v7000_v62  ;;  %v2064_v32 = vsub.f32 1.5, %v2063_v4  ;;  %vm7348_vm3 = vmor %vm2026_vm7, %vm2027_vm5  ;;  %v2313_v62 = vld [vmem:[%s5922_s22 + $0x1a0] sm:$0xff] }
 0x249   : > { %v7235_v49 = vpop.permute.xlu2 %2560  ;;  %v7262_v22 = vadd.f32 1e-05, %v1402_v56  ;;  %v2042_v3 = vmul.f32 %v7201_v61, %v2041_v23  ;;  %v2081_v15 = vmul.f32 %v7237_v40, %v7147_v31  ;;  %v2039_v36 = vsel %vm7256_vm11, %v7034_v10, %v2035_v33  ;;  %v2315_v56 = vld [vmem:[%s5922_s22 + $0x1b0] sm:$0xff]  ;;  %v7282_v27 = vpop.eup %4088  ;;  %vm7367_vm5 = vmor %vm2016_vm13, %vm2017_vm14 }
 0x24a   : > { %v7241_v5 = vpop.permute.xlu1 %2535  ;;  %v2014_v4 = vsub.f32 1.5, %v2013_v24  ;;  %v7292_v26 = vmul.f32 0.5, %v2052_v13  ;;  %vm2067_vm1 = vweird.f32 %v7118_v46  ;;  %v2093_v63 = vmul.f32 0.5, %v2092_v39  ;;  %v2311_v24 = vld [vmem:[%s5922_s22 + $0x190] sm:$0xff] }
 0x24b   : > { %4092 = vrsqrt.f32 %v7246_v38  ;;  %v1405_v10 = vmul.f32 0.0051020407, %v6592_v7  ;;  %v1989_v11 = vsel %vm7288_vm12, %v7016_v35, %v1985_v25  ;;  %v1999_v54 = vsel %vm7270_vm9, %v6974_v58, %v7171_v60  ;;  %vm7332_vm10 = vmor %vm2066_vm8, %vm2067_vm1 }
 0x24c   : > { %v2071_v33 = vmul.f32 %v7264_v53, %v7168_v20  ;;  %v1401_v23 = vmul.f32 0.0051020407, %v6627_v50  ;;  %4094 = vrsqrt.f32 %v7262_v22  ;;  %v2470_v13 = vmul.f32 %v2315_v56, %v2039_v36 }
 0x24d   : > { %v2065_v39 = vmul.f32 %v7118_v46, %v2064_v32  ;;  %v2043_v35 = vmul.f32 0.5, %v2042_v3  ;;  %v2082_v16 = vmul.f32 %v7237_v40, %v2081_v15  ;;  %v2121_v45 = vmul.f32 %v7282_v27, %v7184_v14 }
 0x24e   : > { %v7310_v7 = vpop.permute.xlu0 %2570  ;;  %v7318_v60 = vpop.eup %4090  ;;  %v2094_v25 = vsub.f32 1.5, %v2093_v63  ;;  %v1400_v50 = vmul.f32 0.0051020407, %v6568_v0  ;;  %2765 = vperm.xlu0 %3965, %v2470_v13   ;;  %v2465_v43 = vmul.f32 %v2310_v41, %v1989_v11  ;;  %v2466_v51 = vmul.f32 %v2311_v24, %v1999_v54 }
 0x24f   : > { %v2015_v36 = vmul.f32 %v7101_v28, %v2014_v4  ;;  %vm2057_vm15 = vweird.f32 %v7157_v19  ;;  %vm2096_vm4 = vweird.f32 %v7073_v30  ;;  %v7324_v32 = vadd.f32 1e-05, %v1405_v10 }
 0x250   : > { %v2054_v3 = vsub.f32 1.5, %v7292_v26  ;;  %vm2056_vm2 = vweird.f32 %v7065_v8  ;;  %vm2047_vm6 = vweird.f32 %v7201_v61  ;;  %v2072_v15 = vmul.f32 %v7264_v53, %v2071_v33  ;;  %2740 = vperm.xlu2 %3964, %v2465_v43   ;;  %2745 = vperm.xlu1 %3963, %v2466_v51  }
 0x251   : > { %v7316_v58 = vpop.permute.xlu2 %2575  ;;  %v7338_v56 = vadd.f32 1e-05, %v1401_v23  ;;  %v7342_v4 = vpop.eup %4092  ;;  %vm2046_vm8 = vweird.f32 %v7098_v18  ;;  %vm2097_vm11 = vweird.f32 %v7162_v42  ;;  %v2111_v26 = vmul.f32 %v7318_v60, %v7228_v37  ;;  %vm7427_vm1 = vmor %vm2056_vm2, %vm2057_vm15 }
 0x252   : > { %v7340_v47 = vpop.permute.xlu1 %2550  ;;  %v2122_v63 = vmul.f32 %v7282_v27, %v2121_v45  ;;  %v2069_v10 = vsel %vm7332_vm10, %v7118_v46, %v2065_v39  ;;  %v7361_v11 = vpop.eup %4094  ;;  %v2044_v54 = vsub.f32 1.5, %v2043_v35  ;;  %v7371_v24 = vmul.f32 0.5, %v2082_v16  ;;  %v2314_v35 = vld [vmem:[%s5922_s22 + $0x1a8] sm:$0xff]  ;;  %v9068_v45 = vld [vmem:[#allocation158_spill] sm:$0xff]  ;;  %vm7413_vm9 = vmor %vm2096_vm4, %vm2097_vm11 }
 0x253   : > { %v2095_v33 = vmul.f32 %v7162_v42, %v2094_v25  ;;  %v7374_v23 = vadd.f32 1e-05, %v1400_v50  ;;  %v1404_v46 = vmul.f32 0.0051020407, %v6718_v1  ;;  %4096 = vrsqrt.f32 %v7324_v32  ;;  %vm7444_vm15 = vmor %vm2046_vm8, %vm2047_vm6 }
 0x254   : > { %v2019_v13 = vsel %vm7367_vm5, %v7101_v28, %v2015_v36  ;;  %v2029_v39 = vsel %vm7348_vm3, %v7052_v2, %v7249_v55  ;;  %v7387_v16 = vmul.f32 0.5, %v2072_v15  ;;  %4098 = vrsqrt.f32 %v7338_v56  ;;  %v9069_v2 = vld [vmem:[#allocation157_spill] sm:$0xff] }
 0x255   : > { %v1408_v25 = vmul.f32 0.0051020407, %v9068_v45  ;;  %v2473_v1 = vmul.f32 %v2318_v52, %v2069_v10  ;;  %v2112_v50 = vmul.f32 %v7318_v60, %v2111_v26  ;;  %v2123_v43 = vmul.f32 0.5, %v2122_v63 }
 0x256   : > { %v2101_v28 = vmul.f32 %v7342_v4, %v7246_v38  ;;  %v2151_v51 = vmul.f32 %v7361_v11, %v7262_v22  ;;  %4100 = vrsqrt.f32 %v7374_v23  ;;  %v1403_v55 = vmul.f32 0.0051020407, %v9069_v2  ;;  %v7400_v48 = vpop.permute.xlu0 %2585 }
 0x257   : > { %2780 = vperm.xlu0 %3965, %v2473_v1   ;;  %v2468_v0 = vmul.f32 %v2313_v62, %v2019_v13  ;;  %v2469_v15 = vmul.f32 %v2314_v35, %v2029_v39  ;;  %v2055_v26 = vmul.f32 %v7157_v19, %v2054_v3  ;;  %v2045_v63 = vmul.f32 %v7201_v61, %v2044_v54  ;;  %v2321_v39 = vld [vmem:[%s5922_s22 + $0x1e0] sm:$0xff] }
 0x258   : > { %vm2087_vm7 = vweird.f32 %v7237_v40  ;;  %v7405_v10 = vadd.f32 1e-05, %v1404_v46  ;;  %v2084_v52 = vsub.f32 1.5, %v7371_v24  ;;  %vm2086_vm14 = vweird.f32 %v7147_v31 }
 0x259   : > { %v7396_v36 = vpop.permute.xlu2 %2590  ;;  %vm2077_vm13 = vweird.f32 %v7264_v53  ;;  %vm2126_vm12 = vweird.f32 %v7184_v14  ;;  %v7419_v3 = vadd.f32 1e-05, %v1408_v25  ;;  %2755 = vperm.xlu2 %3964, %v2468_v0   ;;  %2760 = vperm.xlu1 %3963, %v2469_v15   ;;  %v7421_v54 = vpop.eup %4096  ;;  %vm2076_vm4 = vweird.f32 %v7168_v20  ;;  %vm7506_vm8 = vmor %vm2086_vm14, %vm2087_vm7  ;;  %v2319_v20 = vld [vmem:[%s5922_s22 + $0x1d0] sm:$0xff] }
 0x25a   : > { %v2124_v24 = vsub.f32 1.5, %v2123_v43  ;;  %v2102_v46 = vmul.f32 %v7342_v4, %v2101_v28  ;;  %v2152_v13 = vmul.f32 %v7361_v11, %v2151_v51  ;;  %v2099_v62 = vsel %vm7413_vm9, %v7162_v42, %v2095_v33  ;;  %v7438_v35 = vpop.eup %4098  ;;  %v7454_v42 = vpop.permute.xlu1 %2565  ;;  %v2316_v43 = vld [vmem:[%s5922_s22 + $0x1b8] sm:$0xff]  ;;  %vm7522_vm5 = vmor %vm2076_vm4, %vm2077_vm13 }
 0x25b   : > { %v2074_v45 = vsub.f32 1.5, %v7387_v16  ;;  %v7449_v25 = vmul.f32 0.5, %v2112_v50  ;;  %vm2127_vm2 = vweird.f32 %v7282_v27  ;;  %v7452_v1 = vadd.f32 1e-05, %v1403_v55  ;;  %v2317_v50 = vld [vmem:[%s5922_s22 + $0x1c0] sm:$0xff] }
 0x25c   : > { %4102 = vrsqrt.f32 %v7405_v10  ;;  %v1407_v33 = vmul.f32 0.0051020407, %v6819_v34  ;;  %v2049_v18 = vsel %vm7444_vm15, %v7201_v61, %v2045_v63  ;;  %v2059_v16 = vsel %vm7427_vm1, %v7157_v19, %v2055_v26  ;;  %v7466_v28 = vpop.eup %4100  ;;  %v9076_v19 = vld [vmem:[#allocation159_spill] sm:$0xff]  ;;  %vm7490_vm6 = vmor %vm2126_vm12, %vm2127_vm2 }
 0x25d   : > { %v2181_v51 = vmul.f32 %v7421_v54, %v7324_v32  ;;  %4104 = vrsqrt.f32 %v7419_v3  ;;  %v1411_v2 = vmul.f32 0.0051020407, %v6742_v59  ;;  %v2476_v34 = vmul.f32 %v2321_v39, %v2099_v62 }
 0x25e   : > { %v2125_v55 = vmul.f32 %v7282_v27, %v2124_v24  ;;  %v2103_v0 = vmul.f32 0.5, %v2102_v46  ;;  %v2141_v61 = vmul.f32 %v7438_v35, %v7338_v56  ;;  %v2153_v15 = vmul.f32 0.5, %v2152_v13  ;;  %v7498_v39 = vpop.permute.xlu0 %2600 }
 0x25f   : > { %4106 = vrsqrt.f32 %v7452_v1  ;;  %v1406_v26 = vmul.f32 0.0051020407, %v9076_v19  ;;  %2795 = vperm.xlu0 %3965, %v2476_v34   ;;  %v2471_v63 = vmul.f32 %v2316_v43, %v2049_v18  ;;  %v2472_v41 = vmul.f32 %v2317_v50, %v2059_v16  ;;  %v2324_v16 = vld [vmem:[%s5922_s22 + $0x1f8] sm:$0xff] }
 0x260   : > { %v2085_v8 = vmul.f32 %v7237_v40, %v2084_v52  ;;  %v2075_v59 = vmul.f32 %v7264_v53, %v2074_v45  ;;  %v2131_v24 = vmul.f32 %v7466_v28, %v7374_v23  ;;  %v7483_v46 = vadd.f32 1e-05, %v1407_v33 }
 0x261   : > { %v7477_v30 = vpop.permute.xlu2 %2605  ;;  %vm2117_vm10 = vweird.f32 %v7318_v60  ;;  %vm2156_vm3 = vweird.f32 %v7262_v22  ;;  %v2182_v52 = vmul.f32 %v7421_v54, %v2181_v51  ;;  %v7496_v62 = vadd.f32 1e-05, %v1411_v2  ;;  %2770 = vperm.xlu2 %3964, %v2471_v63   ;;  %2775 = vperm.xlu1 %3963, %v2472_v41  }
 0x262   : > { %v7500_v45 = vpop.eup %4102  ;;  %vm2107_vm11 = vweird.f32 %v7342_v4  ;;  %v2142_v33 = vmul.f32 %v7438_v35, %v2141_v61  ;;  %v2154_v18 = vsub.f32 1.5, %v2153_v15  ;;  %v2129_v43 = vsel %vm7490_vm6, %v7282_v27, %v2125_v55  ;;  %v2320_v15 = vld [vmem:[%s5922_s22 + $0x1d8] sm:$0xff]  ;;  %v7545_v63 = vpop.permute.xlu1 %2580 }
 0x263   : > { %v7516_v50 = vpop.eup %4104  ;;  %v2114_v51 = vsub.f32 1.5, %v7449_v25  ;;  %v2104_v2 = vsub.f32 1.5, %v2103_v0  ;;  %vm2157_vm7 = vweird.f32 %v7361_v11  ;;  %v7528_v34 = vadd.f32 1e-05, %v1406_v26 }
 0x264   : > { %v2132_v27 = vmul.f32 %v7466_v28, %v2131_v24  ;;  %4108 = vrsqrt.f32 %v7483_v46  ;;  %v2079_v55 = vsel %vm7522_vm5, %v7264_v53, %v2075_v59  ;;  %v2089_v61 = vsel %vm7506_vm8, %v7237_v40, %v2085_v8  ;;  %v9083_v8 = vld [vmem:[#allocation166_spill] sm:$0xff]  ;;  %vm7565_vm13 = vmor %vm2156_vm3, %vm2157_vm7 }
 0x265   : > { %v7540_v25 = vpop.eup %4106  ;;  %v2171_v0 = vmul.f32 %v7500_v45, %v7405_v10  ;;  %v2183_v19 = vmul.f32 0.5, %v2182_v52  ;;  %4110 = vrsqrt.f32 %v7496_v62  ;;  %v2479_v26 = vmul.f32 %v2324_v16, %v2129_v43 }
 0x266   : > { %v2143_v41 = vmul.f32 0.5, %v2142_v33  ;;  %v2155_v53 = vmul.f32 %v7361_v11, %v2154_v18  ;;  %v2211_v59 = vmul.f32 %v7516_v50, %v7419_v3  ;;  %v1410_v40 = vmul.f32 0.0051020407, %v6916_v29 }
 0x267   : > { %4112 = vrsqrt.f32 %v7528_v34  ;;  %v1409_v24 = vmul.f32 0.0051020407, %v9083_v8  ;;  %2810 = vperm.xlu0 %3965, %v2479_v26   ;;  %v2474_v13 = vmul.f32 %v2319_v20, %v2079_v55  ;;  %v2475_v52 = vmul.f32 %v2320_v15, %v2089_v61  ;;  %v2327_v55 = vld [vmem:[%s5922_s22 + $0x210] sm:$0xff] }
 0x268   : > { %v2115_v14 = vmul.f32 %v7318_v60, %v2114_v51  ;;  %v2105_v43 = vmul.f32 %v7342_v4, %v2104_v2  ;;  %v2133_v16 = vmul.f32 0.5, %v2132_v27  ;;  %v2161_v33 = vmul.f32 %v7540_v25, %v7452_v1 }
 0x269   : > { %v7557_v18 = vpop.permute.xlu2 %2620  ;;  %vm2116_vm14 = vweird.f32 %v7228_v37  ;;  %vm2106_vm9 = vweird.f32 %v7246_v38  ;;  %v2172_v31 = vmul.f32 %v7500_v45, %v2171_v0  ;;  %v2184_v51 = vsub.f32 1.5, %v2183_v19  ;;  %2785 = vperm.xlu2 %3964, %v2474_v13   ;;  %2790 = vperm.xlu1 %3963, %v2475_v52   ;;  %v7598_v19 = vpop.permute.xlu0 %2615 }
 0x26a   : > { %v7570_v2 = vpop.eup %4108  ;;  %vm7574_vm12 = vmor %vm2116_vm14, %vm2117_vm10  ;;  %vm2147_vm1 = vweird.f32 %v7438_v35  ;;  %v2212_v38 = vmul.f32 %v7516_v50, %v2211_v59  ;;  %v7580_v22 = vadd.f32 1e-05, %v1410_v40  ;;  %v2159_v27 = vsel %vm7565_vm13, %v7361_v11, %v2155_v53  ;;  %v2322_v59 = vld [vmem:[%s5922_s22 + $0x1e8] sm:$0xff]  ;;  %v2323_v40 = vld [vmem:[%s5922_s22 + $0x1f0] sm:$0xff] }
 0x26b   : > { %v7586_v20 = vpop.eup %4110  ;;  %vm7590_vm4 = vmor %vm2106_vm9, %vm2107_vm11  ;;  %v2144_v15 = vsub.f32 1.5, %v2143_v41  ;;  %vm2137_vm15 = vweird.f32 %v7466_v28  ;;  %vm2186_vm2 = vweird.f32 %v7324_v32  ;;  %v7596_v0 = vadd.f32 1e-05, %v1409_v24 }
 0x26c   : > { %v2134_v26 = vsub.f32 1.5, %v2133_v16  ;;  %v2162_v11 = vmul.f32 %v7540_v25, %v2161_v33  ;;  %v2109_v53 = vsel %vm7590_vm4, %v7342_v4, %v2105_v43  ;;  %v2119_v41 = vsel %vm7574_vm12, %v7318_v60, %v2115_v14  ;;  %v7618_v43 = vpop.permute.xlu1 %2595 }
 0x26d   : > { %v7609_v8 = vpop.eup %4112  ;;  %v2173_v13 = vmul.f32 0.5, %v2172_v31  ;;  %v2185_v24 = vmul.f32 %v7421_v54, %v2184_v51  ;;  %vm2187_vm10 = vweird.f32 %v7421_v54  ;;  %v2482_v52 = vmul.f32 %v2327_v55, %v2159_v27 }
 0x26e   : > { %v2201_v16 = vmul.f32 %v7570_v2, %v7483_v46  ;;  %v2213_v33 = vmul.f32 0.5, %v2212_v38  ;;  %4114 = vrsqrt.f32 %v7580_v22  ;;  %v2241_v4 = vmul.f32 %v7586_v20, %v7496_v62  ;;  %vm7634_vm8 = vmor %vm2186_vm2, %vm2187_vm10 }
 0x26f   : > { %4116 = vrsqrt.f32 %v7596_v0  ;;  %v1412_v60 = vmul.f32 0.0051020407, %v6963_v6  ;;  %2825 = vperm.xlu0 %3965, %v2482_v52   ;;  %v2477_v14 = vmul.f32 %v2322_v59, %v2109_v53  ;;  %v2478_v29 = vmul.f32 %v2323_v40, %v2119_v41  ;;  %v2325_v52 = vld [vmem:[%s5922_s22 + $0x200] sm:$0xff] }
 0x270   : > { %v2145_v31 = vmul.f32 %v7438_v35, %v2144_v15  ;;  %v2135_v51 = vmul.f32 %v7466_v28, %v2134_v26  ;;  %v2163_v37 = vmul.f32 0.5, %v2162_v11  ;;  %v2191_v38 = vmul.f32 %v7609_v8, %v7528_v34  ;;  %v2330_v26 = vld [vmem:[%s5922_s22 + $0x228] sm:$0xff] }
 0x271   : > { %v7626_v27 = vpop.permute.xlu2 %2635  ;;  %vm2146_vm6 = vweird.f32 %v7338_v56  ;;  %vm2136_vm3 = vweird.f32 %v7374_v23  ;;  %v2174_v55 = vsub.f32 1.5, %v2173_v13  ;;  %2800 = vperm.xlu2 %3964, %v2477_v14   ;;  %2805 = vperm.xlu1 %3963, %v2478_v29   ;;  %v2202_v56 = vmul.f32 %v7570_v2, %v2201_v16 }
 0x272   : > { %vm7640_vm11 = vmor %vm2146_vm6, %vm2147_vm1  ;;  %v2214_v23 = vsub.f32 1.5, %v2213_v33  ;;  %v2242_v15 = vmul.f32 %v7586_v20, %v2241_v4  ;;  %v2189_v32 = vsel %vm7634_vm8, %v7421_v54, %v2185_v24  ;;  %v7656_v53 = vadd.f32 1e-05, %v1412_v60  ;;  %v2326_v24 = vld [vmem:[%s5922_s22 + $0x208] sm:$0xff]  ;;  %v7674_v60 = vpop.permute.xlu0 %2630 }
 0x273   : > { %vm7652_vm5 = vmor %vm2136_vm3, %vm2137_vm15  ;;  %v2164_v41 = vsub.f32 1.5, %v2163_v37  ;;  %v2192_v40 = vmul.f32 %v7609_v8, %v2191_v38  ;;  %v2149_v54 = vsel %vm7640_vm11, %v7438_v35, %v2145_v31  ;;  %v2175_v33 = vmul.f32 %v7500_v45, %v2174_v55 }
 0x274   : > { %v7658_v59 = vpop.eup %4114  ;;  %v2139_v13 = vsel %vm7652_vm5, %v7466_v28, %v2135_v51  ;;  %vm2177_vm7 = vweird.f32 %v7500_v45  ;;  %vm2216_vm14 = vweird.f32 %v7419_v3  ;;  %v2485_v4 = vmul.f32 %v2330_v26, %v2189_v32  ;;  %v7685_v6 = vpop.permute.xlu1 %2610  ;;  %v2332_v32 = vld [vmem:[%s5922_s22 + $0x238] sm:$0xff] }
 0x275   : > { %v7669_v16 = vpop.eup %4116  ;;  %v2203_v14 = vmul.f32 0.5, %v2202_v56  ;;  %v2215_v28 = vmul.f32 %v7516_v50, %v2214_v23  ;;  %vm2217_vm9 = vweird.f32 %v7516_v50  ;;  %v2243_v29 = vmul.f32 0.5, %v2242_v15  ;;  %v2333_v15 = vld [vmem:[%s5922_s22 + $0x240] sm:$0xff] }
 0x276   : > { %v2231_v35 = vmul.f32 %v7658_v59, %v7580_v22  ;;  %4118 = vrsqrt.f32 %v7656_v53  ;;  %v2480_v31 = vmul.f32 %v2325_v52, %v2139_v13  ;;  %v2481_v51 = vmul.f32 %v2326_v24, %v2149_v54  ;;  %vm7690_vm1 = vmor %vm2216_vm14, %vm2217_vm9  ;;  %v2328_v13 = vld [vmem:[%s5922_s22 + $0x218] sm:$0xff]  ;;  %v2329_v52 = vld [vmem:[%s5922_s22 + $0x220] sm:$0xff] }
 0x277   : > { %2840 = vperm.xlu0 %3965, %v2485_v4   ;;  %v2165_v37 = vmul.f32 %v7540_v25, %v2164_v41  ;;  %vm2167_vm13 = vweird.f32 %v7540_v25  ;;  %v2193_v38 = vmul.f32 0.5, %v2192_v40  ;;  %v2221_v55 = vmul.f32 %v7669_v16, %v7596_v0 }
 0x278   : > { %vm2176_vm12 = vweird.f32 %v7405_v10  ;;  %vm2166_vm15 = vweird.f32 %v7452_v1  ;;  %v2244_v10 = vsub.f32 1.5, %v2243_v29  ;;  %v2219_v3 = vsel %vm7690_vm1, %v7516_v50, %v2215_v28 }
 0x279   : > { %2815 = vperm.xlu2 %3964, %v2480_v31   ;;  %2820 = vperm.xlu1 %3963, %v2481_v51   ;;  %v7694_v56 = vpop.permute.xlu2 %2650  ;;  %vm7698_vm4 = vmor %vm2176_vm12, %vm2177_vm7  ;;  %v2204_v26 = vsub.f32 1.5, %v2203_v14  ;;  %v2232_v11 = vmul.f32 %v7658_v59, %v2231_v35  ;;  %v2194_v41 = vsub.f32 1.5, %v2193_v38  ;;  %v2222_v40 = vmul.f32 %v7669_v16, %v2221_v55  ;;  %v2339_v51 = vld [vmem:[%s7776_s25] sm:$0xff] }
 0x27a   : > { %vm7707_vm2 = vmor %vm2166_vm15, %vm2167_vm13  ;;  %v2179_v50 = vsel %vm7698_vm4, %v7500_v45, %v2175_v33  ;;  %v2488_v24 = vmul.f32 %v2333_v15, %v2219_v3  ;;  %vm2207_vm10 = vweird.f32 %v7570_v2  ;;  %v2245_v4 = vmul.f32 %v7586_v20, %v2244_v10  ;;  %v7727_v14 = vpop.permute.xlu0 %2645  ;;  %v2331_v15 = vld [vmem:[%s5922_s22 + $0x230] sm:$0xff] }
 0x27b   : > { %v2169_v1 = vsel %vm7707_vm2, %v7540_v25, %v2165_v37  ;;  %vm2246_vm6 = vweird.f32 %v7496_v62  ;;  %vm2247_vm3 = vweird.f32 %v7586_v20  ;;  %vm2197_vm8 = vweird.f32 %v7609_v8 }
 0x27c   : > { %v7721_v54 = vpop.eup %4118  ;;  %v2233_v25 = vmul.f32 0.5, %v2232_v11  ;;  %v2483_v45 = vmul.f32 %v2328_v13, %v2169_v1  ;;  %v2484_v33 = vmul.f32 %v2329_v52, %v2179_v50  ;;  %v2205_v28 = vmul.f32 %v7570_v2, %v2204_v26  ;;  %v7734_v62 = vpop.permute.xlu1 %2625  ;;  %vm7737_vm5 = vmor %vm2246_vm6, %vm2247_vm3  ;;  %v2340_v52 = vld [vmem:[%s7776_s25 + $0x8] sm:$0xff] }
 0x27d   : > { %v2195_v29 = vmul.f32 %v7609_v8, %v2194_v41  ;;  %v2223_v35 = vmul.f32 0.5, %v2222_v40  ;;  %v2251_v31 = vmul.f32 %v7721_v54, %v7656_v53  ;;  %vm2206_vm11 = vweird.f32 %v7483_v46  ;;  %v2336_v46 = vld [vmem:[%s5922_s22 + $0x258] sm:$0xff] }
 0x27e   : > { %vm7743_vm7 = vmor %vm2206_vm11, %vm2207_vm10  ;;  %vm2196_vm14 = vweird.f32 %v7528_v34  ;;  %v2249_v38 = vsel %vm7737_vm5, %v7586_v20, %v2245_v4  ;;  %v2234_v55 = vsub.f32 1.5, %v2233_v25  ;;  %vm2237_vm13 = vweird.f32 %v7658_v59  ;;  %v2335_v25 = vld [vmem:[%s5922_s22 + $0x250] sm:$0xff] }
 0x27f   : > { %2855 = vperm.xlu0 %3965, %v2488_v24   ;;  %vm2198_vm9 = vmor %vm2196_vm14, %vm2197_vm8  ;;  %v2224_v23 = vsub.f32 1.5, %v2223_v35  ;;  %v2252_v10 = vmul.f32 %v7721_v54, %v2251_v31  ;;  %v2209_v34 = vsel %vm7743_vm7, %v7570_v2, %v2205_v28  ;;  %v2491_v20 = vmul.f32 %v2336_v46, %v2249_v38  ;;  %v2334_v24 = vld [vmem:[%s5922_s22 + $0x248] sm:$0xff]  ;;  %v2337_v31 = vld [vmem:[%s5922_s22 + $0x260] sm:$0xff] }
 0x280   : > { %v2199_v3 = vsel %vm2198_vm9, %v7609_v8, %v2195_v29  ;;  %v2487_v41 = vmul.f32 %v2332_v32, %v2209_v34  ;;  %v2235_v40 = vmul.f32 %v7658_v59, %v2234_v55  ;;  %vm2227_vm12 = vweird.f32 %v7669_v16  ;;  %v2343_v29 = vld [vmem:[%s7776_s25 + $0x20] sm:$0xff]  ;;  %v2346_v55 = vld [vmem:[%s7776_s25 + $0x38] sm:$0xff]  ;;  %v2349_v34 = vld [vmem:[%s7776_s25 + $0x50] sm:$0xff] }
 0x281   : > { %2830 = vperm.xlu2 %3964, %v2483_v45   ;;  %2835 = vperm.xlu1 %3963, %v2484_v33   ;;  %v7754_v61 = vpop.permute.xlu2 %2665  ;;  %v2486_v11 = vmul.f32 %v2331_v15, %v2199_v3  ;;  %v2225_v8 = vmul.f32 %v7669_v16, %v2224_v23  ;;  %v2253_v1 = vmul.f32 0.5, %v2252_v10  ;;  %vm2236_vm1 = vweird.f32 %v7580_v22  ;;  %v2341_v23 = vld [vmem:[%s7776_s25 + $0x10] sm:$0xff]  ;;  %v2342_v10 = vld [vmem:[%s7776_s25 + $0x18] sm:$0xff]  ;;  %v2344_v32 = vld [vmem:[%s7776_s25 + $0x28] sm:$0xff] }
 0x282   : > { %v7764_v26 = vpop.permute.xlu0 %2660  ;;  %vm2238_vm4 = vmor %vm2236_vm1, %vm2237_vm13  ;;  %vm2226_vm15 = vweird.f32 %v7596_v0  ;;  %vm2257_vm10 = vweird.f32 %v7721_v54  ;;  %vm2256_vm6 = vweird.f32 %v7656_v53 }
 0x283   : > { %vm2228_vm2 = vmor %vm2226_vm15, %vm2227_vm12  ;;  %v2254_v50 = vsub.f32 1.5, %v2253_v1  ;;  %v2239_v4 = vsel %vm2238_vm4, %v7658_v59, %v2235_v40  ;;  %v2347_v1 = vld [vmem:[%s7776_s25 + $0x40] sm:$0xff] }
 0x284   : > { %v7770_v2 = vpop.permute.xlu1 %2640  ;;  %v2229_v22 = vsel %vm2228_vm2, %v7669_v16, %v2225_v8  ;;  %v2490_v28 = vmul.f32 %v2335_v25, %v2239_v4  ;;  %vm2258_vm3 = vmor %vm2256_vm6, %vm2257_vm10  ;;  %v2352_v8 = vld [vmem:[%s7776_s25 + $0x68] sm:$0xff]  ;;  %v2355_v4 = vld [vmem:[%s7776_s25 + $0x80] sm:$0xff] }
 0x285   : > { %v2489_v33 = vmul.f32 %v2334_v24, %v2229_v22  ;;  %v2255_v0 = vmul.f32 %v7721_v54, %v2254_v50  ;;  %v2348_v50 = vld [vmem:[%s7776_s25 + $0x48] sm:$0xff]  ;;  %v2350_v25 = vld [vmem:[%s7776_s25 + $0x58] sm:$0xff] }
 0x287   : > { %2870 = vperm.xlu0 %3965, %v2491_v20   ;;  %v2259_v35 = vsel %vm2258_vm3, %v7721_v54, %v2255_v0  ;;  %v2345_v20 = vld [vmem:[%s7776_s25 + $0x30] sm:$0xff] }
 0x288   : > { %v2492_v37 = vmul.f32 %v2337_v31, %v2259_v35  ;;  %v2358_v35 = vld [vmem:[%s7776_s25 + $0x98] sm:$0xff]  ;;  %v2353_v31 = vld [vmem:[%s7776_s25 + $0x70] sm:$0xff] }
 0x289   : > { %2845 = vperm.xlu2 %3964, %v2486_v11   ;;  %2850 = vperm.xlu1 %3963, %v2487_v41   ;;  %v7779_v13 = vpop.permute.xlu2 %2680 }
 0x28a   : > { %v7786_v45 = vpop.permute.xlu0 %2675 }
 0x28e   : > { %v7791_v59 = vpop.permute.xlu1 %2655 }
 0x28f   : > { %3039 = vperm.xlu0 %3965, %v2340_v52  }
 0x291   : > { %2860 = vperm.xlu2 %3964, %v2489_v33   ;;  %2865 = vperm.xlu1 %3963, %v2490_v28   ;;  %v7793_v16 = vpop.permute.xlu2 %2695  ;;  %v2351_v33 = vld [vmem:[%s7776_s25 + $0x60] sm:$0xff] }
 0x294   : > { %v7799_v38 = vpop.permute.xlu0 %2690 }
 0x297   : > { %3054 = vperm.xlu0 %3965, %v2343_v29   ;;  %v7801_v53 = vpop.permute.xlu1 %2670 }
 0x299   : > { %2875 = vperm.xlu2 %3964, %v2492_v37   ;;  %3034 = vperm.xlu1 %3963, %v2339_v51   ;;  %v7803_v46 = vpop.permute.xlu2 %2710  ;;  %v2354_v51 = vld [vmem:[%s7776_s25 + $0x78] sm:$0xff] }
 0x29d   : > { %v7808_v54 = vpop.permute.xlu0 %2705 }
 0x29f   : > { %3069 = vperm.xlu0 %3965, %v2346_v55   ;;  %v7810_v3 = vpop.permute.xlu1 %2685 }
 0x2a1   : > { %3044 = vperm.xlu2 %3964, %v2341_v23   ;;  %3049 = vperm.xlu1 %3963, %v2342_v10   ;;  %v7812_v15 = vpop.permute.xlu2 %2725  ;;  %v2361_v10 = vld [vmem:[%s7776_s25 + $0xb0] sm:$0xff] }
 0x2a6   : > { %v7817_v11 = vpop.permute.xlu0 %2720 }
 0x2a7   : > { %3084 = vperm.xlu0 %3965, %v2349_v34   ;;  %v2356_v34 = vld [vmem:[%s7776_s25 + $0x88] sm:$0xff] }
 0x2a8   : > { %v7819_v41 = vpop.permute.xlu1 %2700 }
 0x2a9   : > { %3059 = vperm.xlu2 %3964, %v2344_v32   ;;  %3064 = vperm.xlu1 %3963, %v2345_v20   ;;  %v2357_v32 = vld [vmem:[%s7776_s25 + $0x90] sm:$0xff] }
 0x2aa   : > { %v7821_v40 = vpop.permute.xlu2 %2740 }
 0x2af   : > { %3099 = vperm.xlu0 %3965, %v2352_v8   ;;  %v7826_v52 = vpop.permute.xlu0 %2735 }
 0x2b0   : > { %9106 = vst [vmem:[#allocation164_spill] sm:$0xff] %v7826_v52  ;;  %v2380_v52 = vld [vmem:[%s7776_s25 + $0x148] sm:$0xff] }
 0x2b1   : > { %3074 = vperm.xlu2 %3964, %v2347_v1   ;;  %3079 = vperm.xlu1 %3963, %v2348_v50   ;;  %v7828_v22 = vpop.permute.xlu1 %2715  ;;  %v2364_v50 = vld [vmem:[%s7776_s25 + $0xc8] sm:$0xff] }
 0x2b3   : > { %v7830_v24 = vpop.permute.xlu2 %2755 }
 0x2b7   : > { %3114 = vperm.xlu0 %3965, %v2355_v4   ;;  %v2359_v4 = vld [vmem:[%s7776_s25 + $0xa0] sm:$0xff] }
 0x2b8   : > { %v7835_v28 = vpop.permute.xlu0 %2750 }
 0x2b9   : > { %9107 = vst [vmem:[#allocation156_spill] sm:$0xff] %v7835_v28  ;;  %3089 = vperm.xlu2 %3964, %v2350_v25   ;;  %3094 = vperm.xlu1 %3963, %v2351_v33   ;;  %v2360_v25 = vld [vmem:[%s7776_s25 + $0xa8] sm:$0xff]  ;;  %v2377_v28 = vld [vmem:[%s7776_s25 + $0x130] sm:$0xff] }
 0x2ba   : > { %v7837_v0 = vpop.permute.xlu1 %2730 }
 0x2bb   : > { %v7839_v29 = vpop.permute.xlu2 %2770 }
 0x2bc   : > { %9108 = vst [vmem:[#allocation158_spill] sm:$0xff] %v7839_v29  ;;  %v2378_v29 = vld [vmem:[%s7776_s25 + $0x138] sm:$0xff] }
 0x2bf   : > { %3129 = vperm.xlu0 %3965, %v2358_v35  }
 0x2c0   : > { %v7844_v37 = vpop.permute.xlu0 %2765 }
 0x2c1   : > { %9109 = vst [vmem:[#allocation157_spill] sm:$0xff] %v7844_v37  ;;  %3104 = vperm.xlu2 %3964, %v2353_v31   ;;  %3109 = vperm.xlu1 %3963, %v2354_v51   ;;  %v2367_v51 = vld [vmem:[%s7776_s25 + $0xe0] sm:$0xff] }
 0x2c2   : > { %v7846_v55 = vpop.permute.xlu1 %2745 }
 0x2c3   : > { %v7848_v23 = vpop.permute.xlu2 %2785 }
 0x2c4   : > { %9110 = vst [vmem:[#allocation159_spill] sm:$0xff] %v7848_v23 }
 0x2c7   : > { %3144 = vperm.xlu0 %3965, %v2361_v10   ;;  %v2362_v10 = vld [vmem:[%s7776_s25 + $0xb8] sm:$0xff] }
 0x2c9   : > { %v7853_v20 = vpop.permute.xlu0 %2780  ;;  %3119 = vperm.xlu2 %3964, %v2356_v34   ;;  %3124 = vperm.xlu1 %3963, %v2357_v32   ;;  %v2363_v34 = vld [vmem:[%s7776_s25 + $0xc0] sm:$0xff] }
 0x2ca   : > { %9111 = vst [vmem:[#allocation166_spill] sm:$0xff] %v7853_v20  ;;  %v2366_v20 = vld [vmem:[%s7776_s25 + $0xd8] sm:$0xff] }
 0x2cb   : > { %v7855_v8 = vpop.permute.xlu1 %2760  ;;  %v7857_v1 = vpop.permute.xlu2 %2800 }
 0x2cc   : > { %9112 = vst [vmem:[#allocation167_spill] sm:$0xff] %v7857_v1  ;;  %v2369_v1 = vld [vmem:[%s7776_s25 + $0xf0] sm:$0xff] }
 0x2cf   : > { %3159 = vperm.xlu0 %3965, %v2364_v50  }
 0x2d1   : > { %v7862_v33 = vpop.permute.xlu0 %2795  ;;  %3134 = vperm.xlu2 %3964, %v2359_v4   ;;  %3139 = vperm.xlu1 %3963, %v2360_v25   ;;  %v2370_v4 = vld [vmem:[%s7776_s25 + $0xf8] sm:$0xff]  ;;  %v2365_v25 = vld [vmem:[%s7776_s25 + $0xd0] sm:$0xff] }
 0x2d2   : > { %9113 = vst [vmem:[#allocation168_spill] sm:$0xff] %v7862_v33 }
 0x2d3   : > { %v7864_v35 = vpop.permute.xlu1 %2775  ;;  %v7866_v31 = vpop.permute.xlu2 %2815 }
 0x2d4   : > { %9114 = vst [vmem:[#allocation169_spill] sm:$0xff] %v7864_v35 }
 0x2d5   : > { %9115 = vst [vmem:[#allocation170_spill] sm:$0xff] %v7866_v31 }
 0x2d7   : > { %3174 = vperm.xlu0 %3965, %v2367_v51  }
 0x2d9   : > { %v7871_v32 = vpop.permute.xlu0 %2810  ;;  %3149 = vperm.xlu2 %3964, %v2362_v10   ;;  %3154 = vperm.xlu1 %3963, %v2363_v34   ;;  %v2373_v10 = vld [vmem:[%s7776_s25 + $0x110] sm:$0xff]  ;;  %v2368_v34 = vld [vmem:[%s7776_s25 + $0xe8] sm:$0xff] }
 0x2da   : > { %9116 = vst [vmem:[#allocation171_spill] sm:$0xff] %v7871_v32 }
 0x2db   : > { %v7873_v50 = vpop.permute.xlu1 %2790  ;;  %v7875_v33 = vpop.permute.xlu2 %2830 }
 0x2dc   : > { %9117 = vst [vmem:[#allocation172_spill] sm:$0xff] %v7873_v50 }
 0x2dd   : > { %9118 = vst [vmem:[#allocation173_spill] sm:$0xff] %v7875_v33 }
 0x2df   : > { %3189 = vperm.xlu0 %3965, %v2370_v4  }
 0x2e1   : > { %v7880_v31 = vpop.permute.xlu0 %2825  ;;  %3164 = vperm.xlu2 %3964, %v2365_v25   ;;  %3169 = vperm.xlu1 %3963, %v2366_v20   ;;  %v2376_v20 = vld [vmem:[%s7776_s25 + $0x128] sm:$0xff]  ;;  %v2371_v25 = vld [vmem:[%s7776_s25 + $0x100] sm:$0xff] }
 0x2e2   : > { %9119 = vst [vmem:[#allocation174_spill] sm:$0xff] %v7880_v31 }
 0x2e3   : > { %v7882_v51 = vpop.permute.xlu1 %2805  ;;  %v7884_v32 = vpop.permute.xlu2 %2845 }
 0x2e4   : > { %9120 = vst [vmem:[#allocation175_spill] sm:$0xff] %v7882_v51  ;;  %v2372_v51 = vld [vmem:[%s7776_s25 + $0x108] sm:$0xff] }
 0x2e5   : > { %9121 = vst [vmem:[#allocation176_spill] sm:$0xff] %v7884_v32 }
 0x2e7   : > { %3204 = vperm.xlu0 %3965, %v2373_v10  }
 0x2e9   : > { %v7889_v33 = vpop.permute.xlu0 %2840  ;;  %3179 = vperm.xlu2 %3964, %v2368_v34   ;;  %3184 = vperm.xlu1 %3963, %v2369_v1   ;;  %v2379_v1 = vld [vmem:[%s7776_s25 + $0x140] sm:$0xff]  ;;  %v2374_v34 = vld [vmem:[%s7776_s25 + $0x118] sm:$0xff] }
 0x2ea   : > { %9122 = vst [vmem:[#allocation177_spill] sm:$0xff] %v7889_v33 }
 0x2eb   : > { %v7891_v4 = vpop.permute.xlu1 %2820  ;;  %v7893_v31 = vpop.permute.xlu2 %2860 }
 0x2ec   : > { %9123 = vst [vmem:[#allocation178_spill] sm:$0xff] %v7891_v4  ;;  %v2375_v4 = vld [vmem:[%s7776_s25 + $0x120] sm:$0xff] }
 0x2ed   : > { %9124 = vst [vmem:[#allocation179_spill] sm:$0xff] %v7893_v31 }
 0x2ef   : > { %3219 = vperm.xlu0 %3965, %v2376_v20   ;;  %v9129_v20 = vld [vmem:[#allocation41_spill] sm:$0xff] }
 0x2f1   : > { %v7898_v32 = vpop.permute.xlu0 %2855  ;;  %3194 = vperm.xlu2 %3964, %v2371_v25   ;;  %3199 = vperm.xlu1 %3963, %v2372_v51   ;;  %v9130_v25 = vld [vmem:[#allocation38_spill] sm:$0xff] }
 0x2f2   : > { %9125 = vst [vmem:[#allocation180_spill] sm:$0xff] %v7898_v32  ;;  %v2882_v32 = vmul.f32 %v7050_v9, %v9129_v20  ;;  %v2883_v51 = vmul.f32 %v7050_v9, %v9130_v25  ;;  %v9132_v9 = vld [vmem:[#allocation43_spill] sm:$0xff]  ;;  %v9134_v20 = vld [vmem:[#allocation40_spill] sm:$0xff] }
 0x2f3   : > { %v7900_v10 = vpop.permute.xlu1 %2835  ;;  %v7902_v33 = vpop.permute.xlu2 %2875 }
 0x2f4   : > { %9126 = vst [vmem:[#allocation181_spill] sm:$0xff] %v7900_v10 }
 0x2f5   : > { %9127 = vst [vmem:[#allocation182_spill] sm:$0xff] %v7902_v33  ;;  %v2382_v33 = vld [vmem:[%s7776_s25 + $0x158] sm:$0xff] }
 0x2f7   : > { %3234 = vperm.xlu0 %3965, %v2379_v1  }
 0x2f9   : > { %v7907_v31 = vpop.permute.xlu0 %2870  ;;  %3209 = vperm.xlu2 %3964, %v2374_v34   ;;  %3214 = vperm.xlu1 %3963, %v2375_v4   ;;  %v9133_v4 = vld [vmem:[#allocation160_spill] sm:$0xff] }
 0x2fa   : > { %9128 = vst [vmem:[#allocation183_spill] sm:$0xff] %v7907_v31  ;;  %v2880_v34 = vmul.f32 %v9133_v4, %v9132_v9 }
 0x2fb   : > { %v7913_v10 = vpop.permute.xlu1 %2850  ;;  %v3045_v37 = vpop.permute.xlu2 %3044 }
 0x2fc   : > { %9131 = vst [vmem:[#allocation41_spill] sm:$0xff] %v7913_v10  ;;  %v3421_v23 = vadd.f32 %v3045_v37, %v2882_v32  ;;  %v3422_v50 = vadd.f32 %v3045_v37, %v2883_v51  ;;  %v2881_v37 = vmul.f32 %v9133_v4, %v9134_v20  ;;  %v9136_v51 = vld [vmem:[#allocation46_spill] sm:$0xff] }
 0x2fd   : > { %v2889_v9 = vmul.f32 %v6989_v17, %v9136_v51 }
 0x2fe   : > { %v3575_v35 = vmax.f32 %v3421_v23, 0.0  ;;  %v3576_v1 = vmax.f32 %v3422_v50, 0.0 }
 0x2ff   : > { %3249 = vperm.xlu0 %3965, %v2382_v33   ;;  %v9135_v33 = vld [vmem:[#allocation49_spill] sm:$0xff] }
 0x300   : > { %3729 = vst [vmem:[%s7923_s28 + $0x20] sm:$0xff] %v3575_v35  ;;  %v2888_v25 = vmul.f32 %v6989_v17, %v9135_v33  ;;  %v9138_v33 = vld [vmem:[#allocation44_spill] sm:$0xff] }
 0x301   : > { %v3040_v23 = vpop.permute.xlu0 %3039  ;;  %3224 = vperm.xlu2 %3964, %v2377_v28   ;;  %3229 = vperm.xlu1 %3963, %v2378_v29   ;;  %3730 = vst.msk [vmem:[%s7923_s28 + $0x28] sm:$0xff] %vm334_vm0, %v3576_v1  ;;  %v2385_v28 = vld [vmem:[%s7776_s25 + $0x170] sm:$0xff] }
 0x302   : > { %v3419_v32 = vadd.f32 %v3040_v23, %v2880_v34  ;;  %v3420_v50 = vadd.f32 %v3040_v23, %v2881_v37  ;;  %v2381_v1 = vld [vmem:[%s7776_s25 + $0x150] sm:$0xff]  ;;  %v9137_v23 = vld [vmem:[#allocation47_spill] sm:$0xff] }
 0x303   : > { %v7936_v31 = vpop.permute.xlu1 %2865  ;;  %v3060_v35 = vpop.permute.xlu2 %3059  ;;  %v2886_v17 = vmul.f32 %v7081_v21, %v9137_v23 }
 0x304   : > { %v3573_v4 = vmax.f32 %v3419_v32, 0.0  ;;  %v3574_v20 = vmax.f32 %v3420_v50, 0.0  ;;  %v3427_v10 = vadd.f32 %v3060_v35, %v2888_v25  ;;  %v3428_v29 = vadd.f32 %v3060_v35, %v2889_v9  ;;  %v9139_v25 = vld [vmem:[#allocation37_spill] sm:$0xff]  ;;  %v9140_v9 = vld [vmem:[#allocation35_spill] sm:$0xff] }
 0x305   : > { %v2887_v32 = vmul.f32 %v7081_v21, %v9138_v33  ;;  %v2878_v51 = vmul.f32 %v6993_v44, %v9139_v25  ;;  %v2879_v35 = vmul.f32 %v6993_v44, %v9140_v9  ;;  %v2383_v9 = vld [vmem:[%s7776_s25 + $0x160] sm:$0xff] }
 0x306   : > { %3727 = vst [vmem:[%s7923_s28 + $0x10] sm:$0xff] %v3573_v4  ;;  %v3581_v34 = vmax.f32 %v3427_v10, 0.0  ;;  %v3582_v37 = vmax.f32 %v3428_v29, 0.0 }
 0x307   : > { %3728 = vst.msk [vmem:[%s7923_s28 + $0x18] sm:$0xff] %vm334_vm0, %v3574_v20  ;;  %3264 = vperm.xlu0 %3965, %v2385_v28   ;;  %v9141_v20 = vld [vmem:[#allocation53_spill] sm:$0xff] }
 0x308   : > { %3735 = vst [vmem:[%s7923_s28 + $0x50] sm:$0xff] %v3581_v34  ;;  %v2894_v21 = vmul.f32 %v7241_v5, %v9141_v20  ;;  %v2384_v20 = vld [vmem:[%s7776_s25 + $0x168] sm:$0xff] }
 0x309   : > { %v3055_v50 = vpop.permute.xlu0 %3054  ;;  %3239 = vperm.xlu2 %3964, %v2380_v52   ;;  %3244 = vperm.xlu1 %3963, %v2381_v1   ;;  %3736 = vst.msk [vmem:[%s7923_s28 + $0x58] sm:$0xff] %vm334_vm0, %v3582_v37  ;;  %v9142_v52 = vld [vmem:[#allocation50_spill] sm:$0xff] }
 0x30a   : > { %v3425_v10 = vadd.f32 %v3055_v50, %v2886_v17  ;;  %v3426_v4 = vadd.f32 %v3055_v50, %v2887_v32  ;;  %v2895_v28 = vmul.f32 %v7241_v5, %v9142_v52  ;;  %v2388_v17 = vld [vmem:[%s7776_s25 + $0x188] sm:$0xff] }
 0x30b   : > { %v3035_v29 = vpop.permute.xlu1 %3034  ;;  %v3075_v1 = vpop.permute.xlu2 %3074 }
 0x30c   : > { %v3579_v34 = vmax.f32 %v3425_v10, 0.0  ;;  %v3580_v23 = vmax.f32 %v3426_v4, 0.0  ;;  %v3417_v33 = vadd.f32 %v3035_v29, %v2878_v51  ;;  %v3418_v44 = vadd.f32 %v3035_v29, %v2879_v35  ;;  %v9143_v10 = vld [vmem:[#allocation55_spill] sm:$0xff]  ;;  %v9144_v35 = vld [vmem:[#allocation52_spill] sm:$0xff] }
 0x30d   : > { %v3433_v32 = vadd.f32 %v3075_v1, %v2894_v21  ;;  %v3434_v50 = vadd.f32 %v3075_v1, %v2895_v28  ;;  %v2892_v51 = vmul.f32 %v7075_v57, %v9143_v10  ;;  %v2893_v4 = vmul.f32 %v7075_v57, %v9144_v35  ;;  %v9145_v28 = vld [vmem:[#allocation42_spill] sm:$0xff]  ;;  %v9146_v1 = vld [vmem:[#allocation39_spill] sm:$0xff] }
 0x30e   : > { %3733 = vst [vmem:[%s7923_s28 + $0x40] sm:$0xff] %v3579_v34  ;;  %v3571_v37 = vmax.f32 %v3417_v33, 0.0  ;;  %v3572_v25 = vmax.f32 %v3418_v44, 0.0  ;;  %v2884_v29 = vmul.f32 %v6912_v12, %v9145_v28  ;;  %v2885_v34 = vmul.f32 %v6912_v12, %v9146_v1  ;;  %v9147_v44 = vld [vmem:[#allocation59_spill] sm:$0xff]  ;;  %v2387_v28 = vld [vmem:[%s7776_s25 + $0x180] sm:$0xff]  ;;  %v9149_v1 = vld [vmem:[#allocation61_spill] sm:$0xff] }
 0x30f   : > { %3734 = vst.msk [vmem:[%s7923_s28 + $0x48] sm:$0xff] %vm334_vm0, %v3580_v23  ;;  %3279 = vperm.xlu0 %3965, %v2388_v17   ;;  %v3587_v5 = vmax.f32 %v3433_v32, 0.0  ;;  %v3588_v52 = vmax.f32 %v3434_v50, 0.0  ;;  %v2900_v57 = vmul.f32 %v7340_v47, %v9147_v44  ;;  %v9148_v17 = vld [vmem:[#allocation56_spill] sm:$0xff] }
 0x310   : > { %3725 = vst [vmem:[%s7923_s28] sm:$0xff] %v3571_v37  ;;  %v2901_v32 = vmul.f32 %v7340_v47, %v9148_v17  ;;  %v9153_v17 = vld [vmem:[#allocation163_spill] sm:$0xff] }
 0x311   : > { %3726 = vst.msk [vmem:[%s7923_s28 + $0x8] sm:$0xff] %vm334_vm0, %v3572_v25  ;;  %v3070_v21 = vpop.permute.xlu0 %3069  ;;  %3254 = vperm.xlu2 %3964, %v2383_v9   ;;  %3259 = vperm.xlu1 %3963, %v2384_v20  }
 0x312   : > { %v3431_v23 = vadd.f32 %v3070_v21, %v2892_v51  ;;  %v3432_v33 = vadd.f32 %v3070_v21, %v2893_v4  ;;  %3741 = vst [vmem:[%s7923_s28 + $0x80] sm:$0xff] %v3587_v5  ;;  %v2391_v5 = vld [vmem:[%s7776_s25 + $0x1a0] sm:$0xff]  ;;  %v2386_v21 = vld [vmem:[%s7776_s25 + $0x178] sm:$0xff] }
 0x313   : > { %v3050_v50 = vpop.permute.xlu1 %3049  ;;  %3742 = vst.msk [vmem:[%s7923_s28 + $0x88] sm:$0xff] %vm334_vm0, %v3588_v52  ;;  %v3090_v37 = vpop.permute.xlu2 %3089 }
 0x314   : > { %v3585_v25 = vmax.f32 %v3431_v23, 0.0  ;;  %v3586_v9 = vmax.f32 %v3432_v33, 0.0  ;;  %v3423_v12 = vadd.f32 %v3050_v50, %v2884_v29  ;;  %v3424_v20 = vadd.f32 %v3050_v50, %v2885_v34  ;;  %v9150_v23 = vld [vmem:[#allocation161_spill] sm:$0xff]  ;;  %v9151_v34 = vld [vmem:[#allocation58_spill] sm:$0xff] }
 0x315   : > { %v3439_v10 = vadd.f32 %v3090_v37, %v2900_v57  ;;  %v3440_v51 = vadd.f32 %v3090_v37, %v2901_v32  ;;  %v2898_v29 = vmul.f32 %v9150_v23, %v9149_v1  ;;  %v2899_v33 = vmul.f32 %v9150_v23, %v9151_v34  ;;  %v9152_v57 = vld [vmem:[#allocation48_spill] sm:$0xff]  ;;  %v9154_v50 = vld [vmem:[#allocation45_spill] sm:$0xff] }
 0x316   : > { %3739 = vst [vmem:[%s7923_s28 + $0x70] sm:$0xff] %v3585_v25  ;;  %v3577_v35 = vmax.f32 %v3423_v12, 0.0  ;;  %v3578_v4 = vmax.f32 %v3424_v20, 0.0  ;;  %v2890_v32 = vmul.f32 %v9153_v17, %v9152_v57  ;;  %v2891_v37 = vmul.f32 %v9153_v17, %v9154_v50  ;;  %v9155_v12 = vld [vmem:[#allocation65_spill] sm:$0xff]  ;;  %v9157_v17 = vld [vmem:[#allocation7_spill] sm:$0xff]  ;;  %v9158_v50 = vld [vmem:[#allocation64_spill] sm:$0xff] }
 0x317   : > { %3740 = vst.msk [vmem:[%s7923_s28 + $0x78] sm:$0xff] %vm334_vm0, %v3586_v9  ;;  %3294 = vperm.xlu0 %3965, %v2391_v5   ;;  %v3593_v47 = vmax.f32 %v3439_v10, 0.0  ;;  %v3594_v52 = vmax.f32 %v3440_v51, 0.0  ;;  %v2906_v20 = vmul.f32 %v7454_v42, %v9155_v12  ;;  %v9156_v5 = vld [vmem:[#allocation62_spill] sm:$0xff]  ;;  %v2390_v57 = vld [vmem:[%s7776_s25 + $0x198] sm:$0xff] }
 0x318   : > { %3731 = vst [vmem:[%s7923_s28 + $0x30] sm:$0xff] %v3577_v35  ;;  %v2907_v10 = vmul.f32 %v7454_v42, %v9156_v5  ;;  %v9160_v12 = vld [vmem:[#allocation162_spill] sm:$0xff]  ;;  %v9161_v5 = vld [vmem:[#allocation51_spill] sm:$0xff] }
 0x319   : > { %3732 = vst.msk [vmem:[%s7923_s28 + $0x38] sm:$0xff] %vm334_vm0, %v3578_v4  ;;  %v3085_v44 = vpop.permute.xlu0 %3084  ;;  %3269 = vperm.xlu2 %3964, %v2386_v21   ;;  %3274 = vperm.xlu1 %3963, %v2387_v28  }
 0x31a   : > { %v3437_v25 = vadd.f32 %v3085_v44, %v2898_v29  ;;  %v3438_v9 = vadd.f32 %v3085_v44, %v2899_v33  ;;  %3747 = vst [vmem:[%s7923_s28 + $0xb0] sm:$0xff] %v3593_v47  ;;  %v2394_v47 = vld [vmem:[%s7776_s25 + $0x1b8] sm:$0xff]  ;;  %v2389_v44 = vld [vmem:[%s7776_s25 + $0x190] sm:$0xff] }
 0x31b   : > { %v3065_v51 = vpop.permute.xlu1 %3064  ;;  %3748 = vst.msk [vmem:[%s7923_s28 + $0xb8] sm:$0xff] %vm334_vm0, %v3594_v52  ;;  %v3105_v35 = vpop.permute.xlu2 %3104 }
 0x31c   : > { %v3591_v4 = vmax.f32 %v3437_v25, 0.0  ;;  %v3592_v21 = vmax.f32 %v3438_v9, 0.0  ;;  %v3429_v28 = vadd.f32 %v3065_v51, %v2890_v32  ;;  %v3430_v1 = vadd.f32 %v3065_v51, %v2891_v37  ;;  %v9159_v9 = vld [vmem:[#allocation54_spill] sm:$0xff] }
 0x31d   : > { %v3445_v23 = vadd.f32 %v3105_v35, %v2906_v20  ;;  %v3446_v29 = vadd.f32 %v3105_v35, %v2907_v10  ;;  %v2904_v32 = vmul.f32 %v7235_v49, %v9157_v17  ;;  %v2905_v37 = vmul.f32 %v7235_v49, %v9158_v50  ;;  %v2392_v50 = vld [vmem:[%s7776_s25 + $0x1a8] sm:$0xff] }
 0x31e   : > { %3745 = vst [vmem:[%s7923_s28 + $0xa0] sm:$0xff] %v3591_v4  ;;  %v3583_v34 = vmax.f32 %v3429_v28, 0.0  ;;  %v3584_v33 = vmax.f32 %v3430_v1, 0.0  ;;  %v2896_v20 = vmul.f32 %v9160_v12, %v9159_v9  ;;  %v2897_v10 = vmul.f32 %v9160_v12, %v9161_v5  ;;  %v9162_v4 = vld [vmem:[#allocation3_spill] sm:$0xff]  ;;  %v9165_v12 = vld [vmem:[#allocation25_spill] sm:$0xff] }
 0x31f   : > { %3746 = vst.msk [vmem:[%s7923_s28 + $0xa8] sm:$0xff] %vm334_vm0, %v3592_v21  ;;  %3309 = vperm.xlu0 %3965, %v2394_v47   ;;  %v3599_v42 = vmax.f32 %v3445_v23, 0.0  ;;  %v3600_v52 = vmax.f32 %v3446_v29, 0.0  ;;  %v2912_v49 = vmul.f32 %v7545_v63, %v9162_v4  ;;  %v9163_v21 = vld [vmem:[#allocation2_spill] sm:$0xff]  ;;  %v9168_v4 = vld [vmem:[#allocation57_spill] sm:$0xff] }
 0x320   : > { %3737 = vst [vmem:[%s7923_s28 + $0x60] sm:$0xff] %v3583_v34  ;;  %v2913_v28 = vmul.f32 %v7545_v63, %v9163_v21 }
 0x321   : > { %3738 = vst.msk [vmem:[%s7923_s28 + $0x68] sm:$0xff] %vm334_vm0, %v3584_v33  ;;  %v3100_v25 = vpop.permute.xlu0 %3099  ;;  %3284 = vperm.xlu2 %3964, %v2389_v44   ;;  %3289 = vperm.xlu1 %3963, %v2390_v57   ;;  %v2397_v44 = vld [vmem:[%s7776_s25 + $0x1d0] sm:$0xff] }
 0x322   : > { %v3443_v51 = vadd.f32 %v3100_v25, %v2904_v32  ;;  %v3444_v35 = vadd.f32 %v3100_v25, %v2905_v37  ;;  %3753 = vst [vmem:[%s7923_s28 + $0xe0] sm:$0xff] %v3599_v42  ;;  %v2393_v37 = vld [vmem:[%s7776_s25 + $0x1b0] sm:$0xff] }
 0x323   : > { %v3080_v1 = vpop.permute.xlu1 %3079  ;;  %3754 = vst.msk [vmem:[%s7923_s28 + $0xe8] sm:$0xff] %vm334_vm0, %v3600_v52  ;;  %v3120_v47 = vpop.permute.xlu2 %3119  ;;  %v9164_v25 = vld [vmem:[#allocation4_spill] sm:$0xff] }
 0x324   : > { %v3597_v23 = vmax.f32 %v3443_v51, 0.0  ;;  %v3598_v29 = vmax.f32 %v3444_v35, 0.0  ;;  %v3435_v34 = vadd.f32 %v3080_v1, %v2896_v20  ;;  %v3436_v33 = vadd.f32 %v3080_v1, %v2897_v10  ;;  %v9166_v10 = vld [vmem:[#allocation60_spill] sm:$0xff]  ;;  %v9167_v51 = vld [vmem:[#allocation165_spill] sm:$0xff]  ;;  %v9169_v1 = vld [vmem:[#allocation6_spill] sm:$0xff] }
 0x325   : > { %v3451_v57 = vadd.f32 %v3120_v47, %v2912_v49  ;;  %v3452_v42 = vadd.f32 %v3120_v47, %v2913_v28  ;;  %v2910_v9 = vmul.f32 %v7316_v58, %v9164_v25  ;;  %v2911_v20 = vmul.f32 %v7316_v58, %v9165_v12  ;;  %v9170_v47 = vld [vmem:[#allocation5_spill] sm:$0xff]  ;;  %v2395_v25 = vld [vmem:[%s7776_s25 + $0x1c0] sm:$0xff]  ;;  %v9171_v12 = vld [vmem:[#allocation27_spill] sm:$0xff] }
 0x326   : > { %3751 = vst [vmem:[%s7923_s28 + $0xd0] sm:$0xff] %v3597_v23  ;;  %v3589_v17 = vmax.f32 %v3435_v34, 0.0  ;;  %v3590_v32 = vmax.f32 %v3436_v33, 0.0  ;;  %v2902_v35 = vmul.f32 %v9167_v51, %v9166_v10  ;;  %v2903_v49 = vmul.f32 %v9167_v51, %v9168_v4 }
 0x327   : > { %3752 = vst.msk [vmem:[%s7923_s28 + $0xd8] sm:$0xff] %vm334_vm0, %v3598_v29  ;;  %3324 = vperm.xlu0 %3965, %v2397_v44   ;;  %v3605_v63 = vmax.f32 %v3451_v57, 0.0  ;;  %v3606_v52 = vmax.f32 %v3452_v42, 0.0  ;;  %v2918_v58 = vmul.f32 %v7618_v43, %v9169_v1  ;;  %v2919_v23 = vmul.f32 %v7618_v43, %v9170_v47  ;;  %v9176_v47 = vld [vmem:[#allocation8_spill] sm:$0xff] }
 0x328   : > { %3743 = vst [vmem:[%s7923_s28 + $0x90] sm:$0xff] %v3589_v17  ;;  %v2400_v17 = vld [vmem:[%s7776_s25 + $0x1e8] sm:$0xff] }
 0x329   : > { %3744 = vst.msk [vmem:[%s7923_s28 + $0x98] sm:$0xff] %vm334_vm0, %v3590_v32  ;;  %v3115_v5 = vpop.permute.xlu0 %3114  ;;  %3299 = vperm.xlu2 %3964, %v2392_v50   ;;  %3304 = vperm.xlu1 %3963, %v2393_v37  }
 0x32a   : > { %v3449_v21 = vadd.f32 %v3115_v5, %v2910_v9  ;;  %v3450_v28 = vadd.f32 %v3115_v5, %v2911_v20  ;;  %3759 = vst [vmem:[%s7923_s28 + $0x110] sm:$0xff] %v3605_v63  ;;  %v2396_v9 = vld [vmem:[%s7776_s25 + $0x1c8] sm:$0xff]  ;;  %v2916_v20 = vmul.f32 %v7396_v36, %v9171_v12  ;;  %v9172_v5 = vld [vmem:[#allocation13_spill] sm:$0xff] }
 0x32b   : > { %v3095_v29 = vpop.permute.xlu1 %3094  ;;  %3760 = vst.msk [vmem:[%s7923_s28 + $0x118] sm:$0xff] %vm334_vm0, %v3606_v52  ;;  %v3135_v34 = vpop.permute.xlu2 %3134  ;;  %v2917_v10 = vmul.f32 %v7396_v36, %v9172_v5  ;;  %v9178_v12 = vld [vmem:[#allocation9_spill] sm:$0xff] }
 0x32c   : > { %v3603_v33 = vmax.f32 %v3449_v21, 0.0  ;;  %v3604_v44 = vmax.f32 %v3450_v28, 0.0  ;;  %v3441_v57 = vadd.f32 %v3095_v29, %v2902_v35  ;;  %v3442_v42 = vadd.f32 %v3095_v29, %v2903_v49  ;;  %v9173_v35 = vld [vmem:[#allocation24_spill] sm:$0xff]  ;;  %v9174_v49 = vld [vmem:[#allocation63_spill] sm:$0xff] }
 0x32d   : > { %v3457_v32 = vadd.f32 %v3135_v34, %v2918_v58  ;;  %v3458_v50 = vadd.f32 %v3135_v34, %v2919_v23  ;;  %v2908_v4 = vmul.f32 %v7310_v7, %v9173_v35  ;;  %v2909_v21 = vmul.f32 %v7310_v7, %v9174_v49  ;;  %v9175_v58 = vld [vmem:[#allocation11_spill] sm:$0xff]  ;;  %v9180_v35 = vld [vmem:[#allocation28_spill] sm:$0xff] }
 0x32e   : > { %3757 = vst [vmem:[%s7923_s28 + $0x100] sm:$0xff] %v3603_v33  ;;  %v3595_v37 = vmax.f32 %v3441_v57, 0.0  ;;  %v3596_v63 = vmax.f32 %v3442_v42, 0.0  ;;  %v2924_v36 = vmul.f32 %v7685_v6, %v9175_v58  ;;  %v2925_v23 = vmul.f32 %v7685_v6, %v9176_v47  ;;  %v2403_v42 = vld [vmem:[%s7776_s25 + $0x200] sm:$0xff] }
 0x32f   : > { %3758 = vst.msk [vmem:[%s7923_s28 + $0x108] sm:$0xff] %vm334_vm0, %v3604_v44  ;;  %3339 = vperm.xlu0 %3965, %v2400_v17   ;;  %v3611_v43 = vmax.f32 %v3457_v32, 0.0  ;;  %v3612_v52 = vmax.f32 %v3458_v50, 0.0 }
 0x330   : > { %3749 = vst [vmem:[%s7923_s28 + $0xc0] sm:$0xff] %v3595_v37 }
 0x331   : > { %3750 = vst.msk [vmem:[%s7923_s28 + $0xc8] sm:$0xff] %vm334_vm0, %v3596_v63  ;;  %v3130_v51 = vpop.permute.xlu0 %3129  ;;  %3314 = vperm.xlu2 %3964, %v2395_v25   ;;  %3319 = vperm.xlu1 %3963, %v2396_v9   ;;  %v2398_v63 = vld [vmem:[%s7776_s25 + $0x1d8] sm:$0xff]  ;;  %v2399_v25 = vld [vmem:[%s7776_s25 + $0x1e0] sm:$0xff] }
 0x332   : > { %v3455_v28 = vadd.f32 %v3130_v51, %v2916_v20  ;;  %v3456_v1 = vadd.f32 %v3130_v51, %v2917_v10  ;;  %3765 = vst [vmem:[%s7923_s28 + $0x140] sm:$0xff] %v3611_v43  ;;  %v9177_v43 = vld [vmem:[#allocation19_spill] sm:$0xff]  ;;  %v2923_v20 = vmul.f32 %v7477_v30, %v9178_v12  ;;  %v9179_v10 = vld [vmem:[#allocation10_spill] sm:$0xff] }
 0x333   : > { %v3110_v29 = vpop.permute.xlu1 %3109  ;;  %3766 = vst.msk [vmem:[%s7923_s28 + $0x148] sm:$0xff] %vm334_vm0, %v3612_v52  ;;  %v3150_v34 = vpop.permute.xlu2 %3149  ;;  %v2922_v52 = vmul.f32 %v7477_v30, %v9177_v43  ;;  %v2914_v51 = vmul.f32 %v7400_v48, %v9179_v10  ;;  %v9185_v43 = vld [vmem:[#allocation31_spill] sm:$0xff]  ;;  %v9186_v12 = vld [vmem:[#allocation26_spill] sm:$0xff] }
 0x334   : > { %v3609_v33 = vmax.f32 %v3455_v28, 0.0  ;;  %v3610_v44 = vmax.f32 %v3456_v1, 0.0  ;;  %v3447_v7 = vadd.f32 %v3110_v29, %v2908_v4  ;;  %v3448_v57 = vadd.f32 %v3110_v29, %v2909_v21  ;;  %v9181_v28 = vld [vmem:[#allocation14_spill] sm:$0xff]  ;;  %v9182_v1 = vld [vmem:[#allocation12_spill] sm:$0xff] }
 0x335   : > { %v3463_v17 = vadd.f32 %v3150_v34, %v2924_v36  ;;  %v3464_v32 = vadd.f32 %v3150_v34, %v2925_v23  ;;  %v2915_v4 = vmul.f32 %v7400_v48, %v9180_v35  ;;  %v2930_v30 = vmul.f32 %v7734_v62, %v9181_v28  ;;  %v9188_v35 = vld [vmem:[#allocation17_spill] sm:$0xff] }
 0x336   : > { %3763 = vst [vmem:[%s7923_s28 + $0x130] sm:$0xff] %v3609_v33  ;;  %v3601_v50 = vmax.f32 %v3447_v7, 0.0  ;;  %v3602_v37 = vmax.f32 %v3448_v57, 0.0  ;;  %v2931_v58 = vmul.f32 %v7734_v62, %v9182_v1  ;;  %v2406_v33 = vld [vmem:[%s7776_s25 + $0x218] sm:$0xff] }
 0x337   : > { %3764 = vst.msk [vmem:[%s7923_s28 + $0x138] sm:$0xff] %vm334_vm0, %v3610_v44  ;;  %3354 = vperm.xlu0 %3965, %v2403_v42   ;;  %v3617_v6 = vmax.f32 %v3463_v17, 0.0  ;;  %v3618_v9 = vmax.f32 %v3464_v32, 0.0  ;;  %v2401_v17 = vld [vmem:[%s7776_s25 + $0x1f0] sm:$0xff]  ;;  %v2402_v32 = vld [vmem:[%s7776_s25 + $0x1f8] sm:$0xff] }
 0x338   : > { %3755 = vst [vmem:[%s7923_s28 + $0xf0] sm:$0xff] %v3601_v50 }
 0x339   : > { %3756 = vst.msk [vmem:[%s7923_s28 + $0xf8] sm:$0xff] %vm334_vm0, %v3602_v37  ;;  %v3145_v5 = vpop.permute.xlu0 %3144  ;;  %3329 = vperm.xlu2 %3964, %v2398_v63   ;;  %3334 = vperm.xlu1 %3963, %v2399_v25   ;;  %v9183_v37 = vld [vmem:[#allocation15_spill] sm:$0xff]  ;;  %v9184_v25 = vld [vmem:[#allocation30_spill] sm:$0xff] }
 0x33a   : > { %v3461_v49 = vadd.f32 %v3145_v5, %v2922_v52  ;;  %v3462_v21 = vadd.f32 %v3145_v5, %v2923_v20  ;;  %3771 = vst [vmem:[%s7923_s28 + $0x170] sm:$0xff] %v3617_v6  ;;  %v2928_v63 = vmul.f32 %v7557_v18, %v9183_v37  ;;  %v2929_v6 = vmul.f32 %v7557_v18, %v9184_v25 }
 0x33b   : > { %v3125_v36 = vpop.permute.xlu1 %3124  ;;  %3772 = vst.msk [vmem:[%s7923_s28 + $0x178] sm:$0xff] %vm334_vm0, %v3618_v9  ;;  %v3165_v47 = vpop.permute.xlu2 %3164  ;;  %v2920_v52 = vmul.f32 %v7498_v39, %v9185_v43  ;;  %v2921_v20 = vmul.f32 %v7498_v39, %v9186_v12 }
 0x33c   : > { %v3615_v23 = vmax.f32 %v3461_v49, 0.0  ;;  %v3616_v29 = vmax.f32 %v3462_v21, 0.0  ;;  %v3453_v48 = vadd.f32 %v3125_v36, %v2914_v51  ;;  %v3454_v34 = vadd.f32 %v3125_v36, %v2915_v4  ;;  %v9187_v51 = vld [vmem:[#allocation18_spill] sm:$0xff] }
 0x33d   : > { %v3469_v44 = vadd.f32 %v3165_v47, %v2930_v30  ;;  %v3470_v7 = vadd.f32 %v3165_v47, %v2931_v58  ;;  %v2936_v18 = vmul.f32 %v7770_v2, %v9187_v51  ;;  %v2937_v4 = vmul.f32 %v7770_v2, %v9188_v35  ;;  %v2409_v58 = vld [vmem:[%s7776_s25 + $0x230] sm:$0xff]  ;;  %v2412_v51 = vld [vmem:[%s7776_s25 + $0x248] sm:$0xff] }
 0x33e   : > { %3769 = vst [vmem:[%s7923_s28 + $0x160] sm:$0xff] %v3615_v23  ;;  %v3607_v57 = vmax.f32 %v3453_v48, 0.0  ;;  %v3608_v42 = vmax.f32 %v3454_v34, 0.0  ;;  %v2404_v48 = vld [vmem:[%s7776_s25 + $0x208] sm:$0xff]  ;;  %v2405_v34 = vld [vmem:[%s7776_s25 + $0x210] sm:$0xff] }
 0x33f   : > { %3770 = vst.msk [vmem:[%s7923_s28 + $0x168] sm:$0xff] %vm334_vm0, %v3616_v29  ;;  %3369 = vperm.xlu0 %3965, %v2406_v33   ;;  %v3623_v62 = vmax.f32 %v3469_v44, 0.0  ;;  %v3624_v50 = vmax.f32 %v3470_v7, 0.0  ;;  %v9189_v44 = vld [vmem:[#allocation22_spill] sm:$0xff] }
 0x340   : > { %3761 = vst [vmem:[%s7923_s28 + $0x120] sm:$0xff] %v3607_v57  ;;  %v2934_v7 = vmul.f32 %v7626_v27, %v9189_v44  ;;  %v9190_v57 = vld [vmem:[#allocation21_spill] sm:$0xff] }
 0x341   : > { %3762 = vst.msk [vmem:[%s7923_s28 + $0x128] sm:$0xff] %vm334_vm0, %v3608_v42  ;;  %v3160_v9 = vpop.permute.xlu0 %3159  ;;  %3344 = vperm.xlu2 %3964, %v2401_v17   ;;  %3349 = vperm.xlu1 %3963, %v2402_v32   ;;  %v2935_v42 = vmul.f32 %v7626_v27, %v9190_v57  ;;  %v9191_v32 = vld [vmem:[#allocation29_spill] sm:$0xff] }
 0x342   : > { %v3467_v5 = vadd.f32 %v3160_v9, %v2928_v63  ;;  %v3468_v10 = vadd.f32 %v3160_v9, %v2929_v6  ;;  %3777 = vst [vmem:[%s7923_s28 + $0x1a0] sm:$0xff] %v3623_v62  ;;  %v2926_v62 = vmul.f32 %v7598_v19, %v9191_v32  ;;  %v9193_v6 = vld [vmem:[#allocation67_spill] sm:$0xff]  ;;  %v9199_v44 = vld [vmem:[#allocation73_spill] sm:$0xff] }
 0x343   : > { %v3140_v49 = vpop.permute.xlu1 %3139  ;;  %3778 = vst.msk [vmem:[%s7923_s28 + $0x1a8] sm:$0xff] %vm334_vm0, %v3624_v50  ;;  %v3180_v21 = vpop.permute.xlu2 %3179  ;;  %v9192_v50 = vld [vmem:[#allocation16_spill] sm:$0xff]  ;;  %v2942_v27 = vmul.f32 %v7791_v59, %v9193_v6  ;;  %v9194_v9 = vld [vmem:[#allocation23_spill] sm:$0xff] }
 0x344   : > { %v3621_v28 = vmax.f32 %v3467_v5, 0.0  ;;  %v3622_v30 = vmax.f32 %v3468_v10, 0.0  ;;  %v3459_v39 = vadd.f32 %v3140_v49, %v2920_v52  ;;  %v3460_v1 = vadd.f32 %v3140_v49, %v2921_v20 }
 0x345   : > { %v3475_v36 = vadd.f32 %v3180_v21, %v2936_v18  ;;  %v3476_v47 = vadd.f32 %v3180_v21, %v2937_v4  ;;  %v2927_v37 = vmul.f32 %v7598_v19, %v9192_v50  ;;  %v2943_v43 = vmul.f32 %v7791_v59, %v9194_v9  ;;  %v2407_v21 = vld [vmem:[%s7776_s25 + $0x220] sm:$0xff]  ;;  %v2410_v9 = vld [vmem:[%s7776_s25 + $0x238] sm:$0xff] }
 0x346   : > { %3775 = vst [vmem:[%s7923_s28 + $0x190] sm:$0xff] %v3621_v28  ;;  %v3613_v23 = vmax.f32 %v3459_v39, 0.0  ;;  %v3614_v29 = vmax.f32 %v3460_v1, 0.0  ;;  %v2408_v28 = vld [vmem:[%s7776_s25 + $0x228] sm:$0xff]  ;;  %v9195_v39 = vld [vmem:[#allocation68_spill] sm:$0xff] }
 0x347   : > { %3776 = vst.msk [vmem:[%s7923_s28 + $0x198] sm:$0xff] %vm334_vm0, %v3622_v30  ;;  %3384 = vperm.xlu0 %3965, %v2409_v58   ;;  %v3629_v2 = vmax.f32 %v3475_v36, 0.0  ;;  %v3630_v33 = vmax.f32 %v3476_v47, 0.0  ;;  %v2940_v1 = vmul.f32 %v7694_v56, %v9195_v39  ;;  %v9196_v58 = vld [vmem:[#allocation36_spill] sm:$0xff] }
 0x348   : > { %3767 = vst [vmem:[%s7923_s28 + $0x150] sm:$0xff] %v3613_v23  ;;  %v2941_v36 = vmul.f32 %v7694_v56, %v9196_v58  ;;  %v9197_v23 = vld [vmem:[#allocation20_spill] sm:$0xff]  ;;  %v2948_v56 = vmul.f32 %v7801_v53, %v9199_v44 }
 0x349   : > { %3768 = vst.msk [vmem:[%s7923_s28 + $0x158] sm:$0xff] %vm334_vm0, %v3614_v29  ;;  %v3175_v17 = vpop.permute.xlu0 %3174  ;;  %3359 = vperm.xlu2 %3964, %v2404_v48   ;;  %3364 = vperm.xlu1 %3963, %v2405_v34   ;;  %v2932_v29 = vmul.f32 %v7674_v60, %v9197_v23  ;;  %v9198_v48 = vld [vmem:[#allocation34_spill] sm:$0xff] }
 0x34a   : > { %v3473_v63 = vadd.f32 %v3175_v17, %v2934_v7  ;;  %v3474_v25 = vadd.f32 %v3175_v17, %v2935_v42  ;;  %3783 = vst [vmem:[%s7923_s28 + $0x1d0] sm:$0xff] %v3629_v2  ;;  %v2933_v34 = vmul.f32 %v7674_v60, %v9198_v48  ;;  %v9200_v7 = vld [vmem:[#allocation70_spill] sm:$0xff] }
 0x34b   : > { %v3155_v52 = vpop.permute.xlu1 %3154  ;;  %3784 = vst.msk [vmem:[%s7923_s28 + $0x1d8] sm:$0xff] %vm334_vm0, %v3630_v33  ;;  %v3195_v12 = vpop.permute.xlu2 %3194  ;;  %v2949_v57 = vmul.f32 %v7801_v53, %v9200_v7 }
 0x34c   : > { %v3627_v20 = vmax.f32 %v3473_v63, 0.0  ;;  %v3628_v5 = vmax.f32 %v3474_v25, 0.0  ;;  %v3465_v19 = vadd.f32 %v3155_v52, %v2926_v62  ;;  %v3466_v10 = vadd.f32 %v3155_v52, %v2927_v37  ;;  %v2415_v37 = vld [vmem:[%s7776_s25 + $0x260] sm:$0xff] }
 0x34d   : > { %v3481_v18 = vadd.f32 %v3195_v12, %v2942_v27  ;;  %v3482_v35 = vadd.f32 %v3195_v12, %v2943_v43  ;;  %v2411_v43 = vld [vmem:[%s7776_s25 + $0x240] sm:$0xff] }
 0x34e   : > { %3781 = vst [vmem:[%s7923_s28 + $0x1c0] sm:$0xff] %v3627_v20  ;;  %v3619_v4 = vmax.f32 %v3465_v19, 0.0  ;;  %v3620_v49 = vmax.f32 %v3466_v10, 0.0  ;;  %v9201_v12 = vld [vmem:[#allocation74_spill] sm:$0xff] }
 0x34f   : > { %3782 = vst.msk [vmem:[%s7923_s28 + $0x1c8] sm:$0xff] %vm334_vm0, %v3628_v5  ;;  %3399 = vperm.xlu0 %3965, %v2412_v51   ;;  %v3635_v59 = vmax.f32 %v3481_v18, 0.0  ;;  %v3636_v30 = vmax.f32 %v3482_v35, 0.0  ;;  %v2946_v20 = vmul.f32 %v7754_v61, %v9201_v12  ;;  %v9202_v5 = vld [vmem:[#allocation71_spill] sm:$0xff]  ;;  %v9203_v51 = vld [vmem:[#allocation33_spill] sm:$0xff]  ;;  %v9204_v35 = vld [vmem:[#allocation32_spill] sm:$0xff] }
 0x350   : > { %3773 = vst [vmem:[%s7923_s28 + $0x180] sm:$0xff] %v3619_v4  ;;  %v2947_v19 = vmul.f32 %v7754_v61, %v9202_v5  ;;  %v2938_v18 = vmul.f32 %v7727_v14, %v9203_v51  ;;  %v2939_v4 = vmul.f32 %v7727_v14, %v9204_v35 }
 0x351   : > { %3774 = vst.msk [vmem:[%s7923_s28 + $0x188] sm:$0xff] %vm334_vm0, %v3620_v49  ;;  %v3190_v47 = vpop.permute.xlu0 %3189  ;;  %3374 = vperm.xlu2 %3964, %v2407_v21   ;;  %3379 = vperm.xlu1 %3963, %v2408_v28   ;;  %v9205_v28 = vld [vmem:[#allocation79_spill] sm:$0xff] }
 0x352   : > { %v3479_v2 = vadd.f32 %v3190_v47, %v2940_v1  ;;  %v3480_v33 = vadd.f32 %v3190_v47, %v2941_v36  ;;  %3789 = vst [vmem:[%s7923_s28 + $0x200] sm:$0xff] %v3635_v59  ;;  %v2954_v61 = vmul.f32 %v7810_v3, %v9205_v28  ;;  %v9206_v59 = vld [vmem:[#allocation76_spill] sm:$0xff]  ;;  %v9215_v28 = vld [vmem:[#allocation75_spill] sm:$0xff] }
 0x353   : > { %v3170_v42 = vpop.permute.xlu1 %3169  ;;  %3790 = vst.msk [vmem:[%s7923_s28 + $0x208] sm:$0xff] %vm334_vm0, %v3636_v30  ;;  %v3210_v17 = vpop.permute.xlu2 %3209  ;;  %v2955_v30 = vmul.f32 %v7810_v3, %v9206_v59  ;;  %v9216_v59 = vld [vmem:[#allocation72_spill] sm:$0xff] }
 0x354   : > { %v3633_v32 = vmax.f32 %v3479_v2, 0.0  ;;  %v3634_v62 = vmax.f32 %v3480_v33, 0.0  ;;  %v3471_v60 = vadd.f32 %v3170_v42, %v2932_v29  ;;  %v3472_v50 = vadd.f32 %v3170_v42, %v2933_v34  ;;  %v2413_v2 = vld [vmem:[%s7776_s25 + $0x250] sm:$0xff]  ;;  %v2414_v33 = vld [vmem:[%s7776_s25 + $0x258] sm:$0xff] }
 0x355   : > { %v3487_v63 = vadd.f32 %v3210_v17, %v2948_v56  ;;  %v3488_v25 = vadd.f32 %v3210_v17, %v2949_v57  ;;  %v9207_v56 = vld [vmem:[#allocation81_spill] sm:$0xff]  ;;  %v9208_v57 = vld [vmem:[#allocation78_spill] sm:$0xff] }
 0x356   : > { %3787 = vst [vmem:[%s7923_s28 + $0x1f0] sm:$0xff] %v3633_v32  ;;  %v3625_v6 = vmax.f32 %v3471_v60, 0.0  ;;  %v3626_v27 = vmax.f32 %v3472_v50, 0.0  ;;  %v2952_v7 = vmul.f32 %v7779_v13, %v9207_v56  ;;  %v2953_v42 = vmul.f32 %v7779_v13, %v9208_v57  ;;  %v9209_v32 = vld [vmem:[#allocation69_spill] sm:$0xff]  ;;  %v9210_v60 = vld [vmem:[#allocation66_spill] sm:$0xff] }
 0x357   : > { %3788 = vst.msk [vmem:[%s7923_s28 + $0x1f8] sm:$0xff] %vm334_vm0, %v3634_v62  ;;  %3414 = vperm.xlu0 %3965, %v2415_v37   ;;  %v3641_v53 = vmax.f32 %v3487_v63, 0.0  ;;  %v3642_v52 = vmax.f32 %v3488_v25, 0.0  ;;  %v2944_v62 = vmul.f32 %v7764_v26, %v9209_v32  ;;  %v2945_v50 = vmul.f32 %v7764_v26, %v9210_v60  ;;  %v9211_v25 = vld [vmem:[#allocation86_spill] sm:$0xff] }
 0x358   : > { %3779 = vst [vmem:[%s7923_s28 + $0x1b0] sm:$0xff] %v3625_v6  ;;  %v2960_v13 = vmul.f32 %v7819_v41, %v9211_v25  ;;  %v9212_v6 = vld [vmem:[#allocation83_spill] sm:$0xff] }
 0x359   : > { %3780 = vst.msk [vmem:[%s7923_s28 + $0x1b8] sm:$0xff] %vm334_vm0, %v3626_v27  ;;  %v3205_v10 = vpop.permute.xlu0 %3204  ;;  %3389 = vperm.xlu2 %3964, %v2410_v9   ;;  %3394 = vperm.xlu1 %3963, %v2411_v43   ;;  %v2961_v27 = vmul.f32 %v7819_v41, %v9212_v6 }
 0x35a   : > { %v3485_v49 = vadd.f32 %v3205_v10, %v2946_v20  ;;  %v3486_v21 = vadd.f32 %v3205_v10, %v2947_v19  ;;  %3795 = vst [vmem:[%s7923_s28 + $0x230] sm:$0xff] %v3641_v53 }
 0x35b   : > { %v3185_v39 = vpop.permute.xlu1 %3184  ;;  %3796 = vst.msk [vmem:[%s7923_s28 + $0x238] sm:$0xff] %vm334_vm0, %v3642_v52  ;;  %v3225_v1 = vpop.permute.xlu2 %3224 }
 0x35c   : > { %v3639_v58 = vmax.f32 %v3485_v49, 0.0  ;;  %v3640_v36 = vmax.f32 %v3486_v21, 0.0  ;;  %v3477_v14 = vadd.f32 %v3185_v39, %v2938_v18  ;;  %v3478_v47 = vadd.f32 %v3185_v39, %v2939_v4  ;;  %v9213_v18 = vld [vmem:[#allocation87_spill] sm:$0xff]  ;;  %v9214_v4 = vld [vmem:[#allocation84_spill] sm:$0xff] }
 0x35d   : > { %v3493_v23 = vadd.f32 %v3225_v1, %v2954_v61  ;;  %v3494_v29 = vadd.f32 %v3225_v1, %v2955_v30  ;;  %v2958_v35 = vmul.f32 %v7793_v16, %v9213_v18  ;;  %v2959_v49 = vmul.f32 %v7793_v16, %v9214_v4  ;;  %v9226_v18 = vld [vmem:[#allocation96_spill] sm:$0xff] }
 0x35e   : > { %3793 = vst [vmem:[%s7923_s28 + $0x220] sm:$0xff] %v3639_v58  ;;  %v3631_v48 = vmax.f32 %v3477_v14, 0.0  ;;  %v3632_v34 = vmax.f32 %v3478_v47, 0.0  ;;  %v2950_v61 = vmul.f32 %v7786_v45, %v9215_v28  ;;  %v2951_v30 = vmul.f32 %v7786_v45, %v9216_v59  ;;  %v9217_v58 = vld [vmem:[#allocation92_spill] sm:$0xff]  ;;  %v9218_v14 = vld [vmem:[#allocation89_spill] sm:$0xff]  ;;  %v9228_v28 = vld [vmem:[#allocation82_spill] sm:$0xff] }
 0x35f   : > { %3794 = vst.msk [vmem:[%s7923_s28 + $0x228] sm:$0xff] %vm334_vm0, %v3640_v36  ;;  %v3647_v3 = vmax.f32 %v3493_v23, 0.0  ;;  %v3648_v44 = vmax.f32 %v3494_v29, 0.0  ;;  %v2966_v36 = vmul.f32 %v7828_v22, %v9217_v58  ;;  %v2967_v16 = vmul.f32 %v7828_v22, %v9218_v14  ;;  %v9230_v58 = vld [vmem:[#allocation101_spill] sm:$0xff] }
 0x360   : > { %3785 = vst [vmem:[%s7923_s28 + $0x1e0] sm:$0xff] %v3631_v48 }
 0x361   : > { %3786 = vst.msk [vmem:[%s7923_s28 + $0x1e8] sm:$0xff] %vm334_vm0, %v3632_v34  ;;  %v3220_v17 = vpop.permute.xlu0 %3219  ;;  %3404 = vperm.xlu2 %3964, %v2413_v2   ;;  %3409 = vperm.xlu1 %3963, %v2414_v33  }
 0x362   : > { %v3491_v37 = vadd.f32 %v3220_v17, %v2952_v7  ;;  %v3492_v63 = vadd.f32 %v3220_v17, %v2953_v42  ;;  %3801 = vst [vmem:[%s7923_s28 + $0x260] sm:$0xff] %v3647_v3  ;;  %v9219_v7 = vld [vmem:[#allocation93_spill] sm:$0xff]  ;;  %v9220_v42 = vld [vmem:[#allocation90_spill] sm:$0xff] }
 0x363   : > { %v3200_v9 = vpop.permute.xlu1 %3199  ;;  %3802 = vst.msk [vmem:[%s7923_s28 + $0x268] sm:$0xff] %vm334_vm0, %v3648_v44  ;;  %v3240_v43 = vpop.permute.xlu2 %3239  ;;  %v2964_v57 = vmul.f32 %v7803_v46, %v9219_v7  ;;  %v2965_v17 = vmul.f32 %v7803_v46, %v9220_v42  ;;  %v9233_v7 = vld [vmem:[#allocation91_spill] sm:$0xff]  ;;  %v9234_v42 = vld [vmem:[#allocation88_spill] sm:$0xff] }
 0x364   : > { %v3645_v53 = vmax.f32 %v3491_v37, 0.0  ;;  %v3646_v52 = vmax.f32 %v3492_v63, 0.0  ;;  %v3483_v12 = vadd.f32 %v3200_v9, %v2944_v62  ;;  %v3484_v26 = vadd.f32 %v3200_v9, %v2945_v50  ;;  %v9221_v62 = vld [vmem:[#allocation80_spill] sm:$0xff]  ;;  %v9222_v50 = vld [vmem:[#allocation77_spill] sm:$0xff] }
 0x365   : > { %v3499_v20 = vadd.f32 %v3240_v43, %v2960_v13  ;;  %v3500_v5 = vadd.f32 %v3240_v43, %v2961_v27  ;;  %v2956_v60 = vmul.f32 %v7799_v38, %v9221_v62  ;;  %v2957_v37 = vmul.f32 %v7799_v38, %v9222_v50  ;;  %v9223_v13 = vld [vmem:[#allocation98_spill] sm:$0xff]  ;;  %v9224_v27 = vld [vmem:[#allocation95_spill] sm:$0xff] }
 0x366   : > { %3799 = vst [vmem:[%s7923_s28 + $0x250] sm:$0xff] %v3645_v53  ;;  %v3637_v19 = vmax.f32 %v3483_v12, 0.0  ;;  %v3638_v10 = vmax.f32 %v3484_v26, 0.0  ;;  %v2972_v6 = vmul.f32 %v7837_v0, %v9223_v13  ;;  %v2973_v46 = vmul.f32 %v7837_v0, %v9224_v27 }
 0x367   : > { %3800 = vst.msk [vmem:[%s7923_s28 + $0x258] sm:$0xff] %vm334_vm0, %v3646_v52  ;;  %v3653_v41 = vmax.f32 %v3499_v20, 0.0  ;;  %v3654_v51 = vmax.f32 %v3500_v5, 0.0 }
 0x368   : > { %3791 = vst [vmem:[%s7923_s28 + $0x210] sm:$0xff] %v3637_v19 }
 0x369   : > { %3792 = vst.msk [vmem:[%s7923_s28 + $0x218] sm:$0xff] %vm334_vm0, %v3638_v10  ;;  %v3235_v21 = vpop.permute.xlu0 %3234 }
 0x36a   : > { %v3497_v39 = vadd.f32 %v3235_v21, %v2958_v35  ;;  %v3498_v1 = vadd.f32 %v3235_v21, %v2959_v49  ;;  %3807 = vst [vmem:[%s7923_s28 + $0x290] sm:$0xff] %v3653_v41  ;;  %v9225_v41 = vld [vmem:[#allocation99_spill] sm:$0xff]  ;;  %v2971_v35 = vmul.f32 %v7812_v15, %v9226_v18  ;;  %v9227_v49 = vld [vmem:[#allocation85_spill] sm:$0xff] }
 0x36b   : > { %v3215_v47 = vpop.permute.xlu1 %3214  ;;  %3808 = vst.msk [vmem:[%s7923_s28 + $0x298] sm:$0xff] %vm334_vm0, %v3654_v51  ;;  %v3255_v23 = vpop.permute.xlu2 %3254  ;;  %v2970_v51 = vmul.f32 %v7812_v15, %v9225_v41  ;;  %v2962_v21 = vmul.f32 %v7808_v54, %v9227_v49  ;;  %v2979_v15 = vmul.f32 %v7846_v55, %v9230_v58  ;;  %v9241_v41 = vld [vmem:[#allocation94_spill] sm:$0xff]  ;;  %v9243_v49 = vld [vmem:[#allocation169_spill] sm:$0xff] }
 0x36c   : > { %v3651_v29 = vmax.f32 %v3497_v39, 0.0  ;;  %v3652_v48 = vmax.f32 %v3498_v1, 0.0  ;;  %v3489_v34 = vadd.f32 %v3215_v47, %v2950_v61  ;;  %v3490_v45 = vadd.f32 %v3215_v47, %v2951_v30  ;;  %v9229_v39 = vld [vmem:[#allocation104_spill] sm:$0xff] }
 0x36d   : > { %v3505_v2 = vadd.f32 %v3255_v23, %v2966_v36  ;;  %v3506_v33 = vadd.f32 %v3255_v23, %v2967_v16  ;;  %v2963_v61 = vmul.f32 %v7808_v54, %v9228_v28  ;;  %v2978_v1 = vmul.f32 %v7846_v55, %v9229_v39  ;;  %v9244_v28 = vld [vmem:[#allocation113_spill] sm:$0xff] }
 0x36e   : > { %3805 = vst [vmem:[%s7923_s28 + $0x280] sm:$0xff] %v3651_v29  ;;  %v3643_v3 = vmax.f32 %v3489_v34, 0.0  ;;  %v3644_v44 = vmax.f32 %v3490_v45, 0.0 }
 0x36f   : > { %3806 = vst.msk [vmem:[%s7923_s28 + $0x288] sm:$0xff] %vm334_vm0, %v3652_v48  ;;  %v3659_v22 = vmax.f32 %v3505_v2, 0.0  ;;  %v3660_v56 = vmax.f32 %v3506_v33, 0.0  ;;  %v9231_v33 = vld [vmem:[#allocation105_spill] sm:$0xff] }
 0x370   : > { %3797 = vst [vmem:[%s7923_s28 + $0x240] sm:$0xff] %v3643_v3  ;;  %v2976_v3 = vmul.f32 %v7821_v40, %v9231_v33  ;;  %v9249_v33 = vld [vmem:[#allocation156_spill] sm:$0xff] }
 0x371   : > { %3798 = vst.msk [vmem:[%s7923_s28 + $0x248] sm:$0xff] %vm334_vm0, %v3644_v44  ;;  %v3250_v32 = vpop.permute.xlu0 %3249  ;;  %v9232_v44 = vld [vmem:[#allocation102_spill] sm:$0xff] }
 0x372   : > { %v3503_v63 = vadd.f32 %v3250_v32, %v2964_v57  ;;  %v3504_v25 = vadd.f32 %v3250_v32, %v2965_v17  ;;  %3813 = vst [vmem:[%s7923_s28 + $0x2c0] sm:$0xff] %v3659_v22  ;;  %v2977_v22 = vmul.f32 %v7821_v40, %v9232_v44  ;;  %v2968_v57 = vmul.f32 %v7817_v11, %v9233_v7  ;;  %v9250_v44 = vld [vmem:[#allocation100_spill] sm:$0xff] }
 0x373   : > { %v3230_v9 = vpop.permute.xlu1 %3229  ;;  %3814 = vst.msk [vmem:[%s7923_s28 + $0x2c8] sm:$0xff] %vm334_vm0, %v3660_v56  ;;  %v3270_v43 = vpop.permute.xlu2 %3269  ;;  %v2969_v17 = vmul.f32 %v7817_v11, %v9234_v42  ;;  %v9252_v42 = vld [vmem:[#allocation172_spill] sm:$0xff] }
 0x374   : > { %v3657_v53 = vmax.f32 %v3503_v63, 0.0  ;;  %v3658_v52 = vmax.f32 %v3504_v25, 0.0  ;;  %v3495_v12 = vadd.f32 %v3230_v9, %v2956_v60  ;;  %v3496_v38 = vadd.f32 %v3230_v9, %v2957_v37  ;;  %v9235_v60 = vld [vmem:[#allocation110_spill] sm:$0xff]  ;;  %v9236_v37 = vld [vmem:[#allocation107_spill] sm:$0xff] }
 0x375   : > { %v3511_v26 = vadd.f32 %v3270_v43, %v2972_v6  ;;  %v3512_v20 = vadd.f32 %v3270_v43, %v2973_v46  ;;  %v2984_v50 = vmul.f32 %v7855_v8, %v9235_v60  ;;  %v2985_v40 = vmul.f32 %v7855_v8, %v9236_v37 }
 0x376   : > { %3811 = vst [vmem:[%s7923_s28 + $0x2b0] sm:$0xff] %v3657_v53  ;;  %v3649_v5 = vmax.f32 %v3495_v12, 0.0  ;;  %v3650_v19 = vmax.f32 %v3496_v38, 0.0  ;;  %v9237_v12 = vld [vmem:[#allocation111_spill] sm:$0xff] }
 0x377   : > { %3812 = vst.msk [vmem:[%s7923_s28 + $0x2b8] sm:$0xff] %vm334_vm0, %v3658_v52  ;;  %v3665_v0 = vmax.f32 %v3511_v26, 0.0  ;;  %v3666_v10 = vmax.f32 %v3512_v20, 0.0  ;;  %v2982_v38 = vmul.f32 %v7830_v24, %v9237_v12  ;;  %v9238_v26 = vld [vmem:[#allocation108_spill] sm:$0xff] }
 0x378   : > { %3803 = vst [vmem:[%s7923_s28 + $0x270] sm:$0xff] %v3649_v5  ;;  %v2983_v20 = vmul.f32 %v7830_v24, %v9238_v26  ;;  %v2991_v24 = vmul.f32 %v9243_v49, %v9244_v28  ;;  %v9257_v26 = vld [vmem:[#allocation109_spill] sm:$0xff] }
 0x379   : > { %3804 = vst.msk [vmem:[%s7923_s28 + $0x278] sm:$0xff] %vm334_vm0, %v3650_v19  ;;  %v3265_v4 = vpop.permute.xlu0 %3264  ;;  %v9239_v19 = vld [vmem:[#allocation97_spill] sm:$0xff] }
 0x37a   : > { %v3509_v59 = vadd.f32 %v3265_v4, %v2970_v51  ;;  %v3510_v30 = vadd.f32 %v3265_v4, %v2971_v35  ;;  %3819 = vst [vmem:[%s7923_s28 + $0x2f0] sm:$0xff] %v3665_v0  ;;  %v9240_v0 = vld [vmem:[#allocation164_spill] sm:$0xff] }
 0x37b   : > { %v3245_v36 = vpop.permute.xlu1 %3244  ;;  %3820 = vst.msk [vmem:[%s7923_s28 + $0x2f8] sm:$0xff] %vm334_vm0, %v3666_v10  ;;  %v3285_v14 = vpop.permute.xlu2 %3284  ;;  %v2974_v10 = vmul.f32 %v9240_v0, %v9239_v19  ;;  %v2975_v51 = vmul.f32 %v9240_v0, %v9241_v41  ;;  %v9242_v4 = vld [vmem:[#allocation116_spill] sm:$0xff]  ;;  %v9259_v19 = vld [vmem:[#allocation106_spill] sm:$0xff] }
 0x37c   : > { %v3663_v16 = vmax.f32 %v3509_v59, 0.0  ;;  %v3664_v47 = vmax.f32 %v3510_v30, 0.0  ;;  %v3501_v23 = vadd.f32 %v3245_v36, %v2962_v21  ;;  %v3502_v54 = vadd.f32 %v3245_v36, %v2963_v61 }
 0x37d   : > { %v3517_v29 = vadd.f32 %v3285_v14, %v2978_v1  ;;  %v3518_v48 = vadd.f32 %v3285_v14, %v2979_v15  ;;  %v2990_v21 = vmul.f32 %v9243_v49, %v9242_v4  ;;  %v9262_v4 = vld [vmem:[#allocation125_spill] sm:$0xff] }
 0x37e   : > { %3817 = vst [vmem:[%s7923_s28 + $0x2e0] sm:$0xff] %v3663_v16  ;;  %v3655_v34 = vmax.f32 %v3501_v23, 0.0  ;;  %v3656_v45 = vmax.f32 %v3502_v54, 0.0  ;;  %v9245_v54 = vld [vmem:[#allocation117_spill] sm:$0xff] }
 0x37f   : > { %3818 = vst.msk [vmem:[%s7923_s28 + $0x2e8] sm:$0xff] %vm334_vm0, %v3664_v47  ;;  %v3671_v55 = vmax.f32 %v3517_v29, 0.0  ;;  %v3672_v2 = vmax.f32 %v3518_v48, 0.0  ;;  %v9246_v29 = vld [vmem:[#allocation158_spill] sm:$0xff] }
 0x380   : > { %3809 = vst [vmem:[%s7923_s28 + $0x2a0] sm:$0xff] %v3655_v34  ;;  %v2988_v48 = vmul.f32 %v9246_v29, %v9245_v54  ;;  %v9247_v34 = vld [vmem:[#allocation114_spill] sm:$0xff] }
 0x381   : > { %3810 = vst.msk [vmem:[%s7923_s28 + $0x2a8] sm:$0xff] %vm334_vm0, %v3656_v45  ;;  %v3280_v56 = vpop.permute.xlu0 %3279  ;;  %v2989_v45 = vmul.f32 %v9246_v29, %v9247_v34  ;;  %v9265_v54 = vld [vmem:[#allocation126_spill] sm:$0xff]  ;;  %v9266_v34 = vld [vmem:[#allocation115_spill] sm:$0xff] }
 0x382   : > { %v3515_v32 = vadd.f32 %v3280_v56, %v2976_v3  ;;  %v3516_v62 = vadd.f32 %v3280_v56, %v2977_v22  ;;  %3825 = vst [vmem:[%s7923_s28 + $0x320] sm:$0xff] %v3671_v55  ;;  %v2981_v22 = vmul.f32 %v9249_v33, %v9250_v44 }
 0x383   : > { %v3260_v63 = vpop.permute.xlu1 %3259  ;;  %3826 = vst.msk [vmem:[%s7923_s28 + $0x328] sm:$0xff] %vm334_vm0, %v3672_v2  ;;  %v3300_v25 = vpop.permute.xlu2 %3299  ;;  %v9248_v2 = vld [vmem:[#allocation103_spill] sm:$0xff] }
 0x384   : > { %v3669_v13 = vmax.f32 %v3515_v32, 0.0  ;;  %v3670_v6 = vmax.f32 %v3516_v62, 0.0  ;;  %v3507_v27 = vadd.f32 %v3260_v63, %v2968_v57  ;;  %v3508_v11 = vadd.f32 %v3260_v63, %v2969_v17  ;;  %v9251_v57 = vld [vmem:[#allocation122_spill] sm:$0xff]  ;;  %v9253_v32 = vld [vmem:[#allocation119_spill] sm:$0xff] }
 0x385   : > { %v3523_v46 = vadd.f32 %v3300_v25, %v2984_v50  ;;  %v3524_v9 = vadd.f32 %v3300_v25, %v2985_v40  ;;  %v2980_v3 = vmul.f32 %v9249_v33, %v9248_v2  ;;  %v2996_v17 = vmul.f32 %v9252_v42, %v9251_v57  ;;  %v9268_v2 = vld [vmem:[#allocation112_spill] sm:$0xff]  ;;  %v9271_v57 = vld [vmem:[#allocation131_spill] sm:$0xff] }
 0x386   : > { %3823 = vst [vmem:[%s7923_s28 + $0x310] sm:$0xff] %v3669_v13  ;;  %v3661_v43 = vmax.f32 %v3507_v27, 0.0  ;;  %v3662_v53 = vmax.f32 %v3508_v11, 0.0  ;;  %v2997_v62 = vmul.f32 %v9252_v42, %v9253_v32 }
 0x387   : > { %3824 = vst.msk [vmem:[%s7923_s28 + $0x318] sm:$0xff] %vm334_vm0, %v3670_v6  ;;  %v3677_v8 = vmax.f32 %v3523_v46, 0.0  ;;  %v3678_v52 = vmax.f32 %v3524_v9, 0.0 }
 0x388   : > { %3815 = vst [vmem:[%s7923_s28 + $0x2d0] sm:$0xff] %v3661_v43  ;;  %v9254_v43 = vld [vmem:[#allocation123_spill] sm:$0xff] }
 0x389   : > { %3816 = vst.msk [vmem:[%s7923_s28 + $0x2d8] sm:$0xff] %vm334_vm0, %v3662_v53  ;;  %v3295_v5 = vpop.permute.xlu0 %3294  ;;  %v9255_v53 = vld [vmem:[#allocation159_spill] sm:$0xff] }
 0x38a   : > { %v3521_v18 = vadd.f32 %v3295_v5, %v2982_v38  ;;  %v3522_v35 = vadd.f32 %v3295_v5, %v2983_v20  ;;  %3831 = vst [vmem:[%s7923_s28 + $0x350] sm:$0xff] %v3677_v8  ;;  %v2994_v8 = vmul.f32 %v9255_v53, %v9254_v43  ;;  %v9258_v20 = vld [vmem:[#allocation157_spill] sm:$0xff]  ;;  %v9274_v43 = vld [vmem:[#allocation132_spill] sm:$0xff] }
 0x38b   : > { %v3275_v61 = vpop.permute.xlu1 %3274  ;;  %3832 = vst.msk [vmem:[%s7923_s28 + $0x358] sm:$0xff] %vm334_vm0, %v3678_v52  ;;  %v3315_v59 = vpop.permute.xlu2 %3314  ;;  %v9256_v52 = vld [vmem:[#allocation120_spill] sm:$0xff]  ;;  %v2986_v5 = vmul.f32 %v9258_v20, %v9257_v26  ;;  %v2987_v0 = vmul.f32 %v9258_v20, %v9259_v19  ;;  %v9277_v26 = vld [vmem:[#allocation118_spill] sm:$0xff] }
 0x38c   : > { %v3675_v30 = vmax.f32 %v3521_v18, 0.0  ;;  %v3676_v39 = vmax.f32 %v3522_v35, 0.0  ;;  %v3513_v1 = vadd.f32 %v3275_v61, %v2974_v10  ;;  %v3514_v58 = vadd.f32 %v3275_v61, %v2975_v51  ;;  %v9260_v51 = vld [vmem:[#allocation128_spill] sm:$0xff]  ;;  %v9261_v18 = vld [vmem:[#allocation175_spill] sm:$0xff] }
 0x38d   : > { %v3529_v15 = vadd.f32 %v3315_v59, %v2990_v21  ;;  %v3530_v36 = vadd.f32 %v3315_v59, %v2991_v24  ;;  %v2995_v12 = vmul.f32 %v9255_v53, %v9256_v52  ;;  %v3002_v35 = vmul.f32 %v9261_v18, %v9260_v51  ;;  %v9275_v52 = vld [vmem:[#allocation121_spill] sm:$0xff] }
 0x38e   : > { %3829 = vst [vmem:[%s7923_s28 + $0x340] sm:$0xff] %v3675_v30  ;;  %v3667_v14 = vmax.f32 %v3513_v1, 0.0  ;;  %v3668_v16 = vmax.f32 %v3514_v58, 0.0  ;;  %v3003_v49 = vmul.f32 %v9261_v18, %v9262_v4  ;;  %v9280_v51 = vld [vmem:[#allocation137_spill] sm:$0xff] }
 0x38f   : > { %3830 = vst.msk [vmem:[%s7923_s28 + $0x348] sm:$0xff] %vm334_vm0, %v3676_v39  ;;  %v3683_v47 = vmax.f32 %v3529_v15, 0.0  ;;  %v3684_v23 = vmax.f32 %v3530_v36, 0.0 }
 0x390   : > { %3821 = vst [vmem:[%s7923_s28 + $0x300] sm:$0xff] %v3667_v14 }
 0x391   : > { %3822 = vst.msk [vmem:[%s7923_s28 + $0x308] sm:$0xff] %vm334_vm0, %v3668_v16  ;;  %v3310_v55 = vpop.permute.xlu0 %3309  ;;  %v9263_v16 = vld [vmem:[#allocation129_spill] sm:$0xff] }
 0x392   : > { %v3527_v56 = vadd.f32 %v3310_v55, %v2988_v48  ;;  %v3528_v7 = vadd.f32 %v3310_v55, %v2989_v45  ;;  %3837 = vst [vmem:[%s7923_s28 + $0x380] sm:$0xff] %v3683_v47  ;;  %v9264_v47 = vld [vmem:[#allocation167_spill] sm:$0xff]  ;;  %v9267_v45 = vld [vmem:[#allocation166_spill] sm:$0xff] }
 0x393   : > { %v3290_v60 = vpop.permute.xlu1 %3289  ;;  %3838 = vst.msk [vmem:[%s7923_s28 + $0x388] sm:$0xff] %vm334_vm0, %v3684_v23  ;;  %v3330_v50 = vpop.permute.xlu2 %3329  ;;  %v3000_v23 = vmul.f32 %v9264_v47, %v9263_v16  ;;  %v3001_v29 = vmul.f32 %v9264_v47, %v9265_v54  ;;  %v2992_v55 = vmul.f32 %v9267_v45, %v9266_v34  ;;  %v2993_v33 = vmul.f32 %v9267_v45, %v9268_v2  ;;  %v9283_v16 = vld [vmem:[#allocation138_spill] sm:$0xff]  ;;  %v9284_v54 = vld [vmem:[#allocation127_spill] sm:$0xff]  ;;  %v9286_v34 = vld [vmem:[#allocation124_spill] sm:$0xff] }
 0x394   : > { %v3681_v37 = vmax.f32 %v3527_v56, 0.0  ;;  %v3682_v40 = vmax.f32 %v3528_v7, 0.0  ;;  %v3519_v63 = vadd.f32 %v3290_v60, %v2980_v3  ;;  %v3520_v25 = vadd.f32 %v3290_v60, %v2981_v22  ;;  %v9269_v22 = vld [vmem:[#allocation134_spill] sm:$0xff] }
 0x395   : > { %v3535_v13 = vadd.f32 %v3330_v50, %v2996_v17  ;;  %v3536_v6 = vadd.f32 %v3330_v50, %v2997_v62  ;;  %v9270_v56 = vld [vmem:[#allocation178_spill] sm:$0xff] }
 0x396   : > { %3835 = vst [vmem:[%s7923_s28 + $0x370] sm:$0xff] %v3681_v37  ;;  %v3673_v27 = vmax.f32 %v3519_v63, 0.0  ;;  %v3674_v11 = vmax.f32 %v3520_v25, 0.0  ;;  %v3008_v7 = vmul.f32 %v9270_v56, %v9269_v22  ;;  %v3009_v42 = vmul.f32 %v9270_v56, %v9271_v57  ;;  %v9289_v22 = vld [vmem:[#allocation143_spill] sm:$0xff] }
 0x397   : > { %3836 = vst.msk [vmem:[%s7923_s28 + $0x378] sm:$0xff] %vm334_vm0, %v3682_v40  ;;  %v3689_v46 = vmax.f32 %v3535_v13, 0.0  ;;  %v3690_v9 = vmax.f32 %v3536_v6, 0.0 }
 0x398   : > { %3827 = vst [vmem:[%s7923_s28 + $0x330] sm:$0xff] %v3673_v27 }
 0x399   : > { %3828 = vst.msk [vmem:[%s7923_s28 + $0x338] sm:$0xff] %vm334_vm0, %v3674_v11  ;;  %v3325_v38 = vpop.permute.xlu0 %3324  ;;  %v9272_v11 = vld [vmem:[#allocation135_spill] sm:$0xff] }
 0x39a   : > { %v3533_v10 = vadd.f32 %v3325_v38, %v2994_v8  ;;  %v3534_v41 = vadd.f32 %v3325_v38, %v2995_v12  ;;  %3843 = vst [vmem:[%s7923_s28 + $0x3b0] sm:$0xff] %v3689_v46  ;;  %v9273_v46 = vld [vmem:[#allocation170_spill] sm:$0xff]  ;;  %v9276_v12 = vld [vmem:[#allocation168_spill] sm:$0xff] }
 0x39b   : > { %v3305_v21 = vpop.permute.xlu1 %3304  ;;  %3844 = vst.msk [vmem:[%s7923_s28 + $0x3b8] sm:$0xff] %vm334_vm0, %v3690_v9  ;;  %v3345_v28 = vpop.permute.xlu2 %3344  ;;  %v3006_v9 = vmul.f32 %v9273_v46, %v9272_v11  ;;  %v3007_v53 = vmul.f32 %v9273_v46, %v9274_v43  ;;  %v2998_v38 = vmul.f32 %v9276_v12, %v9275_v52  ;;  %v2999_v20 = vmul.f32 %v9276_v12, %v9277_v26  ;;  %v9292_v11 = vld [vmem:[#allocation144_spill] sm:$0xff]  ;;  %v9293_v43 = vld [vmem:[#allocation133_spill] sm:$0xff]  ;;  %v9295_v52 = vld [vmem:[#allocation130_spill] sm:$0xff] }
 0x39c   : > { %v3687_v24 = vmax.f32 %v3533_v10, 0.0  ;;  %v3688_v61 = vmax.f32 %v3534_v41, 0.0  ;;  %v3525_v59 = vadd.f32 %v3305_v21, %v2986_v5  ;;  %v3526_v30 = vadd.f32 %v3305_v21, %v2987_v0  ;;  %v9278_v0 = vld [vmem:[#allocation140_spill] sm:$0xff]  ;;  %v9279_v10 = vld [vmem:[#allocation181_spill] sm:$0xff] }
 0x39d   : > { %v3541_v39 = vadd.f32 %v3345_v28, %v3002_v35  ;;  %v3542_v1 = vadd.f32 %v3345_v28, %v3003_v49  ;;  %v3014_v41 = vmul.f32 %v9279_v10, %v9278_v0  ;;  %v3015_v18 = vmul.f32 %v9279_v10, %v9280_v51 }
 0x39e   : > { %3841 = vst [vmem:[%s7923_s28 + $0x3a0] sm:$0xff] %v3687_v24  ;;  %v3679_v58 = vmax.f32 %v3525_v59, 0.0  ;;  %v3680_v15 = vmax.f32 %v3526_v30, 0.0 }
 0x39f   : > { %3842 = vst.msk [vmem:[%s7923_s28 + $0x3a8] sm:$0xff] %vm334_vm0, %v3688_v61  ;;  %v3695_v36 = vmax.f32 %v3541_v39, 0.0  ;;  %v3696_v14 = vmax.f32 %v3542_v1, 0.0 }
 0x3a0   : > { %3833 = vst [vmem:[%s7923_s28 + $0x360] sm:$0xff] %v3679_v58 }
 0x3a1   : > { %3834 = vst.msk [vmem:[%s7923_s28 + $0x368] sm:$0xff] %vm334_vm0, %v3680_v15  ;;  %v3340_v48 = vpop.permute.xlu0 %3339  ;;  %v9281_v15 = vld [vmem:[#allocation141_spill] sm:$0xff] }
 0x3a2   : > { %v3539_v3 = vadd.f32 %v3340_v48, %v3000_v23  ;;  %v3540_v44 = vadd.f32 %v3340_v48, %v3001_v29  ;;  %3849 = vst [vmem:[%s7923_s28 + $0x3e0] sm:$0xff] %v3695_v36  ;;  %v9282_v36 = vld [vmem:[#allocation173_spill] sm:$0xff]  ;;  %v9285_v29 = vld [vmem:[#allocation171_spill] sm:$0xff] }
 0x3a3   : > { %v3320_v17 = vpop.permute.xlu1 %3319  ;;  %3850 = vst.msk [vmem:[%s7923_s28 + $0x3e8] sm:$0xff] %vm334_vm0, %v3696_v14  ;;  %v3360_v32 = vpop.permute.xlu2 %3359  ;;  %v3012_v14 = vmul.f32 %v9282_v36, %v9281_v15  ;;  %v3013_v47 = vmul.f32 %v9282_v36, %v9283_v16  ;;  %v3004_v48 = vmul.f32 %v9285_v29, %v9284_v54  ;;  %v3005_v45 = vmul.f32 %v9285_v29, %v9286_v34  ;;  %v9301_v36 = vld [vmem:[#allocation139_spill] sm:$0xff] }
 0x3a4   : > { %v3693_v62 = vmax.f32 %v3539_v3, 0.0  ;;  %v3694_v60 = vmax.f32 %v3540_v44, 0.0  ;;  %v3531_v50 = vadd.f32 %v3320_v17, %v2992_v55  ;;  %v3532_v37 = vadd.f32 %v3320_v17, %v2993_v33  ;;  %v9287_v33 = vld [vmem:[#allocation146_spill] sm:$0xff]  ;;  %v9288_v3 = vld [vmem:[#allocation41_spill] sm:$0xff] }
 0x3a5   : > { %v3547_v40 = vadd.f32 %v3360_v32, %v3008_v7  ;;  %v3548_v63 = vadd.f32 %v3360_v32, %v3009_v42  ;;  %v3020_v44 = vmul.f32 %v9288_v3, %v9287_v33  ;;  %v3021_v56 = vmul.f32 %v9288_v3, %v9289_v22  ;;  %v9305_v22 = vld [vmem:[#allocation182_spill] sm:$0xff] }
 0x3a6   : > { %3847 = vst [vmem:[%s7923_s28 + $0x3d0] sm:$0xff] %v3693_v62  ;;  %v3685_v25 = vmax.f32 %v3531_v50, 0.0  ;;  %v3686_v13 = vmax.f32 %v3532_v37, 0.0 }
 0x3a7   : > { %3848 = vst.msk [vmem:[%s7923_s28 + $0x3d8] sm:$0xff] %vm334_vm0, %v3694_v60  ;;  %v3701_v6 = vmax.f32 %v3547_v40, 0.0  ;;  %v3702_v27 = vmax.f32 %v3548_v63, 0.0 }
 0x3a8   : > { %3839 = vst [vmem:[%s7923_s28 + $0x390] sm:$0xff] %v3685_v25 }
 0x3a9   : > { %3840 = vst.msk [vmem:[%s7923_s28 + $0x398] sm:$0xff] %vm334_vm0, %v3686_v13  ;;  %v3355_v8 = vpop.permute.xlu0 %3354  ;;  %v9290_v13 = vld [vmem:[#allocation147_spill] sm:$0xff] }
 0x3aa   : > { %v3545_v5 = vadd.f32 %v3355_v8, %v3006_v9  ;;  %v3546_v19 = vadd.f32 %v3355_v8, %v3007_v53  ;;  %3855 = vst [vmem:[%s7923_s28 + $0x410] sm:$0xff] %v3701_v6  ;;  %v9291_v6 = vld [vmem:[#allocation176_spill] sm:$0xff]  ;;  %v9294_v53 = vld [vmem:[#allocation174_spill] sm:$0xff] }
 0x3ab   : > { %v3335_v35 = vpop.permute.xlu1 %3334  ;;  %3856 = vst.msk [vmem:[%s7923_s28 + $0x418] sm:$0xff] %vm334_vm0, %v3702_v27  ;;  %v3375_v4 = vpop.permute.xlu2 %3374  ;;  %v3018_v27 = vmul.f32 %v9291_v6, %v9290_v13  ;;  %v3019_v46 = vmul.f32 %v9291_v6, %v9292_v11  ;;  %v3010_v8 = vmul.f32 %v9294_v53, %v9293_v43  ;;  %v3011_v12 = vmul.f32 %v9294_v53, %v9295_v52  ;;  %v9311_v43 = vld [vmem:[#allocation183_spill] sm:$0xff] }
 0x3ac   : > { %v3699_v49 = vmax.f32 %v3545_v5, 0.0  ;;  %v3700_v21 = vmax.f32 %v3546_v19, 0.0  ;;  %v3537_v28 = vadd.f32 %v3335_v35, %v2998_v38  ;;  %v3538_v24 = vadd.f32 %v3335_v35, %v2999_v20  ;;  %v9296_v20 = vld [vmem:[#allocation152_spill] sm:$0xff]  ;;  %v9297_v19 = vld [vmem:[#allocation149_spill] sm:$0xff] }
 0x3ad   : > { %v3553_v61 = vadd.f32 %v3375_v4, %v3014_v41  ;;  %v3554_v59 = vadd.f32 %v3375_v4, %v3015_v18  ;;  %v3026_v5 = vmul.f32 %v7936_v31, %v9296_v20  ;;  %v3027_v0 = vmul.f32 %v7936_v31, %v9297_v19 }
 0x3ae   : > { %3853 = vst [vmem:[%s7923_s28 + $0x400] sm:$0xff] %v3699_v49  ;;  %v3691_v30 = vmax.f32 %v3537_v28, 0.0  ;;  %v3692_v39 = vmax.f32 %v3538_v24, 0.0 }
 0x3af   : > { %3854 = vst.msk [vmem:[%s7923_s28 + $0x408] sm:$0xff] %vm334_vm0, %v3700_v21  ;;  %v3707_v1 = vmax.f32 %v3553_v61, 0.0  ;;  %v3708_v58 = vmax.f32 %v3554_v59, 0.0  ;;  %v9298_v59 = vld [vmem:[#allocation153_spill] sm:$0xff] }
 0x3b0   : > { %3845 = vst [vmem:[%s7923_s28 + $0x3c0] sm:$0xff] %v3691_v30  ;;  %v9299_v30 = vld [vmem:[#allocation179_spill] sm:$0xff] }
 0x3b1   : > { %3846 = vst.msk [vmem:[%s7923_s28 + $0x3c8] sm:$0xff] %vm334_vm0, %v3692_v39  ;;  %v3370_v23 = vpop.permute.xlu0 %3369  ;;  %v3024_v39 = vmul.f32 %v9299_v30, %v9298_v59 }
 0x3b2   : > { %v3551_v55 = vadd.f32 %v3370_v23, %v3012_v14  ;;  %v3552_v2 = vadd.f32 %v3370_v23, %v3013_v47  ;;  %3861 = vst [vmem:[%s7923_s28 + $0x440] sm:$0xff] %v3707_v1  ;;  %v9300_v1 = vld [vmem:[#allocation150_spill] sm:$0xff]  ;;  %v9302_v14 = vld [vmem:[#allocation177_spill] sm:$0xff]  ;;  %v9303_v47 = vld [vmem:[#allocation136_spill] sm:$0xff] }
 0x3b3   : > { %v3350_v7 = vpop.permute.xlu1 %3349  ;;  %3862 = vst.msk [vmem:[%s7923_s28 + $0x448] sm:$0xff] %vm334_vm0, %v3708_v58  ;;  %v3390_v57 = vpop.permute.xlu2 %3389  ;;  %v3025_v58 = vmul.f32 %v9299_v30, %v9300_v1  ;;  %v3016_v16 = vmul.f32 %v9302_v14, %v9301_v36  ;;  %v3017_v23 = vmul.f32 %v9302_v14, %v9303_v47 }
 0x3b4   : > { %v3705_v42 = vmax.f32 %v3551_v55, 0.0  ;;  %v3706_v17 = vmax.f32 %v3552_v2, 0.0  ;;  %v3543_v32 = vadd.f32 %v3350_v7, %v3004_v48  ;;  %v3544_v62 = vadd.f32 %v3350_v7, %v3005_v45  ;;  %v9306_v7 = vld [vmem:[#allocation154_spill] sm:$0xff] }
 0x3b5   : > { %v3559_v60 = vadd.f32 %v3390_v57, %v3020_v44  ;;  %v3560_v50 = vadd.f32 %v3390_v57, %v3021_v56  ;;  %v9304_v44 = vld [vmem:[#allocation155_spill] sm:$0xff]  ;;  %v3031_v57 = vmul.f32 %v9305_v22, %v9306_v7 }
 0x3b6   : > { %3859 = vst [vmem:[%s7923_s28 + $0x430] sm:$0xff] %v3705_v42  ;;  %v3697_v37 = vmax.f32 %v3543_v32, 0.0  ;;  %v3698_v40 = vmax.f32 %v3544_v62, 0.0  ;;  %v3030_v56 = vmul.f32 %v9305_v22, %v9304_v44  ;;  %v9308_v32 = vld [vmem:[#allocation180_spill] sm:$0xff] }
 0x3b7   : > { %3860 = vst.msk [vmem:[%s7923_s28 + $0x438] sm:$0xff] %vm334_vm0, %v3706_v17  ;;  %v3713_v63 = vmax.f32 %v3559_v60, 0.0  ;;  %v3714_v25 = vmax.f32 %v3560_v50, 0.0  ;;  %v9307_v17 = vld [vmem:[#allocation145_spill] sm:$0xff]  ;;  %v9309_v60 = vld [vmem:[#allocation142_spill] sm:$0xff] }
 0x3b8   : > { %3851 = vst [vmem:[%s7923_s28 + $0x3f0] sm:$0xff] %v3697_v37  ;;  %v3022_v62 = vmul.f32 %v9308_v32, %v9307_v17  ;;  %v3023_v50 = vmul.f32 %v9308_v32, %v9309_v60 }
 0x3b9   : > { %3852 = vst.msk [vmem:[%s7923_s28 + $0x3f8] sm:$0xff] %vm334_vm0, %v3698_v40  ;;  %v3385_v9 = vpop.permute.xlu0 %3384 }
 0x3ba   : > { %v3557_v38 = vadd.f32 %v3385_v9, %v3018_v27  ;;  %v3558_v26 = vadd.f32 %v3385_v9, %v3019_v46  ;;  %3867 = vst [vmem:[%s7923_s28 + $0x470] sm:$0xff] %v3713_v63  ;;  %v9310_v9 = vld [vmem:[#allocation151_spill] sm:$0xff] }
 0x3bb   : > { %v3365_v10 = vpop.permute.xlu1 %3364  ;;  %3868 = vst.msk [vmem:[%s7923_s28 + $0x478] sm:$0xff] %vm334_vm0, %v3714_v25  ;;  %v3405_v41 = vpop.permute.xlu2 %3404  ;;  %v3028_v53 = vmul.f32 %v9311_v43, %v9310_v9 }
 0x3bc   : > { %v3711_v51 = vmax.f32 %v3557_v38, 0.0  ;;  %v3712_v18 = vmax.f32 %v3558_v26, 0.0  ;;  %v3549_v35 = vadd.f32 %v3365_v10, %v3010_v8  ;;  %v3550_v4 = vadd.f32 %v3365_v10, %v3011_v12  ;;  %v9312_v8 = vld [vmem:[#allocation148_spill] sm:$0xff] }
 0x3bd   : > { %v3565_v49 = vadd.f32 %v3405_v41, %v3026_v5  ;;  %v3566_v21 = vadd.f32 %v3405_v41, %v3027_v0  ;;  %v3029_v52 = vmul.f32 %v9311_v43, %v9312_v8 }
 0x3be   : > { %3865 = vst [vmem:[%s7923_s28 + $0x460] sm:$0xff] %v3711_v51  ;;  %v3703_v28 = vmax.f32 %v3549_v35, 0.0  ;;  %v3704_v24 = vmax.f32 %v3550_v4, 0.0 }
 0x3bf   : > { %3866 = vst.msk [vmem:[%s7923_s28 + $0x468] sm:$0xff] %vm334_vm0, %v3712_v18  ;;  %v3719_v31 = vmax.f32 %v3565_v49, 0.0  ;;  %v3720_v61 = vmax.f32 %v3566_v21, 0.0 }
 0x3c0   : > { %3857 = vst [vmem:[%s7923_s28 + $0x420] sm:$0xff] %v3703_v28 }
 0x3c1   : > { %3858 = vst.msk [vmem:[%s7923_s28 + $0x428] sm:$0xff] %vm334_vm0, %v3704_v24  ;;  %v3400_v15 = vpop.permute.xlu0 %3399 }
 0x3c2   : > { %v3563_v54 = vadd.f32 %v3400_v15, %v3024_v39  ;;  %v3564_v29 = vadd.f32 %v3400_v15, %v3025_v58  ;;  %3873 = vst [vmem:[%s7923_s28 + $0x4a0] sm:$0xff] %v3719_v31 }
 0x3c3   : > { %v3380_v48 = vpop.permute.xlu1 %3379  ;;  %3874 = vst.msk [vmem:[%s7923_s28 + $0x4a8] sm:$0xff] %vm334_vm0, %v3720_v61 }
 0x3c4   : > { %v3717_v34 = vmax.f32 %v3563_v54, 0.0  ;;  %v3718_v45 = vmax.f32 %v3564_v29, 0.0  ;;  %v3555_v55 = vadd.f32 %v3380_v48, %v3016_v16  ;;  %v3556_v2 = vadd.f32 %v3380_v48, %v3017_v23 }
 0x3c6   : > { %3871 = vst [vmem:[%s7923_s28 + $0x490] sm:$0xff] %v3717_v34  ;;  %v3709_v33 = vmax.f32 %v3555_v55, 0.0  ;;  %v3710_v3 = vmax.f32 %v3556_v2, 0.0 }
 0x3c7   : > { %3872 = vst.msk [vmem:[%s7923_s28 + $0x498] sm:$0xff] %vm334_vm0, %v3718_v45 }
 0x3c8   : > { %3863 = vst [vmem:[%s7923_s28 + $0x450] sm:$0xff] %v3709_v33 }
 0x3c9   : > { %3864 = vst.msk [vmem:[%s7923_s28 + $0x458] sm:$0xff] %vm334_vm0, %v3710_v3  ;;  %v3415_v42 = vpop.permute.xlu0 %3414 }
 0x3ca   : > { %v3569_v37 = vadd.f32 %v3415_v42, %v3030_v56  ;;  %v3570_v40 = vadd.f32 %v3415_v42, %v3031_v57 }
 0x3cb   : > { %v3395_v63 = vpop.permute.xlu1 %3394 }
 0x3cc   : > { %v3723_v25 = vmax.f32 %v3569_v37, 0.0  ;;  %v3724_v13 = vmax.f32 %v3570_v40, 0.0  ;;  %v3561_v6 = vadd.f32 %v3395_v63, %v3022_v62  ;;  %v3562_v27 = vadd.f32 %v3395_v63, %v3023_v50 }
 0x3ce   : > { %3877 = vst [vmem:[%s7923_s28 + $0x4c0] sm:$0xff] %v3723_v25  ;;  %v3715_v11 = vmax.f32 %v3561_v6, 0.0  ;;  %v3716_v46 = vmax.f32 %v3562_v27, 0.0 }
 0x3cf   : > { %3878 = vst.msk [vmem:[%s7923_s28 + $0x4c8] sm:$0xff] %vm334_vm0, %v3724_v13 }
 0x3d0   : > { %3869 = vst [vmem:[%s7923_s28 + $0x480] sm:$0xff] %v3715_v11 }
 0x3d1   : > { %3870 = vst.msk [vmem:[%s7923_s28 + $0x488] sm:$0xff] %vm334_vm0, %v3716_v46 }
 0x3d3   : > { %v3410_v12 = vpop.permute.xlu1 %3409 }
 0x3d4   : > { %v3567_v38 = vadd.f32 %v3410_v12, %v3028_v53  ;;  %v3568_v26 = vadd.f32 %v3410_v12, %v3029_v52 }
 0x3d6   : > { %v3721_v20 = vmax.f32 %v3567_v38, 0.0  ;;  %v3722_v5 = vmax.f32 %v3568_v26, 0.0 }
 0x3d8   : > { %3875 = vst [vmem:[%s7923_s28 + $0x4b0] sm:$0xff] %v3721_v20 }
 0x3d9   : > { %3876 = vst.msk [vmem:[%s7923_s28 + $0x4b8] sm:$0xff] %vm334_vm0, %v3722_v5 }
 0x3da PF: > { %s13_s12 = sadd.s32 1, %s4228_s12  }
 0x3db   : > { %p10_p4 = scmp.ge.s32.totalorder %s13_s12, 4  }
 0x3dd   :  { %12 = sbr.rel (!%p10_p4) target bundleno = 1 (0x1), region = 64 }

</bundles_post_ra>
